<compile_context>
chip_gen: v5e
topology: v5e:2x2
jax: 0.10.0
libtpu: 0.0.40
codegen_flags: <defaults>
</compile_context>

<pallas_src>
import functools

import jax
import jax.numpy as jnp
from jax.experimental import pallas as pl
from jax.experimental.pallas import tpu as pltpu


def _encoder_kernel(x_ref, mask_ref, wih_ref, whh_ref, b_ref, out_ref,
                    act_f_ref, act_b_ref, gin_f_ref, gin_b_ref,
                    *, T, H, L, bt):
    """One batch tile of the whole multi-layer bidirectional LSTM encoder.

    x_ref    : [1, T*bt, H]      time-major input slab (row t*bt+j = time t, batch j)
    mask_ref : [1, T*bt, H]      1.0 where t < length[j], else 0.0
    wih_ref  : [L, 2, H, 8H]     input weights; [:,0]=rows for fwd-part of input (or x for l=0),
                                 [:,1]=rows for bwd-part; columns = [fwd gates | bwd gates]
    whh_ref  : [L, 2, H, 4H]     recurrent weights per direction
    b_ref    : [L, 1, 8H]        combined bias (b_ih + b_hh) per direction
    out_ref  : [bt, 2H]          concat(final c_fwd, final c_bwd) of the last layer
    """
    H4 = 4 * H

    for l in range(L):                                   # static layer loop (fused encoder)
        # ---- hoisted input projection: one wide MXU matmul per layer (off the serial path) ----
        w_in_f = wih_ref[l, 0]                           # [H, 8H]
        w_in_b = wih_ref[l, 1]                           # [H, 8H]
        bias = b_ref[l]                                  # [1, 8H]
        if l == 0:
            g_in = jnp.dot(x_ref[0], w_in_f,
                           preferred_element_type=jnp.float32) + bias
        else:
            g_in = (jnp.dot(act_f_ref[...], w_in_f, preferred_element_type=jnp.float32)
                    + jnp.dot(act_b_ref[...], w_in_b, preferred_element_type=jnp.float32)
                    + bias)
        gin_f_ref[...] = g_in[:, :H4]                    # vreg-aligned lane split (4H = 128)
        gin_b_ref[...] = g_in[:, H4:]

        whh_f = whh_ref[l, 0]                            # [H, 4H], loaded once per layer
        whh_b = whh_ref[l, 1]

        h_f = jnp.zeros((bt, H), jnp.float32)            # state carried in vregs
        c_f = jnp.zeros((bt, H), jnp.float32)
        h_b = jnp.zeros((bt, H), jnp.float32)
        c_b = jnp.zeros((bt, H), jnp.float32)

        last = l == L - 1
        for t in range(T):                               # fully unrolled; fwd t and bwd T-1-t fused
            s = T - 1 - t
            m_f = mask_ref[0, t * bt:(t + 1) * bt, :]    # [bt, H], tile-aligned static slice
            m_b = mask_ref[0, s * bt:(s + 1) * bt, :]

            gf = gin_f_ref[t * bt:(t + 1) * bt, :] + jnp.dot(
                h_f, whh_f, preferred_element_type=jnp.float32)
            gb = gin_b_ref[s * bt:(s + 1) * bt, :] + jnp.dot(
                h_b, whh_b, preferred_element_type=jnp.float32)

            # full-width nonlinearities (EUP slot), then gate slices (i, f, g, o order)
            sig_f = jax.nn.sigmoid(gf)
            tah_f = jnp.tanh(gf)
            sig_b = jax.nn.sigmoid(gb)
            tah_b = jnp.tanh(gb)

            cf_new = sig_f[:, H:2 * H] * c_f + sig_f[:, :H] * tah_f[:, 2 * H:3 * H]
            hf_new = sig_f[:, 3 * H:] * jnp.tanh(cf_new)
            cb_new = sig_b[:, H:2 * H] * c_b + sig_b[:, :H] * tah_b[:, 2 * H:3 * H]
            hb_new = sig_b[:, 3 * H:] * jnp.tanh(cb_new)

            # packed-sequence semantics: freeze state at t >= length
            keep_f = m_f > 0.0
            keep_b = m_b > 0.0
            h_f = jnp.where(keep_f, hf_new, h_f)
            c_f = jnp.where(keep_f, cf_new, c_f)
            h_b = jnp.where(keep_b, hb_new, h_b)
            c_b = jnp.where(keep_b, cb_new, c_b)

            if not last:                                 # last layer: no activation writeback at all
                act_f_ref[t * bt:(t + 1) * bt, :] = m_f * hf_new
                act_b_ref[s * bt:(s + 1) * bt, :] = m_b * hb_new

        if last:
            out_ref[:, :H] = c_f
            out_ref[:, H:] = c_b


def pack_params(layer_params, hidden):
    """Pack per-layer / per-direction LSTM weights into stacked kernel inputs."""
    H = hidden
    wih_stack, whh_stack, b_stack = [], [], []
    for l, (fwd, bwd) in enumerate(layer_params):
        wf, wb = fwd["wih"], bwd["wih"]                                  # [d_in, 4H]
        if l == 0:
            part0 = jnp.concatenate([wf, wb], axis=1)                    # [H, 8H]
            part1 = jnp.zeros((H, 8 * H), jnp.float32)                   # unused for layer 0
        else:
            part0 = jnp.concatenate([wf[:H], wb[:H]], axis=1)            # fwd-part input rows
            part1 = jnp.concatenate([wf[H:], wb[H:]], axis=1)            # bwd-part input rows
        wih_stack.append(jnp.stack([part0, part1], axis=0))              # [2, H, 8H]
        whh_stack.append(jnp.stack([fwd["whh"], bwd["whh"]], axis=0))    # [2, H, 4H]
        b_stack.append(jnp.concatenate([fwd["b"], bwd["b"]], axis=1))    # [1, 8H]
    return jnp.stack(wih_stack), jnp.stack(whh_stack), jnp.stack(b_stack)


@functools.partial(jax.jit, static_argnames=("batch_tile",))
def pass_ex_bert_encoder_forward(x_btd, lengths, layer_params, batch_tile=8):
    """x_btd: [B, T, embed] float32 (batch_first, like the PyTorch module)."""
    B, T, D = x_btd.shape
    H = layer_params[0][0]["whh"].shape[0]
    assert D == H, "PassExBertEncoder uses input_size == encoder_rnn_size"
    L = len(layer_params)
    bt = batch_tile
    nbt = -(-B // bt)
    B_pad = nbt * bt                                     # pad batch to full sublane tiles

    x_pad = jnp.zeros((B_pad, T, H), jnp.float32).at[:B].set(x_btd.astype(jnp.float32))
    len_pad = jnp.zeros((B_pad,), jnp.int32).at[:B].set(lengths.astype(jnp.int32))

    # time-major, grouped into [n_batch_tiles, T*bt, H] slabs (row t*bt+j = time t, batch j)
    def tile(a):                                         # a: [T, B_pad, H]
        return a.reshape(T, nbt, bt, H).transpose(1, 0, 2, 3).reshape(nbt, T * bt, H)

    x_tiles = tile(jnp.transpose(x_pad, (1, 0, 2)))
    mask = (jnp.arange(T)[:, None] < len_pad[None, :]).astype(jnp.float32)   # [T, B_pad]
    mask_tiles = tile(jnp.broadcast_to(mask[:, :, None], (T, B_pad, H)))

    wih_all, whh_all, b_all = pack_params(layer_params, H)

    kernel = functools.partial(_encoder_kernel, T=T, H=H, L=L, bt=bt)

    out = pl.pallas_call(
        kernel,
        out_shape=jax.ShapeDtypeStruct((B_pad, 2 * H), jnp.float32),
        grid=(nbt,),
        in_specs=[
            pl.BlockSpec((1, T * bt, H), lambda i: (i, 0, 0)),             # x slab
            pl.BlockSpec((1, T * bt, H), lambda i: (i, 0, 0)),             # mask slab
            pl.BlockSpec((L, 2, H, 8 * H), lambda i: (0, 0, 0, 0)),        # W_ih (packed)
            pl.BlockSpec((L, 2, H, 4 * H), lambda i: (0, 0, 0, 0)),        # W_hh
            pl.BlockSpec((L, 1, 8 * H), lambda i: (0, 0, 0)),              # bias
        ],
        out_specs=pl.BlockSpec((bt, 2 * H), lambda i: (i, 0)),
        scratch_shapes=[
            pltpu.VMEM((T * bt, H), jnp.float32),        # act_f: next-layer fwd input
            pltpu.VMEM((T * bt, H), jnp.float32),        # act_b: next-layer bwd input
            pltpu.VMEM((T * bt, 4 * H), jnp.float32),    # gin_f: hoisted fwd input gates
            pltpu.VMEM((T * bt, 4 * H), jnp.float32),    # gin_b: hoisted bwd input gates
        ],
        compiler_params=pltpu.CompilerParams(dimension_semantics=("parallel",)),
    )(x_tiles, mask_tiles, wih_all, whh_all, b_all)
    return out[:B]


def init_lstm_params(key, num_layers, hidden):
    """Deterministic synthetic params matching nn.LSTM(hidden, hidden, L, bidirectional)."""
    stdv = 1.0 / (hidden ** 0.5)
    layers = []
    for l in range(num_layers):
        d_in = hidden if l == 0 else 2 * hidden
        per_dir = []
        for _ in range(2):
            key, k1, k2, k3, k4 = jax.random.split(key, 5)
            wih = jax.random.uniform(k1, (4 * hidden, d_in), jnp.float32, -stdv, stdv)
            whh = jax.random.uniform(k2, (4 * hidden, hidden), jnp.float32, -stdv, stdv)
            b_ih = jax.random.uniform(k3, (4 * hidden,), jnp.float32, -stdv, stdv)
            b_hh = jax.random.uniform(k4, (4 * hidden,), jnp.float32, -stdv, stdv)
            per_dir.append({
                "wih": wih.T,                                   # [d_in, 4H]
                "whh": whh.T,                                   # [H, 4H]
                "b": (b_ih + b_hh).reshape(1, 4 * hidden),      # [1, 4H]
            })
        layers.append(tuple(per_dir))
    return layers


def encoder_reference(x_btd, lengths, layer_params):
    """Pure-JAX reference with identical packed-LSTM semantics (for validation)."""
    B, T, _ = x_btd.shape
    inp = x_btd
    c_f = c_b = None
    for fwd, bwd in layer_params:
        H = fwd["whh"].shape[0]

        def run(p, reverse):
            h = jnp.zeros((B, H), jnp.float32)
            c = jnp.zeros((B, H), jnp.float32)
            outs = [None] * T
            order = range(T - 1, -1, -1) if reverse else range(T)
            for t in order:
                x_t = inp[:, t, :]
                gates = x_t @ p["wih"] + h @ p["whh"] + p["b"]
                i_g = jax.nn.sigmoid(gates[:, :H])
                f_g = jax.nn.sigmoid(gates[:, H:2 * H])
                g_g = jnp.tanh(gates[:, 2 * H:3 * H])
                o_g = jax.nn.sigmoid(gates[:, 3 * H:])
                c_new = f_g * c + i_g * g_g
                h_new = o_g * jnp.tanh(c_new)
                mask = (lengths > t)[:, None]
                h = jnp.where(mask, h_new, h)
                c = jnp.where(mask, c_new, c)
                outs[t] = jnp.where(mask, h_new, 0.0)
            return jnp.stack(outs, axis=1), c

        out_f, c_f = run(fwd, False)
        out_b, c_b = run(bwd, True)
        inp = jnp.concatenate([out_f, out_b], axis=-1)
    return jnp.concatenate([c_f, c_b], axis=1)


if __name__ == "__main__":
    B, T, H, NUM_LAYERS = 4, 8, 32, 2          # encoder_rnn_size=32, encoder_num_layers=2
    key = jax.random.PRNGKey(0)
    kx, kp = jax.random.split(key)

    x = jax.random.normal(kx, (B, T, H), jnp.float32)          # [batch, seq, embed]
    input_lengths = jnp.array([8, 5, 3, 7], jnp.int32)         # variable lengths <= T
    params = init_lstm_params(kp, NUM_LAYERS, H)

    out = pass_ex_bert_encoder_forward(x, input_lengths, params)
    out = jax.block_until_ready(out)

    ref = encoder_reference(x, input_lengths, params)
    assert out.shape == (B, 2 * H), out.shape
    assert jnp.allclose(out, ref, atol=1e-4, rtol=1e-4), float(jnp.max(jnp.abs(out - ref)))
    print("KERNEL_OK")
</pallas_src>

<mosaic_0001>
module attributes {stable_mosaic.version = 11 : i64} {
  func.func @_encoder_kernel(%arg0: i32, %arg1: memref<1x64x32xf32, #tpu.memory_space<vmem>>, %arg2: memref<1x64x32xf32, #tpu.memory_space<vmem>>, %arg3: memref<2x2x32x256xf32, #tpu.memory_space<vmem>>, %arg4: memref<2x2x32x128xf32, #tpu.memory_space<vmem>>, %arg5: memref<2x1x256xf32, #tpu.memory_space<vmem>>, %arg6: memref<8x64xf32, #tpu.memory_space<vmem>>, %arg7: memref<64x32xf32, #tpu.memory_space<vmem>>, %arg8: memref<64x32xf32, #tpu.memory_space<vmem>>, %arg9: memref<64x128xf32, #tpu.memory_space<vmem>>, %arg10: memref<64x128xf32, #tpu.memory_space<vmem>>) attributes {dimension_semantics = [#tpu.dimension_semantics<parallel>], iteration_bounds = array<i64: 1>, scalar_prefetch = 0 : i64, scratch_operands = 4 : i64, tpu.core_type = #tpu.core_type<tc>, window_params = [{transform_indices = @transform_0, window_bounds = array<i64: 1, 64, 32>}, {transform_indices = @transform_1, window_bounds = array<i64: 1, 64, 32>}, {pipeline_mode = #tpu.pipeline_mode<synchronous>, transform_indices = @transform_2, window_bounds = array<i64: 2, 2, 32, 256>}, {pipeline_mode = #tpu.pipeline_mode<synchronous>, transform_indices = @transform_3, window_bounds = array<i64: 2, 2, 32, 128>}, {pipeline_mode = #tpu.pipeline_mode<synchronous>, transform_indices = @transform_4, window_bounds = array<i64: 2, 1, 256>}, {transform_indices = @transform_5, window_bounds = array<i64: 8, 64>}]} {
    %c0 = arith.constant 0 : index
    %c0_0 = arith.constant 0 : index
    %c0_1 = arith.constant 0 : index
    %c0_2 = arith.constant 0 : index
    %0 = vector.load %arg3[%c0, %c0_0, %c0_1, %c0_2] : memref<2x2x32x256xf32, #tpu.memory_space<vmem>>, vector<1x1x32x256xf32>
    %1 = vector.shape_cast %0 : vector<1x1x32x256xf32> to vector<32x256xf32>
    %c0_3 = arith.constant 0 : index
    %c0_4 = arith.constant 0 : index
    %c0_5 = arith.constant 0 : index
    %2 = vector.load %arg5[%c0_3, %c0_4, %c0_5] : memref<2x1x256xf32, #tpu.memory_space<vmem>>, vector<1x1x256xf32>
    %3 = vector.shape_cast %2 : vector<1x1x256xf32> to vector<1x256xf32>
    %c0_6 = arith.constant 0 : index
    %c0_7 = arith.constant 0 : index
    %c0_8 = arith.constant 0 : index
    %4 = vector.load %arg1[%c0_6, %c0_7, %c0_8] : memref<1x64x32xf32, #tpu.memory_space<vmem>>, vector<1x64x32xf32>
    %5 = vector.shape_cast %4 : vector<1x64x32xf32> to vector<64x32xf32>
    %cst = arith.constant dense<0.000000e+00> : vector<64x256xf32>
    %6 = tpu.matmul %5, %1, %cst {dimension_numbers = #tpu.dot_dimension_numbers<[1], [0], [0], [1], [0, 0, 1, 1], [], []>} : vector<64x32xf32>, vector<32x256xf32>, vector<64x256xf32> -> vector<64x256xf32>
    %7 = vector.broadcast %3 : vector<1x256xf32> to vector<64x256xf32>
    %8 = arith.addf %6, %7 : vector<64x256xf32>
    %9 = vector.extract_strided_slice %8 {offsets = [0, 0], sizes = [64, 128], strides = [1, 1]} : vector<64x256xf32> to vector<64x128xf32>
    %c0_9 = arith.constant 0 : index
    %c0_10 = arith.constant 0 : index
    %10 = vector.load %arg9[%c0_9, %c0_10] : memref<64x128xf32, #tpu.memory_space<vmem>>, vector<64x128xf32>
    tpu.vector_store %arg9[%c0_9, %c0_10], %9 {strides = array<i32>} : memref<64x128xf32, #tpu.memory_space<vmem>>, vector<64x128xf32>,
    %11 = vector.extract_strided_slice %8 {offsets = [0, 128], sizes = [64, 128], strides = [1, 1]} : vector<64x256xf32> to vector<64x128xf32>
    %c0_11 = arith.constant 0 : index
    %c0_12 = arith.constant 0 : index
    %12 = vector.load %arg10[%c0_11, %c0_12] : memref<64x128xf32, #tpu.memory_space<vmem>>, vector<64x128xf32>
    tpu.vector_store %arg10[%c0_11, %c0_12], %11 {strides = array<i32>} : memref<64x128xf32, #tpu.memory_space<vmem>>, vector<64x128xf32>,
    %c0_13 = arith.constant 0 : index
    %c0_14 = arith.constant 0 : index
    %c0_15 = arith.constant 0 : index
    %c0_16 = arith.constant 0 : index
    %13 = vector.load %arg4[%c0_13, %c0_14, %c0_15, %c0_16] : memref<2x2x32x128xf32, #tpu.memory_space<vmem>>, vector<1x1x32x128xf32>
    %14 = vector.shape_cast %13 : vector<1x1x32x128xf32> to vector<32x128xf32>
    %c0_17 = arith.constant 0 : index
    %c1 = arith.constant 1 : index
    %c0_18 = arith.constant 0 : index
    %c0_19 = arith.constant 0 : index
    %15 = vector.load %arg4[%c0_17, %c1, %c0_18, %c0_19] : memref<2x2x32x128xf32, #tpu.memory_space<vmem>>, vector<1x1x32x128xf32>
    %16 = vector.shape_cast %15 : vector<1x1x32x128xf32> to vector<32x128xf32>
    %cst_20 = arith.constant 0.000000e+00 : f32
    %17 = vector.broadcast %cst_20 : f32 to vector<8x32xf32>
    %cst_21 = arith.constant 0.000000e+00 : f32
    %18 = vector.broadcast %cst_21 : f32 to vector<8x32xf32>
    %cst_22 = arith.constant 0.000000e+00 : f32
    %19 = vector.broadcast %cst_22 : f32 to vector<8x32xf32>
    %cst_23 = arith.constant 0.000000e+00 : f32
    %20 = vector.broadcast %cst_23 : f32 to vector<8x32xf32>
    %c0_24 = arith.constant 0 : index
    %c0_25 = arith.constant 0 : index
    %c0_26 = arith.constant 0 : index
    %21 = vector.load %arg2[%c0_24, %c0_25, %c0_26] : memref<1x64x32xf32, #tpu.memory_space<vmem>>, vector<1x8x32xf32>
    %22 = vector.shape_cast %21 : vector<1x8x32xf32> to vector<8x32xf32>
    %c0_27 = arith.constant 0 : index
    %c56 = arith.constant 56 : index
    %c0_28 = arith.constant 0 : index
    %23 = vector.load %arg2[%c0_27, %c56, %c0_28] : memref<1x64x32xf32, #tpu.memory_space<vmem>>, vector<1x8x32xf32>
    %24 = vector.shape_cast %23 : vector<1x8x32xf32> to vector<8x32xf32>
    %c0_29 = arith.constant 0 : index
    %c0_30 = arith.constant 0 : index
    %25 = vector.load %arg9[%c0_29, %c0_30] : memref<64x128xf32, #tpu.memory_space<vmem>>, vector<8x128xf32>
    %cst_31 = arith.constant dense<0.000000e+00> : vector<8x128xf32>
    %26 = tpu.matmul %17, %14, %cst_31 {dimension_numbers = #tpu.dot_dimension_numbers<[1], [0], [0], [1], [0, 0, 1, 1], [], []>} : vector<8x32xf32>, vector<32x128xf32>, vector<8x128xf32> -> vector<8x128xf32>
    %27 = arith.addf %25, %26 : vector<8x128xf32>
    %c56_32 = arith.constant 56 : index
    %c0_33 = arith.constant 0 : index
    %28 = vector.load %arg10[%c56_32, %c0_33] : memref<64x128xf32, #tpu.memory_space<vmem>>, vector<8x128xf32>
    %cst_34 = arith.constant dense<0.000000e+00> : vector<8x128xf32>
    %29 = tpu.matmul %19, %16, %cst_34 {dimension_numbers = #tpu.dot_dimension_numbers<[1], [0], [0], [1], [0, 0, 1, 1], [], []>} : vector<8x32xf32>, vector<32x128xf32>, vector<8x128xf32> -> vector<8x128xf32>
    %30 = arith.addf %28, %29 : vector<8x128xf32>
    %31 = arith.negf %27 : vector<8x128xf32>
    %32 = math.exp %31 : vector<8x128xf32>
    %cst_35 = arith.constant 1.000000e+00 : f32
    %33 = vector.broadcast %cst_35 : f32 to vector<8x128xf32>
    %34 = arith.addf %33, %32 : vector<8x128xf32>
    %35 = arith.divf %33, %34 : vector<8x128xf32>
    %36 = math.tanh %27 : vector<8x128xf32>
    %37 = arith.negf %30 : vector<8x128xf32>
    %38 = math.exp %37 : vector<8x128xf32>
    %cst_36 = arith.constant 1.000000e+00 : f32
    %39 = vector.broadcast %cst_36 : f32 to vector<8x128xf32>
    %40 = arith.addf %39, %38 : vector<8x128xf32>
    %41 = arith.divf %39, %40 : vector<8x128xf32>
    %42 = math.tanh %30 : vector<8x128xf32>
    %43 = vector.extract_strided_slice %35 {offsets = [0, 32], sizes = [8, 32], strides = [1, 1]} : vector<8x128xf32> to vector<8x32xf32>
    %44 = arith.mulf %43, %18 : vector<8x32xf32>
    %45 = vector.extract_strided_slice %35 {offsets = [0, 0], sizes = [8, 32], strides = [1, 1]} : vector<8x128xf32> to vector<8x32xf32>
    %46 = vector.extract_strided_slice %36 {offsets = [0, 64], sizes = [8, 32], strides = [1, 1]} : vector<8x128xf32> to vector<8x32xf32>
    %47 = arith.mulf %45, %46 : vector<8x32xf32>
    %48 = arith.addf %44, %47 : vector<8x32xf32>
    %49 = vector.extract_strided_slice %35 {offsets = [0, 96], sizes = [8, 32], strides = [1, 1]} : vector<8x128xf32> to vector<8x32xf32>
    %50 = math.tanh %48 : vector<8x32xf32>
    %51 = arith.mulf %49, %50 : vector<8x32xf32>
    %52 = vector.extract_strided_slice %41 {offsets = [0, 32], sizes = [8, 32], strides = [1, 1]} : vector<8x128xf32> to vector<8x32xf32>
    %53 = arith.mulf %52, %20 : vector<8x32xf32>
    %54 = vector.extract_strided_slice %41 {offsets = [0, 0], sizes = [8, 32], strides = [1, 1]} : vector<8x128xf32> to vector<8x32xf32>
    %55 = vector.extract_strided_slice %42 {offsets = [0, 64], sizes = [8, 32], strides = [1, 1]} : vector<8x128xf32> to vector<8x32xf32>
    %56 = arith.mulf %54, %55 : vector<8x32xf32>
    %57 = arith.addf %53, %56 : vector<8x32xf32>
    %58 = vector.extract_strided_slice %41 {offsets = [0, 96], sizes = [8, 32], strides = [1, 1]} : vector<8x128xf32> to vector<8x32xf32>
    %59 = math.tanh %57 : vector<8x32xf32>
    %60 = arith.mulf %58, %59 : vector<8x32xf32>
    %cst_37 = arith.constant 0.000000e+00 : f32
    %61 = vector.broadcast %cst_37 : f32 to vector<8x32xf32>
    %62 = arith.cmpf ogt, %22, %61 : vector<8x32xf32>
    %cst_38 = arith.constant 0.000000e+00 : f32
    %63 = vector.broadcast %cst_38 : f32 to vector<8x32xf32>
    %64 = arith.cmpf ogt, %24, %63 : vector<8x32xf32>
    %65 = arith.select %62, %51, %17 : vector<8x32xi1>, vector<8x32xf32>
    %66 = arith.select %62, %48, %18 : vector<8x32xi1>, vector<8x32xf32>
    %67 = arith.select %64, %60, %19 : vector<8x32xi1>, vector<8x32xf32>
    %68 = arith.select %64, %57, %20 : vector<8x32xi1>, vector<8x32xf32>
    %69 = arith.mulf %22, %51 : vector<8x32xf32>
    %c0_39 = arith.constant 0 : index
    %c0_40 = arith.constant 0 : index
    %70 = vector.load %arg7[%c0_39, %c0_40] : memref<64x32xf32, #tpu.memory_space<vmem>>, vector<8x32xf32>
    tpu.vector_store %arg7[%c0_39, %c0_40], %69 {strides = array<i32>} : memref<64x32xf32, #tpu.memory_space<vmem>>, vector<8x32xf32>,
    %71 = arith.mulf %24, %60 : vector<8x32xf32>
    %c56_41 = arith.constant 56 : index
    %c0_42 = arith.constant 0 : index
    %72 = vector.load %arg8[%c56_41, %c0_42] : memref<64x32xf32, #tpu.memory_space<vmem>>, vector<8x32xf32>
    tpu.vector_store %arg8[%c56_41, %c0_42], %71 {strides = array<i32>} : memref<64x32xf32, #tpu.memory_space<vmem>>, vector<8x32xf32>,
    %c0_43 = arith.constant 0 : index
    %c8 = arith.constant 8 : index
    %c0_44 = arith.constant 0 : index
    %73 = vector.load %arg2[%c0_43, %c8, %c0_44] : memref<1x64x32xf32, #tpu.memory_space<vmem>>, vector<1x8x32xf32>
    %74 = vector.shape_cast %73 : vector<1x8x32xf32> to vector<8x32xf32>
    %c0_45 = arith.constant 0 : index
    %c48 = arith.constant 48 : index
    %c0_46 = arith.constant 0 : index
    %75 = vector.load %arg2[%c0_45, %c48, %c0_46] : memref<1x64x32xf32, #tpu.memory_space<vmem>>, vector<1x8x32xf32>
    %76 = vector.shape_cast %75 : vector<1x8x32xf32> to vector<8x32xf32>
    %c8_47 = arith.constant 8 : index
    %c0_48 = arith.constant 0 : index
    %77 = vector.load %arg9[%c8_47, %c0_48] : memref<64x128xf32, #tpu.memory_space<vmem>>, vector<8x128xf32>
    %cst_49 = arith.constant dense<0.000000e+00> : vector<8x128xf32>
    %78 = tpu.matmul %65, %14, %cst_49 {dimension_numbers = #tpu.dot_dimension_numbers<[1], [0], [0], [1], [0, 0, 1, 1], [], []>} : vector<8x32xf32>, vector<32x128xf32>, vector<8x128xf32> -> vector<8x128xf32>
    %79 = arith.addf %77, %78 : vector<8x128xf32>
    %c48_50 = arith.constant 48 : index
    %c0_51 = arith.constant 0 : index
    %80 = vector.load %arg10[%c48_50, %c0_51] : memref<64x128xf32, #tpu.memory_space<vmem>>, vector<8x128xf32>
    %cst_52 = arith.constant dense<0.000000e+00> : vector<8x128xf32>
    %81 = tpu.matmul %67, %16, %cst_52 {dimension_numbers = #tpu.dot_dimension_numbers<[1], [0], [0], [1], [0, 0, 1, 1], [], []>} : vector<8x32xf32>, vector<32x128xf32>, vector<8x128xf32> -> vector<8x128xf32>
    %82 = arith.addf %80, %81 : vector<8x128xf32>
    %83 = arith.negf %79 : vector<8x128xf32>
    %84 = math.exp %83 : vector<8x128xf32>
    %cst_53 = arith.constant 1.000000e+00 : f32
    %85 = vector.broadcast %cst_53 : f32 to vector<8x128xf32>
    %86 = arith.addf %85, %84 : vector<8x128xf32>
    %87 = arith.divf %85, %86 : vector<8x128xf32>
    %88 = math.tanh %79 : vector<8x128xf32>
    %89 = arith.negf %82 : vector<8x128xf32>
    %90 = math.exp %89 : vector<8x128xf32>
    %cst_54 = arith.constant 1.000000e+00 : f32
    %91 = vector.broadcast %cst_54 : f32 to vector<8x128xf32>
    %92 = arith.addf %91, %90 : vector<8x128xf32>
    %93 = arith.divf %91, %92 : vector<8x128xf32>
    %94 = math.tanh %82 : vector<8x128xf32>
    %95 = vector.extract_strided_slice %87 {offsets = [0, 32], sizes = [8, 32], strides = [1, 1]} : vector<8x128xf32> to vector<8x32xf32>
    %96 = arith.mulf %95, %66 : vector<8x32xf32>
    %97 = vector.extract_strided_slice %87 {offsets = [0, 0], sizes = [8, 32], strides = [1, 1]} : vector<8x128xf32> to vector<8x32xf32>
    %98 = vector.extract_strided_slice %88 {offsets = [0, 64], sizes = [8, 32], strides = [1, 1]} : vector<8x128xf32> to vector<8x32xf32>
    %99 = arith.mulf %97, %98 : vector<8x32xf32>
    %100 = arith.addf %96, %99 : vector<8x32xf32>
    %101 = vector.extract_strided_slice %87 {offsets = [0, 96], sizes = [8, 32], strides = [1, 1]} : vector<8x128xf32> to vector<8x32xf32>
    %102 = math.tanh %100 : vector<8x32xf32>
    %103 = arith.mulf %101, %102 : vector<8x32xf32>
    %104 = vector.extract_strided_slice %93 {offsets = [0, 32], sizes = [8, 32], strides = [1, 1]} : vector<8x128xf32> to vector<8x32xf32>
    %105 = arith.mulf %104, %68 : vector<8x32xf32>
    %106 = vector.extract_strided_slice %93 {offsets = [0, 0], sizes = [8, 32], strides = [1, 1]} : vector<8x128xf32> to vector<8x32xf32>
    %107 = vector.extract_strided_slice %94 {offsets = [0, 64], sizes = [8, 32], strides = [1, 1]} : vector<8x128xf32> to vector<8x32xf32>
    %108 = arith.mulf %106, %107 : vector<8x32xf32>
    %109 = arith.addf %105, %108 : vector<8x32xf32>
    %110 = vector.extract_strided_slice %93 {offsets = [0, 96], sizes = [8, 32], strides = [1, 1]} : vector<8x128xf32> to vector<8x32xf32>
    %111 = math.tanh %109 : vector<8x32xf32>
    %112 = arith.mulf %110, %111 : vector<8x32xf32>
    %cst_55 = arith.constant 0.000000e+00 : f32
    %113 = vector.broadcast %cst_55 : f32 to vector<8x32xf32>
    %114 = arith.cmpf ogt, %74, %113 : vector<8x32xf32>
    %cst_56 = arith.constant 0.000000e+00 : f32
    %115 = vector.broadcast %cst_56 : f32 to vector<8x32xf32>
    %116 = arith.cmpf ogt, %76, %115 : vector<8x32xf32>
    %117 = arith.select %114, %103, %65 : vector<8x32xi1>, vector<8x32xf32>
    %118 = arith.select %114, %100, %66 : vector<8x32xi1>, vector<8x32xf32>
    %119 = arith.select %116, %112, %67 : vector<8x32xi1>, vector<8x32xf32>
    %120 = arith.select %116, %109, %68 : vector<8x32xi1>, vector<8x32xf32>
    %121 = arith.mulf %74, %103 : vector<8x32xf32>
    %c8_57 = arith.constant 8 : index
    %c0_58 = arith.constant 0 : index
    %122 = vector.load %arg7[%c8_57, %c0_58] : memref<64x32xf32, #tpu.memory_space<vmem>>, vector<8x32xf32>
    tpu.vector_store %arg7[%c8_57, %c0_58], %121 {strides = array<i32>} : memref<64x32xf32, #tpu.memory_space<vmem>>, vector<8x32xf32>,
    %123 = arith.mulf %76, %112 : vector<8x32xf32>
    %c48_59 = arith.constant 48 : index
    %c0_60 = arith.constant 0 : index
    %124 = vector.load %arg8[%c48_59, %c0_60] : memref<64x32xf32, #tpu.memory_space<vmem>>, vector<8x32xf32>
    tpu.vector_store %arg8[%c48_59, %c0_60], %123 {strides = array<i32>} : memref<64x32xf32, #tpu.memory_space<vmem>>, vector<8x32xf32>,
    %c0_61 = arith.constant 0 : index
    %c16 = arith.constant 16 : index
    %c0_62 = arith.constant 0 : index
    %125 = vector.load %arg2[%c0_61, %c16, %c0_62] : memref<1x64x32xf32, #tpu.memory_space<vmem>>, vector<1x8x32xf32>
    %126 = vector.shape_cast %125 : vector<1x8x32xf32> to vector<8x32xf32>
    %c0_63 = arith.constant 0 : index
    %c40 = arith.constant 40 : index
    %c0_64 = arith.constant 0 : index
    %127 = vector.load %arg2[%c0_63, %c40, %c0_64] : memref<1x64x32xf32, #tpu.memory_space<vmem>>, vector<1x8x32xf32>
    %128 = vector.shape_cast %127 : vector<1x8x32xf32> to vector<8x32xf32>
    %c16_65 = arith.constant 16 : index
    %c0_66 = arith.constant 0 : index
    %129 = vector.load %arg9[%c16_65, %c0_66] : memref<64x128xf32, #tpu.memory_space<vmem>>, vector<8x128xf32>
    %cst_67 = arith.constant dense<0.000000e+00> : vector<8x128xf32>
    %130 = tpu.matmul %117, %14, %cst_67 {dimension_numbers = #tpu.dot_dimension_numbers<[1], [0], [0], [1], [0, 0, 1, 1], [], []>} : vector<8x32xf32>, vector<32x128xf32>, vector<8x128xf32> -> vector<8x128xf32>
    %131 = arith.addf %129, %130 : vector<8x128xf32>
    %c40_68 = arith.constant 40 : index
    %c0_69 = arith.constant 0 : index
    %132 = vector.load %arg10[%c40_68, %c0_69] : memref<64x128xf32, #tpu.memory_space<vmem>>, vector<8x128xf32>
    %cst_70 = arith.constant dense<0.000000e+00> : vector<8x128xf32>
    %133 = tpu.matmul %119, %16, %cst_70 {dimension_numbers = #tpu.dot_dimension_numbers<[1], [0], [0], [1], [0, 0, 1, 1], [], []>} : vector<8x32xf32>, vector<32x128xf32>, vector<8x128xf32> -> vector<8x128xf32>
    %134 = arith.addf %132, %133 : vector<8x128xf32>
    %135 = arith.negf %131 : vector<8x128xf32>
    %136 = math.exp %135 : vector<8x128xf32>
    %cst_71 = arith.constant 1.000000e+00 : f32
    %137 = vector.broadcast %cst_71 : f32 to vector<8x128xf32>
    %138 = arith.addf %137, %136 : vector<8x128xf32>
    %139 = arith.divf %137, %138 : vector<8x128xf32>
    %140 = math.tanh %131 : vector<8x128xf32>
    %141 = arith.negf %134 : vector<8x128xf32>
    %142 = math.exp %141 : vector<8x128xf32>
    %cst_72 = arith.constant 1.000000e+00 : f32
    %143 = vector.broadcast %cst_72 : f32 to vector<8x128xf32>
    %144 = arith.addf %143, %142 : vector<8x128xf32>
    %145 = arith.divf %143, %144 : vector<8x128xf32>
    %146 = math.tanh %134 : vector<8x128xf32>
    %147 = vector.extract_strided_slice %139 {offsets = [0, 32], sizes = [8, 32], strides = [1, 1]} : vector<8x128xf32> to vector<8x32xf32>
    %148 = arith.mulf %147, %118 : vector<8x32xf32>
    %149 = vector.extract_strided_slice %139 {offsets = [0, 0], sizes = [8, 32], strides = [1, 1]} : vector<8x128xf32> to vector<8x32xf32>
    %150 = vector.extract_strided_slice %140 {offsets = [0, 64], sizes = [8, 32], strides = [1, 1]} : vector<8x128xf32> to vector<8x32xf32>
    %151 = arith.mulf %149, %150 : vector<8x32xf32>
    %152 = arith.addf %148, %151 : vector<8x32xf32>
    %153 = vector.extract_strided_slice %139 {offsets = [0, 96], sizes = [8, 32], strides = [1, 1]} : vector<8x128xf32> to vector<8x32xf32>
    %154 = math.tanh %152 : vector<8x32xf32>
    %155 = arith.mulf %153, %154 : vector<8x32xf32>
    %156 = vector.extract_strided_slice %145 {offsets = [0, 32], sizes = [8, 32], strides = [1, 1]} : vector<8x128xf32> to vector<8x32xf32>
    %157 = arith.mulf %156, %120 : vector<8x32xf32>
    %158 = vector.extract_strided_slice %145 {offsets = [0, 0], sizes = [8, 32], strides = [1, 1]} : vector<8x128xf32> to vector<8x32xf32>
    %159 = vector.extract_strided_slice %146 {offsets = [0, 64], sizes = [8, 32], strides = [1, 1]} : vector<8x128xf32> to vector<8x32xf32>
    %160 = arith.mulf %158, %159 : vector<8x32xf32>
    %161 = arith.addf %157, %160 : vector<8x32xf32>
    %162 = vector.extract_strided_slice %145 {offsets = [0, 96], sizes = [8, 32], strides = [1, 1]} : vector<8x128xf32> to vector<8x32xf32>
    %163 = math.tanh %161 : vector<8x32xf32>
    %164 = arith.mulf %162, %163 : vector<8x32xf32>
    %cst_73 = arith.constant 0.000000e+00 : f32
    %165 = vector.broadcast %cst_73 : f32 to vector<8x32xf32>
    %166 = arith.cmpf ogt, %126, %165 : vector<8x32xf32>
    %cst_74 = arith.constant 0.000000e+00 : f32
    %167 = vector.broadcast %cst_74 : f32 to vector<8x32xf32>
    %168 = arith.cmpf ogt, %128, %167 : vector<8x32xf32>
    %169 = arith.select %166, %155, %117 : vector<8x32xi1>, vector<8x32xf32>
    %170 = arith.select %166, %152, %118 : vector<8x32xi1>, vector<8x32xf32>
    %171 = arith.select %168, %164, %119 : vector<8x32xi1>, vector<8x32xf32>
    %172 = arith.select %168, %161, %120 : vector<8x32xi1>, vector<8x32xf32>
    %173 = arith.mulf %126, %155 : vector<8x32xf32>
    %c16_75 = arith.constant 16 : index
    %c0_76 = arith.constant 0 : index
    %174 = vector.load %arg7[%c16_75, %c0_76] : memref<64x32xf32, #tpu.memory_space<vmem>>, vector<8x32xf32>
    tpu.vector_store %arg7[%c16_75, %c0_76], %173 {strides = array<i32>} : memref<64x32xf32, #tpu.memory_space<vmem>>, vector<8x32xf32>,
    %175 = arith.mulf %128, %164 : vector<8x32xf32>
    %c40_77 = arith.constant 40 : index
    %c0_78 = arith.constant 0 : index
    %176 = vector.load %arg8[%c40_77, %c0_78] : memref<64x32xf32, #tpu.memory_space<vmem>>, vector<8x32xf32>
    tpu.vector_store %arg8[%c40_77, %c0_78], %175 {strides = array<i32>} : memref<64x32xf32, #tpu.memory_space<vmem>>, vector<8x32xf32>,
    %c0_79 = arith.constant 0 : index
    %c24 = arith.constant 24 : index
    %c0_80 = arith.constant 0 : index
    %177 = vector.load %arg2[%c0_79, %c24, %c0_80] : memref<1x64x32xf32, #tpu.memory_space<vmem>>, vector<1x8x32xf32>
    %178 = vector.shape_cast %177 : vector<1x8x32xf32> to vector<8x32xf32>
    %c0_81 = arith.constant 0 : index
    %c32 = arith.constant 32 : index
    %c0_82 = arith.constant 0 : index
    %179 = vector.load %arg2[%c0_81, %c32, %c0_82] : memref<1x64x32xf32, #tpu.memory_space<vmem>>, vector<1x8x32xf32>
    %180 = vector.shape_cast %179 : vector<1x8x32xf32> to vector<8x32xf32>
    %c24_83 = arith.constant 24 : index
    %c0_84 = arith.constant 0 : index
    %181 = vector.load %arg9[%c24_83, %c0_84] : memref<64x128xf32, #tpu.memory_space<vmem>>, vector<8x128xf32>
    %cst_85 = arith.constant dense<0.000000e+00> : vector<8x128xf32>
    %182 = tpu.matmul %169, %14, %cst_85 {dimension_numbers = #tpu.dot_dimension_numbers<[1], [0], [0], [1], [0, 0, 1, 1], [], []>} : vector<8x32xf32>, vector<32x128xf32>, vector<8x128xf32> -> vector<8x128xf32>
    %183 = arith.addf %181, %182 : vector<8x128xf32>
    %c32_86 = arith.constant 32 : index
    %c0_87 = arith.constant 0 : index
    %184 = vector.load %arg10[%c32_86, %c0_87] : memref<64x128xf32, #tpu.memory_space<vmem>>, vector<8x128xf32>
    %cst_88 = arith.constant dense<0.000000e+00> : vector<8x128xf32>
    %185 = tpu.matmul %171, %16, %cst_88 {dimension_numbers = #tpu.dot_dimension_numbers<[1], [0], [0], [1], [0, 0, 1, 1], [], []>} : vector<8x32xf32>, vector<32x128xf32>, vector<8x128xf32> -> vector<8x128xf32>
    %186 = arith.addf %184, %185 : vector<8x128xf32>
    %187 = arith.negf %183 : vector<8x128xf32>
    %188 = math.exp %187 : vector<8x128xf32>
    %cst_89 = arith.constant 1.000000e+00 : f32
    %189 = vector.broadcast %cst_89 : f32 to vector<8x128xf32>
    %190 = arith.addf %189, %188 : vector<8x128xf32>
    %191 = arith.divf %189, %190 : vector<8x128xf32>
    %192 = math.tanh %183 : vector<8x128xf32>
    %193 = arith.negf %186 : vector<8x128xf32>
    %194 = math.exp %193 : vector<8x128xf32>
    %cst_90 = arith.constant 1.000000e+00 : f32
    %195 = vector.broadcast %cst_90 : f32 to vector<8x128xf32>
    %196 = arith.addf %195, %194 : vector<8x128xf32>
    %197 = arith.divf %195, %196 : vector<8x128xf32>
    %198 = math.tanh %186 : vector<8x128xf32>
    %199 = vector.extract_strided_slice %191 {offsets = [0, 32], sizes = [8, 32], strides = [1, 1]} : vector<8x128xf32> to vector<8x32xf32>
    %200 = arith.mulf %199, %170 : vector<8x32xf32>
    %201 = vector.extract_strided_slice %191 {offsets = [0, 0], sizes = [8, 32], strides = [1, 1]} : vector<8x128xf32> to vector<8x32xf32>
    %202 = vector.extract_strided_slice %192 {offsets = [0, 64], sizes = [8, 32], strides = [1, 1]} : vector<8x128xf32> to vector<8x32xf32>
    %203 = arith.mulf %201, %202 : vector<8x32xf32>
    %204 = arith.addf %200, %203 : vector<8x32xf32>
    %205 = vector.extract_strided_slice %191 {offsets = [0, 96], sizes = [8, 32], strides = [1, 1]} : vector<8x128xf32> to vector<8x32xf32>
    %206 = math.tanh %204 : vector<8x32xf32>
    %207 = arith.mulf %205, %206 : vector<8x32xf32>
    %208 = vector.extract_strided_slice %197 {offsets = [0, 32], sizes = [8, 32], strides = [1, 1]} : vector<8x128xf32> to vector<8x32xf32>
    %209 = arith.mulf %208, %172 : vector<8x32xf32>
    %210 = vector.extract_strided_slice %197 {offsets = [0, 0], sizes = [8, 32], strides = [1, 1]} : vector<8x128xf32> to vector<8x32xf32>
    %211 = vector.extract_strided_slice %198 {offsets = [0, 64], sizes = [8, 32], strides = [1, 1]} : vector<8x128xf32> to vector<8x32xf32>
    %212 = arith.mulf %210, %211 : vector<8x32xf32>
    %213 = arith.addf %209, %212 : vector<8x32xf32>
    %214 = vector.extract_strided_slice %197 {offsets = [0, 96], sizes = [8, 32], strides = [1, 1]} : vector<8x128xf32> to vector<8x32xf32>
    %215 = math.tanh %213 : vector<8x32xf32>
    %216 = arith.mulf %214, %215 : vector<8x32xf32>
    %cst_91 = arith.constant 0.000000e+00 : f32
    %217 = vector.broadcast %cst_91 : f32 to vector<8x32xf32>
    %218 = arith.cmpf ogt, %178, %217 : vector<8x32xf32>
    %cst_92 = arith.constant 0.000000e+00 : f32
    %219 = vector.broadcast %cst_92 : f32 to vector<8x32xf32>
    %220 = arith.cmpf ogt, %180, %219 : vector<8x32xf32>
    %221 = arith.select %218, %207, %169 : vector<8x32xi1>, vector<8x32xf32>
    %222 = arith.select %218, %204, %170 : vector<8x32xi1>, vector<8x32xf32>
    %223 = arith.select %220, %216, %171 : vector<8x32xi1>, vector<8x32xf32>
    %224 = arith.select %220, %213, %172 : vector<8x32xi1>, vector<8x32xf32>
    %225 = arith.mulf %178, %207 : vector<8x32xf32>
    %c24_93 = arith.constant 24 : index
    %c0_94 = arith.constant 0 : index
    %226 = vector.load %arg7[%c24_93, %c0_94] : memref<64x32xf32, #tpu.memory_space<vmem>>, vector<8x32xf32>
    tpu.vector_store %arg7[%c24_93, %c0_94], %225 {strides = array<i32>} : memref<64x32xf32, #tpu.memory_space<vmem>>, vector<8x32xf32>,
    %227 = arith.mulf %180, %216 : vector<8x32xf32>
    %c32_95 = arith.constant 32 : index
    %c0_96 = arith.constant 0 : index
    %228 = vector.load %arg8[%c32_95, %c0_96] : memref<64x32xf32, #tpu.memory_space<vmem>>, vector<8x32xf32>
    tpu.vector_store %arg8[%c32_95, %c0_96], %227 {strides = array<i32>} : memref<64x32xf32, #tpu.memory_space<vmem>>, vector<8x32xf32>,
    %c0_97 = arith.constant 0 : index
    %c32_98 = arith.constant 32 : index
    %c0_99 = arith.constant 0 : index
    %229 = vector.load %arg2[%c0_97, %c32_98, %c0_99] : memref<1x64x32xf32, #tpu.memory_space<vmem>>, vector<1x8x32xf32>
    %230 = vector.shape_cast %229 : vector<1x8x32xf32> to vector<8x32xf32>
    %c0_100 = arith.constant 0 : index
    %c24_101 = arith.constant 24 : index
    %c0_102 = arith.constant 0 : index
    %231 = vector.load %arg2[%c0_100, %c24_101, %c0_102] : memref<1x64x32xf32, #tpu.memory_space<vmem>>, vector<1x8x32xf32>
    %232 = vector.shape_cast %231 : vector<1x8x32xf32> to vector<8x32xf32>
    %c32_103 = arith.constant 32 : index
    %c0_104 = arith.constant 0 : index
    %233 = vector.load %arg9[%c32_103, %c0_104] : memref<64x128xf32, #tpu.memory_space<vmem>>, vector<8x128xf32>
    %cst_105 = arith.constant dense<0.000000e+00> : vector<8x128xf32>
    %234 = tpu.matmul %221, %14, %cst_105 {dimension_numbers = #tpu.dot_dimension_numbers<[1], [0], [0], [1], [0, 0, 1, 1], [], []>} : vector<8x32xf32>, vector<32x128xf32>, vector<8x128xf32> -> vector<8x128xf32>
    %235 = arith.addf %233, %234 : vector<8x128xf32>
    %c24_106 = arith.constant 24 : index
    %c0_107 = arith.constant 0 : index
    %236 = vector.load %arg10[%c24_106, %c0_107] : memref<64x128xf32, #tpu.memory_space<vmem>>, vector<8x128xf32>
    %cst_108 = arith.constant dense<0.000000e+00> : vector<8x128xf32>
    %237 = tpu.matmul %223, %16, %cst_108 {dimension_numbers = #tpu.dot_dimension_numbers<[1], [0], [0], [1], [0, 0, 1, 1], [], []>} : vector<8x32xf32>, vector<32x128xf32>, vector<8x128xf32> -> vector<8x128xf32>
    %238 = arith.addf %236, %237 : vector<8x128xf32>
    %239 = arith.negf %235 : vector<8x128xf32>
    %240 = math.exp %239 : vector<8x128xf32>
    %cst_109 = arith.constant 1.000000e+00 : f32
    %241 = vector.broadcast %cst_109 : f32 to vector<8x128xf32>
    %242 = arith.addf %241, %240 : vector<8x128xf32>
    %243 = arith.divf %241, %242 : vector<8x128xf32>
    %244 = math.tanh %235 : vector<8x128xf32>
    %245 = arith.negf %238 : vector<8x128xf32>
    %246 = math.exp %245 : vector<8x128xf32>
    %cst_110 = arith.constant 1.000000e+00 : f32
    %247 = vector.broadcast %cst_110 : f32 to vector<8x128xf32>
    %248 = arith.addf %247, %246 : vector<8x128xf32>
    %249 = arith.divf %247, %248 : vector<8x128xf32>
    %250 = math.tanh %238 : vector<8x128xf32>
    %251 = vector.extract_strided_slice %243 {offsets = [0, 32], sizes = [8, 32], strides = [1, 1]} : vector<8x128xf32> to vector<8x32xf32>
    %252 = arith.mulf %251, %222 : vector<8x32xf32>
    %253 = vector.extract_strided_slice %243 {offsets = [0, 0], sizes = [8, 32], strides = [1, 1]} : vector<8x128xf32> to vector<8x32xf32>
    %254 = vector.extract_strided_slice %244 {offsets = [0, 64], sizes = [8, 32], strides = [1, 1]} : vector<8x128xf32> to vector<8x32xf32>
    %255 = arith.mulf %253, %254 : vector<8x32xf32>
    %256 = arith.addf %252, %255 : vector<8x32xf32>
    %257 = vector.extract_strided_slice %243 {offsets = [0, 96], sizes = [8, 32], strides = [1, 1]} : vector<8x128xf32> to vector<8x32xf32>
    %258 = math.tanh %256 : vector<8x32xf32>
    %259 = arith.mulf %257, %258 : vector<8x32xf32>
    %260 = vector.extract_strided_slice %249 {offsets = [0, 32], sizes = [8, 32], strides = [1, 1]} : vector<8x128xf32> to vector<8x32xf32>
    %261 = arith.mulf %260, %224 : vector<8x32xf32>
    %262 = vector.extract_strided_slice %249 {offsets = [0, 0], sizes = [8, 32], strides = [1, 1]} : vector<8x128xf32> to vector<8x32xf32>
    %263 = vector.extract_strided_slice %250 {offsets = [0, 64], sizes = [8, 32], strides = [1, 1]} : vector<8x128xf32> to vector<8x32xf32>
    %264 = arith.mulf %262, %263 : vector<8x32xf32>
    %265 = arith.addf %261, %264 : vector<8x32xf32>
    %266 = vector.extract_strided_slice %249 {offsets = [0, 96], sizes = [8, 32], strides = [1, 1]} : vector<8x128xf32> to vector<8x32xf32>
    %267 = math.tanh %265 : vector<8x32xf32>
    %268 = arith.mulf %266, %267 : vector<8x32xf32>
    %cst_111 = arith.constant 0.000000e+00 : f32
    %269 = vector.broadcast %cst_111 : f32 to vector<8x32xf32>
    %270 = arith.cmpf ogt, %230, %269 : vector<8x32xf32>
    %cst_112 = arith.constant 0.000000e+00 : f32
    %271 = vector.broadcast %cst_112 : f32 to vector<8x32xf32>
    %272 = arith.cmpf ogt, %232, %271 : vector<8x32xf32>
    %273 = arith.select %270, %259, %221 : vector<8x32xi1>, vector<8x32xf32>
    %274 = arith.select %270, %256, %222 : vector<8x32xi1>, vector<8x32xf32>
    %275 = arith.select %272, %268, %223 : vector<8x32xi1>, vector<8x32xf32>
    %276 = arith.select %272, %265, %224 : vector<8x32xi1>, vector<8x32xf32>
    %277 = arith.mulf %230, %259 : vector<8x32xf32>
    %c32_113 = arith.constant 32 : index
    %c0_114 = arith.constant 0 : index
    %278 = vector.load %arg7[%c32_113, %c0_114] : memref<64x32xf32, #tpu.memory_space<vmem>>, vector<8x32xf32>
    tpu.vector_store %arg7[%c32_113, %c0_114], %277 {strides = array<i32>} : memref<64x32xf32, #tpu.memory_space<vmem>>, vector<8x32xf32>,
    %279 = arith.mulf %232, %268 : vector<8x32xf32>
    %c24_115 = arith.constant 24 : index
    %c0_116 = arith.constant 0 : index
    %280 = vector.load %arg8[%c24_115, %c0_116] : memref<64x32xf32, #tpu.memory_space<vmem>>, vector<8x32xf32>
    tpu.vector_store %arg8[%c24_115, %c0_116], %279 {strides = array<i32>} : memref<64x32xf32, #tpu.memory_space<vmem>>, vector<8x32xf32>,
    %c0_117 = arith.constant 0 : index
    %c40_118 = arith.constant 40 : index
    %c0_119 = arith.constant 0 : index
    %281 = vector.load %arg2[%c0_117, %c40_118, %c0_119] : memref<1x64x32xf32, #tpu.memory_space<vmem>>, vector<1x8x32xf32>
    %282 = vector.shape_cast %281 : vector<1x8x32xf32> to vector<8x32xf32>
    %c0_120 = arith.constant 0 : index
    %c16_121 = arith.constant 16 : index
    %c0_122 = arith.constant 0 : index
    %283 = vector.load %arg2[%c0_120, %c16_121, %c0_122] : memref<1x64x32xf32, #tpu.memory_space<vmem>>, vector<1x8x32xf32>
    %284 = vector.shape_cast %283 : vector<1x8x32xf32> to vector<8x32xf32>
    %c40_123 = arith.constant 40 : index
    %c0_124 = arith.constant 0 : index
    %285 = vector.load %arg9[%c40_123, %c0_124] : memref<64x128xf32, #tpu.memory_space<vmem>>, vector<8x128xf32>
    %cst_125 = arith.constant dense<0.000000e+00> : vector<8x128xf32>
    %286 = tpu.matmul %273, %14, %cst_125 {dimension_numbers = #tpu.dot_dimension_numbers<[1], [0], [0], [1], [0, 0, 1, 1], [], []>} : vector<8x32xf32>, vector<32x128xf32>, vector<8x128xf32> -> vector<8x128xf32>
    %287 = arith.addf %285, %286 : vector<8x128xf32>
    %c16_126 = arith.constant 16 : index
    %c0_127 = arith.constant 0 : index
    %288 = vector.load %arg10[%c16_126, %c0_127] : memref<64x128xf32, #tpu.memory_space<vmem>>, vector<8x128xf32>
    %cst_128 = arith.constant dense<0.000000e+00> : vector<8x128xf32>
    %289 = tpu.matmul %275, %16, %cst_128 {dimension_numbers = #tpu.dot_dimension_numbers<[1], [0], [0], [1], [0, 0, 1, 1], [], []>} : vector<8x32xf32>, vector<32x128xf32>, vector<8x128xf32> -> vector<8x128xf32>
    %290 = arith.addf %288, %289 : vector<8x128xf32>
    %291 = arith.negf %287 : vector<8x128xf32>
    %292 = math.exp %291 : vector<8x128xf32>
    %cst_129 = arith.constant 1.000000e+00 : f32
    %293 = vector.broadcast %cst_129 : f32 to vector<8x128xf32>
    %294 = arith.addf %293, %292 : vector<8x128xf32>
    %295 = arith.divf %293, %294 : vector<8x128xf32>
    %296 = math.tanh %287 : vector<8x128xf32>
    %297 = arith.negf %290 : vector<8x128xf32>
    %298 = math.exp %297 : vector<8x128xf32>
    %cst_130 = arith.constant 1.000000e+00 : f32
    %299 = vector.broadcast %cst_130 : f32 to vector<8x128xf32>
    %300 = arith.addf %299, %298 : vector<8x128xf32>
    %301 = arith.divf %299, %300 : vector<8x128xf32>
    %302 = math.tanh %290 : vector<8x128xf32>
    %303 = vector.extract_strided_slice %295 {offsets = [0, 32], sizes = [8, 32], strides = [1, 1]} : vector<8x128xf32> to vector<8x32xf32>
    %304 = arith.mulf %303, %274 : vector<8x32xf32>
    %305 = vector.extract_strided_slice %295 {offsets = [0, 0], sizes = [8, 32], strides = [1, 1]} : vector<8x128xf32> to vector<8x32xf32>
    %306 = vector.extract_strided_slice %296 {offsets = [0, 64], sizes = [8, 32], strides = [1, 1]} : vector<8x128xf32> to vector<8x32xf32>
    %307 = arith.mulf %305, %306 : vector<8x32xf32>
    %308 = arith.addf %304, %307 : vector<8x32xf32>
    %309 = vector.extract_strided_slice %295 {offsets = [0, 96], sizes = [8, 32], strides = [1, 1]} : vector<8x128xf32> to vector<8x32xf32>
    %310 = math.tanh %308 : vector<8x32xf32>
    %311 = arith.mulf %309, %310 : vector<8x32xf32>
    %312 = vector.extract_strided_slice %301 {offsets = [0, 32], sizes = [8, 32], strides = [1, 1]} : vector<8x128xf32> to vector<8x32xf32>
    %313 = arith.mulf %312, %276 : vector<8x32xf32>
    %314 = vector.extract_strided_slice %301 {offsets = [0, 0], sizes = [8, 32], strides = [1, 1]} : vector<8x128xf32> to vector<8x32xf32>
    %315 = vector.extract_strided_slice %302 {offsets = [0, 64], sizes = [8, 32], strides = [1, 1]} : vector<8x128xf32> to vector<8x32xf32>
    %316 = arith.mulf %314, %315 : vector<8x32xf32>
    %317 = arith.addf %313, %316 : vector<8x32xf32>
    %318 = vector.extract_strided_slice %301 {offsets = [0, 96], sizes = [8, 32], strides = [1, 1]} : vector<8x128xf32> to vector<8x32xf32>
    %319 = math.tanh %317 : vector<8x32xf32>
    %320 = arith.mulf %318, %319 : vector<8x32xf32>
    %cst_131 = arith.constant 0.000000e+00 : f32
    %321 = vector.broadcast %cst_131 : f32 to vector<8x32xf32>
    %322 = arith.cmpf ogt, %282, %321 : vector<8x32xf32>
    %cst_132 = arith.constant 0.000000e+00 : f32
    %323 = vector.broadcast %cst_132 : f32 to vector<8x32xf32>
    %324 = arith.cmpf ogt, %284, %323 : vector<8x32xf32>
    %325 = arith.select %322, %311, %273 : vector<8x32xi1>, vector<8x32xf32>
    %326 = arith.select %322, %308, %274 : vector<8x32xi1>, vector<8x32xf32>
    %327 = arith.select %324, %320, %275 : vector<8x32xi1>, vector<8x32xf32>
    %328 = arith.select %324, %317, %276 : vector<8x32xi1>, vector<8x32xf32>
    %329 = arith.mulf %282, %311 : vector<8x32xf32>
    %c40_133 = arith.constant 40 : index
    %c0_134 = arith.constant 0 : index
    %330 = vector.load %arg7[%c40_133, %c0_134] : memref<64x32xf32, #tpu.memory_space<vmem>>, vector<8x32xf32>
    tpu.vector_store %arg7[%c40_133, %c0_134], %329 {strides = array<i32>} : memref<64x32xf32, #tpu.memory_space<vmem>>, vector<8x32xf32>,
    %331 = arith.mulf %284, %320 : vector<8x32xf32>
    %c16_135 = arith.constant 16 : index
    %c0_136 = arith.constant 0 : index
    %332 = vector.load %arg8[%c16_135, %c0_136] : memref<64x32xf32, #tpu.memory_space<vmem>>, vector<8x32xf32>
    tpu.vector_store %arg8[%c16_135, %c0_136], %331 {strides = array<i32>} : memref<64x32xf32, #tpu.memory_space<vmem>>, vector<8x32xf32>,
    %c0_137 = arith.constant 0 : index
    %c48_138 = arith.constant 48 : index
    %c0_139 = arith.constant 0 : index
    %333 = vector.load %arg2[%c0_137, %c48_138, %c0_139] : memref<1x64x32xf32, #tpu.memory_space<vmem>>, vector<1x8x32xf32>
    %334 = vector.shape_cast %333 : vector<1x8x32xf32> to vector<8x32xf32>
    %c0_140 = arith.constant 0 : index
    %c8_141 = arith.constant 8 : index
    %c0_142 = arith.constant 0 : index
    %335 = vector.load %arg2[%c0_140, %c8_141, %c0_142] : memref<1x64x32xf32, #tpu.memory_space<vmem>>, vector<1x8x32xf32>
    %336 = vector.shape_cast %335 : vector<1x8x32xf32> to vector<8x32xf32>
    %c48_143 = arith.constant 48 : index
    %c0_144 = arith.constant 0 : index
    %337 = vector.load %arg9[%c48_143, %c0_144] : memref<64x128xf32, #tpu.memory_space<vmem>>, vector<8x128xf32>
    %cst_145 = arith.constant dense<0.000000e+00> : vector<8x128xf32>
    %338 = tpu.matmul %325, %14, %cst_145 {dimension_numbers = #tpu.dot_dimension_numbers<[1], [0], [0], [1], [0, 0, 1, 1], [], []>} : vector<8x32xf32>, vector<32x128xf32>, vector<8x128xf32> -> vector<8x128xf32>
    %339 = arith.addf %337, %338 : vector<8x128xf32>
    %c8_146 = arith.constant 8 : index
    %c0_147 = arith.constant 0 : index
    %340 = vector.load %arg10[%c8_146, %c0_147] : memref<64x128xf32, #tpu.memory_space<vmem>>, vector<8x128xf32>
    %cst_148 = arith.constant dense<0.000000e+00> : vector<8x128xf32>
    %341 = tpu.matmul %327, %16, %cst_148 {dimension_numbers = #tpu.dot_dimension_numbers<[1], [0], [0], [1], [0, 0, 1, 1], [], []>} : vector<8x32xf32>, vector<32x128xf32>, vector<8x128xf32> -> vector<8x128xf32>
    %342 = arith.addf %340, %341 : vector<8x128xf32>
    %343 = arith.negf %339 : vector<8x128xf32>
    %344 = math.exp %343 : vector<8x128xf32>
    %cst_149 = arith.constant 1.000000e+00 : f32
    %345 = vector.broadcast %cst_149 : f32 to vector<8x128xf32>
    %346 = arith.addf %345, %344 : vector<8x128xf32>
    %347 = arith.divf %345, %346 : vector<8x128xf32>
    %348 = math.tanh %339 : vector<8x128xf32>
    %349 = arith.negf %342 : vector<8x128xf32>
    %350 = math.exp %349 : vector<8x128xf32>
    %cst_150 = arith.constant 1.000000e+00 : f32
    %351 = vector.broadcast %cst_150 : f32 to vector<8x128xf32>
    %352 = arith.addf %351, %350 : vector<8x128xf32>
    %353 = arith.divf %351, %352 : vector<8x128xf32>
    %354 = math.tanh %342 : vector<8x128xf32>
    %355 = vector.extract_strided_slice %347 {offsets = [0, 32], sizes = [8, 32], strides = [1, 1]} : vector<8x128xf32> to vector<8x32xf32>
    %356 = arith.mulf %355, %326 : vector<8x32xf32>
    %357 = vector.extract_strided_slice %347 {offsets = [0, 0], sizes = [8, 32], strides = [1, 1]} : vector<8x128xf32> to vector<8x32xf32>
    %358 = vector.extract_strided_slice %348 {offsets = [0, 64], sizes = [8, 32], strides = [1, 1]} : vector<8x128xf32> to vector<8x32xf32>
    %359 = arith.mulf %357, %358 : vector<8x32xf32>
    %360 = arith.addf %356, %359 : vector<8x32xf32>
    %361 = vector.extract_strided_slice %347 {offsets = [0, 96], sizes = [8, 32], strides = [1, 1]} : vector<8x128xf32> to vector<8x32xf32>
    %362 = math.tanh %360 : vector<8x32xf32>
    %363 = arith.mulf %361, %362 : vector<8x32xf32>
    %364 = vector.extract_strided_slice %353 {offsets = [0, 32], sizes = [8, 32], strides = [1, 1]} : vector<8x128xf32> to vector<8x32xf32>
    %365 = arith.mulf %364, %328 : vector<8x32xf32>
    %366 = vector.extract_strided_slice %353 {offsets = [0, 0], sizes = [8, 32], strides = [1, 1]} : vector<8x128xf32> to vector<8x32xf32>
    %367 = vector.extract_strided_slice %354 {offsets = [0, 64], sizes = [8, 32], strides = [1, 1]} : vector<8x128xf32> to vector<8x32xf32>
    %368 = arith.mulf %366, %367 : vector<8x32xf32>
    %369 = arith.addf %365, %368 : vector<8x32xf32>
    %370 = vector.extract_strided_slice %353 {offsets = [0, 96], sizes = [8, 32], strides = [1, 1]} : vector<8x128xf32> to vector<8x32xf32>
    %371 = math.tanh %369 : vector<8x32xf32>
    %372 = arith.mulf %370, %371 : vector<8x32xf32>
    %cst_151 = arith.constant 0.000000e+00 : f32
    %373 = vector.broadcast %cst_151 : f32 to vector<8x32xf32>
    %374 = arith.cmpf ogt, %334, %373 : vector<8x32xf32>
    %cst_152 = arith.constant 0.000000e+00 : f32
    %375 = vector.broadcast %cst_152 : f32 to vector<8x32xf32>
    %376 = arith.cmpf ogt, %336, %375 : vector<8x32xf32>
    %377 = arith.select %374, %363, %325 : vector<8x32xi1>, vector<8x32xf32>
    %378 = arith.select %374, %360, %326 : vector<8x32xi1>, vector<8x32xf32>
    %379 = arith.select %376, %372, %327 : vector<8x32xi1>, vector<8x32xf32>
    %380 = arith.select %376, %369, %328 : vector<8x32xi1>, vector<8x32xf32>
    %381 = arith.mulf %334, %363 : vector<8x32xf32>
    %c48_153 = arith.constant 48 : index
    %c0_154 = arith.constant 0 : index
    %382 = vector.load %arg7[%c48_153, %c0_154] : memref<64x32xf32, #tpu.memory_space<vmem>>, vector<8x32xf32>
    tpu.vector_store %arg7[%c48_153, %c0_154], %381 {strides = array<i32>} : memref<64x32xf32, #tpu.memory_space<vmem>>, vector<8x32xf32>,
    %383 = arith.mulf %336, %372 : vector<8x32xf32>
    %c8_155 = arith.constant 8 : index
    %c0_156 = arith.constant 0 : index
    %384 = vector.load %arg8[%c8_155, %c0_156] : memref<64x32xf32, #tpu.memory_space<vmem>>, vector<8x32xf32>
    tpu.vector_store %arg8[%c8_155, %c0_156], %383 {strides = array<i32>} : memref<64x32xf32, #tpu.memory_space<vmem>>, vector<8x32xf32>,
    %c0_157 = arith.constant 0 : index
    %c56_158 = arith.constant 56 : index
    %c0_159 = arith.constant 0 : index
    %385 = vector.load %arg2[%c0_157, %c56_158, %c0_159] : memref<1x64x32xf32, #tpu.memory_space<vmem>>, vector<1x8x32xf32>
    %386 = vector.shape_cast %385 : vector<1x8x32xf32> to vector<8x32xf32>
    %c0_160 = arith.constant 0 : index
    %c0_161 = arith.constant 0 : index
    %c0_162 = arith.constant 0 : index
    %387 = vector.load %arg2[%c0_160, %c0_161, %c0_162] : memref<1x64x32xf32, #tpu.memory_space<vmem>>, vector<1x8x32xf32>
    %388 = vector.shape_cast %387 : vector<1x8x32xf32> to vector<8x32xf32>
    %c56_163 = arith.constant 56 : index
    %c0_164 = arith.constant 0 : index
    %389 = vector.load %arg9[%c56_163, %c0_164] : memref<64x128xf32, #tpu.memory_space<vmem>>, vector<8x128xf32>
    %cst_165 = arith.constant dense<0.000000e+00> : vector<8x128xf32>
    %390 = tpu.matmul %377, %14, %cst_165 {dimension_numbers = #tpu.dot_dimension_numbers<[1], [0], [0], [1], [0, 0, 1, 1], [], []>} : vector<8x32xf32>, vector<32x128xf32>, vector<8x128xf32> -> vector<8x128xf32>
    %391 = arith.addf %389, %390 : vector<8x128xf32>
    %c0_166 = arith.constant 0 : index
    %c0_167 = arith.constant 0 : index
    %392 = vector.load %arg10[%c0_166, %c0_167] : memref<64x128xf32, #tpu.memory_space<vmem>>, vector<8x128xf32>
    %cst_168 = arith.constant dense<0.000000e+00> : vector<8x128xf32>
    %393 = tpu.matmul %379, %16, %cst_168 {dimension_numbers = #tpu.dot_dimension_numbers<[1], [0], [0], [1], [0, 0, 1, 1], [], []>} : vector<8x32xf32>, vector<32x128xf32>, vector<8x128xf32> -> vector<8x128xf32>
    %394 = arith.addf %392, %393 : vector<8x128xf32>
    %395 = arith.negf %391 : vector<8x128xf32>
    %396 = math.exp %395 : vector<8x128xf32>
    %cst_169 = arith.constant 1.000000e+00 : f32
    %397 = vector.broadcast %cst_169 : f32 to vector<8x128xf32>
    %398 = arith.addf %397, %396 : vector<8x128xf32>
    %399 = arith.divf %397, %398 : vector<8x128xf32>
    %400 = math.tanh %391 : vector<8x128xf32>
    %401 = arith.negf %394 : vector<8x128xf32>
    %402 = math.exp %401 : vector<8x128xf32>
    %cst_170 = arith.constant 1.000000e+00 : f32
    %403 = vector.broadcast %cst_170 : f32 to vector<8x128xf32>
    %404 = arith.addf %403, %402 : vector<8x128xf32>
    %405 = arith.divf %403, %404 : vector<8x128xf32>
    %406 = math.tanh %394 : vector<8x128xf32>
    %407 = vector.extract_strided_slice %399 {offsets = [0, 32], sizes = [8, 32], strides = [1, 1]} : vector<8x128xf32> to vector<8x32xf32>
    %408 = arith.mulf %407, %378 : vector<8x32xf32>
    %409 = vector.extract_strided_slice %399 {offsets = [0, 0], sizes = [8, 32], strides = [1, 1]} : vector<8x128xf32> to vector<8x32xf32>
    %410 = vector.extract_strided_slice %400 {offsets = [0, 64], sizes = [8, 32], strides = [1, 1]} : vector<8x128xf32> to vector<8x32xf32>
    %411 = arith.mulf %409, %410 : vector<8x32xf32>
    %412 = arith.addf %408, %411 : vector<8x32xf32>
    %413 = vector.extract_strided_slice %399 {offsets = [0, 96], sizes = [8, 32], strides = [1, 1]} : vector<8x128xf32> to vector<8x32xf32>
    %414 = math.tanh %412 : vector<8x32xf32>
    %415 = arith.mulf %413, %414 : vector<8x32xf32>
    %416 = vector.extract_strided_slice %405 {offsets = [0, 32], sizes = [8, 32], strides = [1, 1]} : vector<8x128xf32> to vector<8x32xf32>
    %417 = arith.mulf %416, %380 : vector<8x32xf32>
    %418 = vector.extract_strided_slice %405 {offsets = [0, 0], sizes = [8, 32], strides = [1, 1]} : vector<8x128xf32> to vector<8x32xf32>
    %419 = vector.extract_strided_slice %406 {offsets = [0, 64], sizes = [8, 32], strides = [1, 1]} : vector<8x128xf32> to vector<8x32xf32>
    %420 = arith.mulf %418, %419 : vector<8x32xf32>
    %421 = arith.addf %417, %420 : vector<8x32xf32>
    %422 = vector.extract_strided_slice %405 {offsets = [0, 96], sizes = [8, 32], strides = [1, 1]} : vector<8x128xf32> to vector<8x32xf32>
    %423 = math.tanh %421 : vector<8x32xf32>
    %424 = arith.mulf %422, %423 : vector<8x32xf32>
    %425 = arith.mulf %386, %415 : vector<8x32xf32>
    %c56_171 = arith.constant 56 : index
    %c0_172 = arith.constant 0 : index
    %426 = vector.load %arg7[%c56_171, %c0_172] : memref<64x32xf32, #tpu.memory_space<vmem>>, vector<8x32xf32>
    tpu.vector_store %arg7[%c56_171, %c0_172], %425 {strides = array<i32>} : memref<64x32xf32, #tpu.memory_space<vmem>>, vector<8x32xf32>,
    %427 = arith.mulf %388, %424 : vector<8x32xf32>
    %c0_173 = arith.constant 0 : index
    %c0_174 = arith.constant 0 : index
    %428 = vector.load %arg8[%c0_173, %c0_174] : memref<64x32xf32, #tpu.memory_space<vmem>>, vector<8x32xf32>
    tpu.vector_store %arg8[%c0_173, %c0_174], %427 {strides = array<i32>} : memref<64x32xf32, #tpu.memory_space<vmem>>, vector<8x32xf32>,
    %c1_175 = arith.constant 1 : index
    %c0_176 = arith.constant 0 : index
    %c0_177 = arith.constant 0 : index
    %c0_178 = arith.constant 0 : index
    %429 = vector.load %arg3[%c1_175, %c0_176, %c0_177, %c0_178] : memref<2x2x32x256xf32, #tpu.memory_space<vmem>>, vector<1x1x32x256xf32>
    %430 = vector.shape_cast %429 : vector<1x1x32x256xf32> to vector<32x256xf32>
    %c1_179 = arith.constant 1 : index
    %c1_180 = arith.constant 1 : index
    %c0_181 = arith.constant 0 : index
    %c0_182 = arith.constant 0 : index
    %431 = vector.load %arg3[%c1_179, %c1_180, %c0_181, %c0_182] : memref<2x2x32x256xf32, #tpu.memory_space<vmem>>, vector<1x1x32x256xf32>
    %432 = vector.shape_cast %431 : vector<1x1x32x256xf32> to vector<32x256xf32>
    %c1_183 = arith.constant 1 : index
    %c0_184 = arith.constant 0 : index
    %c0_185 = arith.constant 0 : index
    %433 = vector.load %arg5[%c1_183, %c0_184, %c0_185] : memref<2x1x256xf32, #tpu.memory_space<vmem>>, vector<1x1x256xf32>
    %434 = vector.shape_cast %433 : vector<1x1x256xf32> to vector<1x256xf32>
    %c0_186 = arith.constant 0 : index
    %c0_187 = arith.constant 0 : index
    %435 = vector.load %arg7[%c0_186, %c0_187] : memref<64x32xf32, #tpu.memory_space<vmem>>, vector<64x32xf32>
    %cst_188 = arith.constant dense<0.000000e+00> : vector<64x256xf32>
    %436 = tpu.matmul %435, %430, %cst_188 {dimension_numbers = #tpu.dot_dimension_numbers<[1], [0], [0], [1], [0, 0, 1, 1], [], []>} : vector<64x32xf32>, vector<32x256xf32>, vector<64x256xf32> -> vector<64x256xf32>
    %c0_189 = arith.constant 0 : index
    %c0_190 = arith.constant 0 : index
    %437 = vector.load %arg8[%c0_189, %c0_190] : memref<64x32xf32, #tpu.memory_space<vmem>>, vector<64x32xf32>
    %cst_191 = arith.constant dense<0.000000e+00> : vector<64x256xf32>
    %438 = tpu.matmul %437, %432, %cst_191 {dimension_numbers = #tpu.dot_dimension_numbers<[1], [0], [0], [1], [0, 0, 1, 1], [], []>} : vector<64x32xf32>, vector<32x256xf32>, vector<64x256xf32> -> vector<64x256xf32>
    %439 = arith.addf %436, %438 : vector<64x256xf32>
    %440 = vector.broadcast %434 : vector<1x256xf32> to vector<64x256xf32>
    %441 = arith.addf %439, %440 : vector<64x256xf32>
    %442 = vector.extract_strided_slice %441 {offsets = [0, 0], sizes = [64, 128], strides = [1, 1]} : vector<64x256xf32> to vector<64x128xf32>
    %c0_192 = arith.constant 0 : index
    %c0_193 = arith.constant 0 : index
    %443 = vector.load %arg9[%c0_192, %c0_193] : memref<64x128xf32, #tpu.memory_space<vmem>>, vector<64x128xf32>
    tpu.vector_store %arg9[%c0_192, %c0_193], %442 {strides = array<i32>} : memref<64x128xf32, #tpu.memory_space<vmem>>, vector<64x128xf32>,
    %444 = vector.extract_strided_slice %441 {offsets = [0, 128], sizes = [64, 128], strides = [1, 1]} : vector<64x256xf32> to vector<64x128xf32>
    %c0_194 = arith.constant 0 : index
    %c0_195 = arith.constant 0 : index
    %445 = vector.load %arg10[%c0_194, %c0_195] : memref<64x128xf32, #tpu.memory_space<vmem>>, vector<64x128xf32>
    tpu.vector_store %arg10[%c0_194, %c0_195], %444 {strides = array<i32>} : memref<64x128xf32, #tpu.memory_space<vmem>>, vector<64x128xf32>,
    %c1_196 = arith.constant 1 : index
    %c0_197 = arith.constant 0 : index
    %c0_198 = arith.constant 0 : index
    %c0_199 = arith.constant 0 : index
    %446 = vector.load %arg4[%c1_196, %c0_197, %c0_198, %c0_199] : memref<2x2x32x128xf32, #tpu.memory_space<vmem>>, vector<1x1x32x128xf32>
    %447 = vector.shape_cast %446 : vector<1x1x32x128xf32> to vector<32x128xf32>
    %c1_200 = arith.constant 1 : index
    %c1_201 = arith.constant 1 : index
    %c0_202 = arith.constant 0 : index
    %c0_203 = arith.constant 0 : index
    %448 = vector.load %arg4[%c1_200, %c1_201, %c0_202, %c0_203] : memref<2x2x32x128xf32, #tpu.memory_space<vmem>>, vector<1x1x32x128xf32>
    %449 = vector.shape_cast %448 : vector<1x1x32x128xf32> to vector<32x128xf32>
    %cst_204 = arith.constant 0.000000e+00 : f32
    %450 = vector.broadcast %cst_204 : f32 to vector<8x32xf32>
    %cst_205 = arith.constant 0.000000e+00 : f32
    %451 = vector.broadcast %cst_205 : f32 to vector<8x32xf32>
    %cst_206 = arith.constant 0.000000e+00 : f32
    %452 = vector.broadcast %cst_206 : f32 to vector<8x32xf32>
    %cst_207 = arith.constant 0.000000e+00 : f32
    %453 = vector.broadcast %cst_207 : f32 to vector<8x32xf32>
    %c0_208 = arith.constant 0 : index
    %c0_209 = arith.constant 0 : index
    %c0_210 = arith.constant 0 : index
    %454 = vector.load %arg2[%c0_208, %c0_209, %c0_210] : memref<1x64x32xf32, #tpu.memory_space<vmem>>, vector<1x8x32xf32>
    %455 = vector.shape_cast %454 : vector<1x8x32xf32> to vector<8x32xf32>
    %c0_211 = arith.constant 0 : index
    %c56_212 = arith.constant 56 : index
    %c0_213 = arith.constant 0 : index
    %456 = vector.load %arg2[%c0_211, %c56_212, %c0_213] : memref<1x64x32xf32, #tpu.memory_space<vmem>>, vector<1x8x32xf32>
    %457 = vector.shape_cast %456 : vector<1x8x32xf32> to vector<8x32xf32>
    %c0_214 = arith.constant 0 : index
    %c0_215 = arith.constant 0 : index
    %458 = vector.load %arg9[%c0_214, %c0_215] : memref<64x128xf32, #tpu.memory_space<vmem>>, vector<8x128xf32>
    %cst_216 = arith.constant dense<0.000000e+00> : vector<8x128xf32>
    %459 = tpu.matmul %450, %447, %cst_216 {dimension_numbers = #tpu.dot_dimension_numbers<[1], [0], [0], [1], [0, 0, 1, 1], [], []>} : vector<8x32xf32>, vector<32x128xf32>, vector<8x128xf32> -> vector<8x128xf32>
    %460 = arith.addf %458, %459 : vector<8x128xf32>
    %c56_217 = arith.constant 56 : index
    %c0_218 = arith.constant 0 : index
    %461 = vector.load %arg10[%c56_217, %c0_218] : memref<64x128xf32, #tpu.memory_space<vmem>>, vector<8x128xf32>
    %cst_219 = arith.constant dense<0.000000e+00> : vector<8x128xf32>
    %462 = tpu.matmul %452, %449, %cst_219 {dimension_numbers = #tpu.dot_dimension_numbers<[1], [0], [0], [1], [0, 0, 1, 1], [], []>} : vector<8x32xf32>, vector<32x128xf32>, vector<8x128xf32> -> vector<8x128xf32>
    %463 = arith.addf %461, %462 : vector<8x128xf32>
    %464 = arith.negf %460 : vector<8x128xf32>
    %465 = math.exp %464 : vector<8x128xf32>
    %cst_220 = arith.constant 1.000000e+00 : f32
    %466 = vector.broadcast %cst_220 : f32 to vector<8x128xf32>
    %467 = arith.addf %466, %465 : vector<8x128xf32>
    %468 = arith.divf %466, %467 : vector<8x128xf32>
    %469 = math.tanh %460 : vector<8x128xf32>
    %470 = arith.negf %463 : vector<8x128xf32>
    %471 = math.exp %470 : vector<8x128xf32>
    %cst_221 = arith.constant 1.000000e+00 : f32
    %472 = vector.broadcast %cst_221 : f32 to vector<8x128xf32>
    %473 = arith.addf %472, %471 : vector<8x128xf32>
    %474 = arith.divf %472, %473 : vector<8x128xf32>
    %475 = math.tanh %463 : vector<8x128xf32>
    %476 = vector.extract_strided_slice %468 {offsets = [0, 32], sizes = [8, 32], strides = [1, 1]} : vector<8x128xf32> to vector<8x32xf32>
    %477 = arith.mulf %476, %451 : vector<8x32xf32>
    %478 = vector.extract_strided_slice %468 {offsets = [0, 0], sizes = [8, 32], strides = [1, 1]} : vector<8x128xf32> to vector<8x32xf32>
    %479 = vector.extract_strided_slice %469 {offsets = [0, 64], sizes = [8, 32], strides = [1, 1]} : vector<8x128xf32> to vector<8x32xf32>
    %480 = arith.mulf %478, %479 : vector<8x32xf32>
    %481 = arith.addf %477, %480 : vector<8x32xf32>
    %482 = vector.extract_strided_slice %468 {offsets = [0, 96], sizes = [8, 32], strides = [1, 1]} : vector<8x128xf32> to vector<8x32xf32>
    %483 = math.tanh %481 : vector<8x32xf32>
    %484 = arith.mulf %482, %483 : vector<8x32xf32>
    %485 = vector.extract_strided_slice %474 {offsets = [0, 32], sizes = [8, 32], strides = [1, 1]} : vector<8x128xf32> to vector<8x32xf32>
    %486 = arith.mulf %485, %453 : vector<8x32xf32>
    %487 = vector.extract_strided_slice %474 {offsets = [0, 0], sizes = [8, 32], strides = [1, 1]} : vector<8x128xf32> to vector<8x32xf32>
    %488 = vector.extract_strided_slice %475 {offsets = [0, 64], sizes = [8, 32], strides = [1, 1]} : vector<8x128xf32> to vector<8x32xf32>
    %489 = arith.mulf %487, %488 : vector<8x32xf32>
    %490 = arith.addf %486, %489 : vector<8x32xf32>
    %491 = vector.extract_strided_slice %474 {offsets = [0, 96], sizes = [8, 32], strides = [1, 1]} : vector<8x128xf32> to vector<8x32xf32>
    %492 = math.tanh %490 : vector<8x32xf32>
    %493 = arith.mulf %491, %492 : vector<8x32xf32>
    %cst_222 = arith.constant 0.000000e+00 : f32
    %494 = vector.broadcast %cst_222 : f32 to vector<8x32xf32>
    %495 = arith.cmpf ogt, %455, %494 : vector<8x32xf32>
    %cst_223 = arith.constant 0.000000e+00 : f32
    %496 = vector.broadcast %cst_223 : f32 to vector<8x32xf32>
    %497 = arith.cmpf ogt, %457, %496 : vector<8x32xf32>
    %498 = arith.select %495, %484, %450 : vector<8x32xi1>, vector<8x32xf32>
    %499 = arith.select %495, %481, %451 : vector<8x32xi1>, vector<8x32xf32>
    %500 = arith.select %497, %493, %452 : vector<8x32xi1>, vector<8x32xf32>
    %501 = arith.select %497, %490, %453 : vector<8x32xi1>, vector<8x32xf32>
    %c0_224 = arith.constant 0 : index
    %c8_225 = arith.constant 8 : index
    %c0_226 = arith.constant 0 : index
    %502 = vector.load %arg2[%c0_224, %c8_225, %c0_226] : memref<1x64x32xf32, #tpu.memory_space<vmem>>, vector<1x8x32xf32>
    %503 = vector.shape_cast %502 : vector<1x8x32xf32> to vector<8x32xf32>
    %c0_227 = arith.constant 0 : index
    %c48_228 = arith.constant 48 : index
    %c0_229 = arith.constant 0 : index
    %504 = vector.load %arg2[%c0_227, %c48_228, %c0_229] : memref<1x64x32xf32, #tpu.memory_space<vmem>>, vector<1x8x32xf32>
    %505 = vector.shape_cast %504 : vector<1x8x32xf32> to vector<8x32xf32>
    %c8_230 = arith.constant 8 : index
    %c0_231 = arith.constant 0 : index
    %506 = vector.load %arg9[%c8_230, %c0_231] : memref<64x128xf32, #tpu.memory_space<vmem>>, vector<8x128xf32>
    %cst_232 = arith.constant dense<0.000000e+00> : vector<8x128xf32>
    %507 = tpu.matmul %498, %447, %cst_232 {dimension_numbers = #tpu.dot_dimension_numbers<[1], [0], [0], [1], [0, 0, 1, 1], [], []>} : vector<8x32xf32>, vector<32x128xf32>, vector<8x128xf32> -> vector<8x128xf32>
    %508 = arith.addf %506, %507 : vector<8x128xf32>
    %c48_233 = arith.constant 48 : index
    %c0_234 = arith.constant 0 : index
    %509 = vector.load %arg10[%c48_233, %c0_234] : memref<64x128xf32, #tpu.memory_space<vmem>>, vector<8x128xf32>
    %cst_235 = arith.constant dense<0.000000e+00> : vector<8x128xf32>
    %510 = tpu.matmul %500, %449, %cst_235 {dimension_numbers = #tpu.dot_dimension_numbers<[1], [0], [0], [1], [0, 0, 1, 1], [], []>} : vector<8x32xf32>, vector<32x128xf32>, vector<8x128xf32> -> vector<8x128xf32>
    %511 = arith.addf %509, %510 : vector<8x128xf32>
    %512 = arith.negf %508 : vector<8x128xf32>
    %513 = math.exp %512 : vector<8x128xf32>
    %cst_236 = arith.constant 1.000000e+00 : f32
    %514 = vector.broadcast %cst_236 : f32 to vector<8x128xf32>
    %515 = arith.addf %514, %513 : vector<8x128xf32>
    %516 = arith.divf %514, %515 : vector<8x128xf32>
    %517 = math.tanh %508 : vector<8x128xf32>
    %518 = arith.negf %511 : vector<8x128xf32>
    %519 = math.exp %518 : vector<8x128xf32>
    %cst_237 = arith.constant 1.000000e+00 : f32
    %520 = vector.broadcast %cst_237 : f32 to vector<8x128xf32>
    %521 = arith.addf %520, %519 : vector<8x128xf32>
    %522 = arith.divf %520, %521 : vector<8x128xf32>
    %523 = math.tanh %511 : vector<8x128xf32>
    %524 = vector.extract_strided_slice %516 {offsets = [0, 32], sizes = [8, 32], strides = [1, 1]} : vector<8x128xf32> to vector<8x32xf32>
    %525 = arith.mulf %524, %499 : vector<8x32xf32>
    %526 = vector.extract_strided_slice %516 {offsets = [0, 0], sizes = [8, 32], strides = [1, 1]} : vector<8x128xf32> to vector<8x32xf32>
    %527 = vector.extract_strided_slice %517 {offsets = [0, 64], sizes = [8, 32], strides = [1, 1]} : vector<8x128xf32> to vector<8x32xf32>
    %528 = arith.mulf %526, %527 : vector<8x32xf32>
    %529 = arith.addf %525, %528 : vector<8x32xf32>
    %530 = vector.extract_strided_slice %516 {offsets = [0, 96], sizes = [8, 32], strides = [1, 1]} : vector<8x128xf32> to vector<8x32xf32>
    %531 = math.tanh %529 : vector<8x32xf32>
    %532 = arith.mulf %530, %531 : vector<8x32xf32>
    %533 = vector.extract_strided_slice %522 {offsets = [0, 32], sizes = [8, 32], strides = [1, 1]} : vector<8x128xf32> to vector<8x32xf32>
    %534 = arith.mulf %533, %501 : vector<8x32xf32>
    %535 = vector.extract_strided_slice %522 {offsets = [0, 0], sizes = [8, 32], strides = [1, 1]} : vector<8x128xf32> to vector<8x32xf32>
    %536 = vector.extract_strided_slice %523 {offsets = [0, 64], sizes = [8, 32], strides = [1, 1]} : vector<8x128xf32> to vector<8x32xf32>
    %537 = arith.mulf %535, %536 : vector<8x32xf32>
    %538 = arith.addf %534, %537 : vector<8x32xf32>
    %539 = vector.extract_strided_slice %522 {offsets = [0, 96], sizes = [8, 32], strides = [1, 1]} : vector<8x128xf32> to vector<8x32xf32>
    %540 = math.tanh %538 : vector<8x32xf32>
    %541 = arith.mulf %539, %540 : vector<8x32xf32>
    %cst_238 = arith.constant 0.000000e+00 : f32
    %542 = vector.broadcast %cst_238 : f32 to vector<8x32xf32>
    %543 = arith.cmpf ogt, %503, %542 : vector<8x32xf32>
    %cst_239 = arith.constant 0.000000e+00 : f32
    %544 = vector.broadcast %cst_239 : f32 to vector<8x32xf32>
    %545 = arith.cmpf ogt, %505, %544 : vector<8x32xf32>
    %546 = arith.select %543, %532, %498 : vector<8x32xi1>, vector<8x32xf32>
    %547 = arith.select %543, %529, %499 : vector<8x32xi1>, vector<8x32xf32>
    %548 = arith.select %545, %541, %500 : vector<8x32xi1>, vector<8x32xf32>
    %549 = arith.select %545, %538, %501 : vector<8x32xi1>, vector<8x32xf32>
    %c0_240 = arith.constant 0 : index
    %c16_241 = arith.constant 16 : index
    %c0_242 = arith.constant 0 : index
    %550 = vector.load %arg2[%c0_240, %c16_241, %c0_242] : memref<1x64x32xf32, #tpu.memory_space<vmem>>, vector<1x8x32xf32>
    %551 = vector.shape_cast %550 : vector<1x8x32xf32> to vector<8x32xf32>
    %c0_243 = arith.constant 0 : index
    %c40_244 = arith.constant 40 : index
    %c0_245 = arith.constant 0 : index
    %552 = vector.load %arg2[%c0_243, %c40_244, %c0_245] : memref<1x64x32xf32, #tpu.memory_space<vmem>>, vector<1x8x32xf32>
    %553 = vector.shape_cast %552 : vector<1x8x32xf32> to vector<8x32xf32>
    %c16_246 = arith.constant 16 : index
    %c0_247 = arith.constant 0 : index
    %554 = vector.load %arg9[%c16_246, %c0_247] : memref<64x128xf32, #tpu.memory_space<vmem>>, vector<8x128xf32>
    %cst_248 = arith.constant dense<0.000000e+00> : vector<8x128xf32>
    %555 = tpu.matmul %546, %447, %cst_248 {dimension_numbers = #tpu.dot_dimension_numbers<[1], [0], [0], [1], [0, 0, 1, 1], [], []>} : vector<8x32xf32>, vector<32x128xf32>, vector<8x128xf32> -> vector<8x128xf32>
    %556 = arith.addf %554, %555 : vector<8x128xf32>
    %c40_249 = arith.constant 40 : index
    %c0_250 = arith.constant 0 : index
    %557 = vector.load %arg10[%c40_249, %c0_250] : memref<64x128xf32, #tpu.memory_space<vmem>>, vector<8x128xf32>
    %cst_251 = arith.constant dense<0.000000e+00> : vector<8x128xf32>
    %558 = tpu.matmul %548, %449, %cst_251 {dimension_numbers = #tpu.dot_dimension_numbers<[1], [0], [0], [1], [0, 0, 1, 1], [], []>} : vector<8x32xf32>, vector<32x128xf32>, vector<8x128xf32> -> vector<8x128xf32>
    %559 = arith.addf %557, %558 : vector<8x128xf32>
    %560 = arith.negf %556 : vector<8x128xf32>
    %561 = math.exp %560 : vector<8x128xf32>
    %cst_252 = arith.constant 1.000000e+00 : f32
    %562 = vector.broadcast %cst_252 : f32 to vector<8x128xf32>
    %563 = arith.addf %562, %561 : vector<8x128xf32>
    %564 = arith.divf %562, %563 : vector<8x128xf32>
    %565 = math.tanh %556 : vector<8x128xf32>
    %566 = arith.negf %559 : vector<8x128xf32>
    %567 = math.exp %566 : vector<8x128xf32>
    %cst_253 = arith.constant 1.000000e+00 : f32
    %568 = vector.broadcast %cst_253 : f32 to vector<8x128xf32>
    %569 = arith.addf %568, %567 : vector<8x128xf32>
    %570 = arith.divf %568, %569 : vector<8x128xf32>
    %571 = math.tanh %559 : vector<8x128xf32>
    %572 = vector.extract_strided_slice %564 {offsets = [0, 32], sizes = [8, 32], strides = [1, 1]} : vector<8x128xf32> to vector<8x32xf32>
    %573 = arith.mulf %572, %547 : vector<8x32xf32>
    %574 = vector.extract_strided_slice %564 {offsets = [0, 0], sizes = [8, 32], strides = [1, 1]} : vector<8x128xf32> to vector<8x32xf32>
    %575 = vector.extract_strided_slice %565 {offsets = [0, 64], sizes = [8, 32], strides = [1, 1]} : vector<8x128xf32> to vector<8x32xf32>
    %576 = arith.mulf %574, %575 : vector<8x32xf32>
    %577 = arith.addf %573, %576 : vector<8x32xf32>
    %578 = vector.extract_strided_slice %564 {offsets = [0, 96], sizes = [8, 32], strides = [1, 1]} : vector<8x128xf32> to vector<8x32xf32>
    %579 = math.tanh %577 : vector<8x32xf32>
    %580 = arith.mulf %578, %579 : vector<8x32xf32>
    %581 = vector.extract_strided_slice %570 {offsets = [0, 32], sizes = [8, 32], strides = [1, 1]} : vector<8x128xf32> to vector<8x32xf32>
    %582 = arith.mulf %581, %549 : vector<8x32xf32>
    %583 = vector.extract_strided_slice %570 {offsets = [0, 0], sizes = [8, 32], strides = [1, 1]} : vector<8x128xf32> to vector<8x32xf32>
    %584 = vector.extract_strided_slice %571 {offsets = [0, 64], sizes = [8, 32], strides = [1, 1]} : vector<8x128xf32> to vector<8x32xf32>
    %585 = arith.mulf %583, %584 : vector<8x32xf32>
    %586 = arith.addf %582, %585 : vector<8x32xf32>
    %587 = vector.extract_strided_slice %570 {offsets = [0, 96], sizes = [8, 32], strides = [1, 1]} : vector<8x128xf32> to vector<8x32xf32>
    %588 = math.tanh %586 : vector<8x32xf32>
    %589 = arith.mulf %587, %588 : vector<8x32xf32>
    %cst_254 = arith.constant 0.000000e+00 : f32
    %590 = vector.broadcast %cst_254 : f32 to vector<8x32xf32>
    %591 = arith.cmpf ogt, %551, %590 : vector<8x32xf32>
    %cst_255 = arith.constant 0.000000e+00 : f32
    %592 = vector.broadcast %cst_255 : f32 to vector<8x32xf32>
    %593 = arith.cmpf ogt, %553, %592 : vector<8x32xf32>
    %594 = arith.select %591, %580, %546 : vector<8x32xi1>, vector<8x32xf32>
    %595 = arith.select %591, %577, %547 : vector<8x32xi1>, vector<8x32xf32>
    %596 = arith.select %593, %589, %548 : vector<8x32xi1>, vector<8x32xf32>
    %597 = arith.select %593, %586, %549 : vector<8x32xi1>, vector<8x32xf32>
    %c0_256 = arith.constant 0 : index
    %c24_257 = arith.constant 24 : index
    %c0_258 = arith.constant 0 : index
    %598 = vector.load %arg2[%c0_256, %c24_257, %c0_258] : memref<1x64x32xf32, #tpu.memory_space<vmem>>, vector<1x8x32xf32>
    %599 = vector.shape_cast %598 : vector<1x8x32xf32> to vector<8x32xf32>
    %c0_259 = arith.constant 0 : index
    %c32_260 = arith.constant 32 : index
    %c0_261 = arith.constant 0 : index
    %600 = vector.load %arg2[%c0_259, %c32_260, %c0_261] : memref<1x64x32xf32, #tpu.memory_space<vmem>>, vector<1x8x32xf32>
    %601 = vector.shape_cast %600 : vector<1x8x32xf32> to vector<8x32xf32>
    %c24_262 = arith.constant 24 : index
    %c0_263 = arith.constant 0 : index
    %602 = vector.load %arg9[%c24_262, %c0_263] : memref<64x128xf32, #tpu.memory_space<vmem>>, vector<8x128xf32>
    %cst_264 = arith.constant dense<0.000000e+00> : vector<8x128xf32>
    %603 = tpu.matmul %594, %447, %cst_264 {dimension_numbers = #tpu.dot_dimension_numbers<[1], [0], [0], [1], [0, 0, 1, 1], [], []>} : vector<8x32xf32>, vector<32x128xf32>, vector<8x128xf32> -> vector<8x128xf32>
    %604 = arith.addf %602, %603 : vector<8x128xf32>
    %c32_265 = arith.constant 32 : index
    %c0_266 = arith.constant 0 : index
    %605 = vector.load %arg10[%c32_265, %c0_266] : memref<64x128xf32, #tpu.memory_space<vmem>>, vector<8x128xf32>
    %cst_267 = arith.constant dense<0.000000e+00> : vector<8x128xf32>
    %606 = tpu.matmul %596, %449, %cst_267 {dimension_numbers = #tpu.dot_dimension_numbers<[1], [0], [0], [1], [0, 0, 1, 1], [], []>} : vector<8x32xf32>, vector<32x128xf32>, vector<8x128xf32> -> vector<8x128xf32>
    %607 = arith.addf %605, %606 : vector<8x128xf32>
    %608 = arith.negf %604 : vector<8x128xf32>
    %609 = math.exp %608 : vector<8x128xf32>
    %cst_268 = arith.constant 1.000000e+00 : f32
    %610 = vector.broadcast %cst_268 : f32 to vector<8x128xf32>
    %611 = arith.addf %610, %609 : vector<8x128xf32>
    %612 = arith.divf %610, %611 : vector<8x128xf32>
    %613 = math.tanh %604 : vector<8x128xf32>
    %614 = arith.negf %607 : vector<8x128xf32>
    %615 = math.exp %614 : vector<8x128xf32>
    %cst_269 = arith.constant 1.000000e+00 : f32
    %616 = vector.broadcast %cst_269 : f32 to vector<8x128xf32>
    %617 = arith.addf %616, %615 : vector<8x128xf32>
    %618 = arith.divf %616, %617 : vector<8x128xf32>
    %619 = math.tanh %607 : vector<8x128xf32>
    %620 = vector.extract_strided_slice %612 {offsets = [0, 32], sizes = [8, 32], strides = [1, 1]} : vector<8x128xf32> to vector<8x32xf32>
    %621 = arith.mulf %620, %595 : vector<8x32xf32>
    %622 = vector.extract_strided_slice %612 {offsets = [0, 0], sizes = [8, 32], strides = [1, 1]} : vector<8x128xf32> to vector<8x32xf32>
    %623 = vector.extract_strided_slice %613 {offsets = [0, 64], sizes = [8, 32], strides = [1, 1]} : vector<8x128xf32> to vector<8x32xf32>
    %624 = arith.mulf %622, %623 : vector<8x32xf32>
    %625 = arith.addf %621, %624 : vector<8x32xf32>
    %626 = vector.extract_strided_slice %612 {offsets = [0, 96], sizes = [8, 32], strides = [1, 1]} : vector<8x128xf32> to vector<8x32xf32>
    %627 = math.tanh %625 : vector<8x32xf32>
    %628 = arith.mulf %626, %627 : vector<8x32xf32>
    %629 = vector.extract_strided_slice %618 {offsets = [0, 32], sizes = [8, 32], strides = [1, 1]} : vector<8x128xf32> to vector<8x32xf32>
    %630 = arith.mulf %629, %597 : vector<8x32xf32>
    %631 = vector.extract_strided_slice %618 {offsets = [0, 0], sizes = [8, 32], strides = [1, 1]} : vector<8x128xf32> to vector<8x32xf32>
    %632 = vector.extract_strided_slice %619 {offsets = [0, 64], sizes = [8, 32], strides = [1, 1]} : vector<8x128xf32> to vector<8x32xf32>
    %633 = arith.mulf %631, %632 : vector<8x32xf32>
    %634 = arith.addf %630, %633 : vector<8x32xf32>
    %635 = vector.extract_strided_slice %618 {offsets = [0, 96], sizes = [8, 32], strides = [1, 1]} : vector<8x128xf32> to vector<8x32xf32>
    %636 = math.tanh %634 : vector<8x32xf32>
    %637 = arith.mulf %635, %636 : vector<8x32xf32>
    %cst_270 = arith.constant 0.000000e+00 : f32
    %638 = vector.broadcast %cst_270 : f32 to vector<8x32xf32>
    %639 = arith.cmpf ogt, %599, %638 : vector<8x32xf32>
    %cst_271 = arith.constant 0.000000e+00 : f32
    %640 = vector.broadcast %cst_271 : f32 to vector<8x32xf32>
    %641 = arith.cmpf ogt, %601, %640 : vector<8x32xf32>
    %642 = arith.select %639, %628, %594 : vector<8x32xi1>, vector<8x32xf32>
    %643 = arith.select %639, %625, %595 : vector<8x32xi1>, vector<8x32xf32>
    %644 = arith.select %641, %637, %596 : vector<8x32xi1>, vector<8x32xf32>
    %645 = arith.select %641, %634, %597 : vector<8x32xi1>, vector<8x32xf32>
    %c0_272 = arith.constant 0 : index
    %c32_273 = arith.constant 32 : index
    %c0_274 = arith.constant 0 : index
    %646 = vector.load %arg2[%c0_272, %c32_273, %c0_274] : memref<1x64x32xf32, #tpu.memory_space<vmem>>, vector<1x8x32xf32>
    %647 = vector.shape_cast %646 : vector<1x8x32xf32> to vector<8x32xf32>
    %c0_275 = arith.constant 0 : index
    %c24_276 = arith.constant 24 : index
    %c0_277 = arith.constant 0 : index
    %648 = vector.load %arg2[%c0_275, %c24_276, %c0_277] : memref<1x64x32xf32, #tpu.memory_space<vmem>>, vector<1x8x32xf32>
    %649 = vector.shape_cast %648 : vector<1x8x32xf32> to vector<8x32xf32>
    %c32_278 = arith.constant 32 : index
    %c0_279 = arith.constant 0 : index
    %650 = vector.load %arg9[%c32_278, %c0_279] : memref<64x128xf32, #tpu.memory_space<vmem>>, vector<8x128xf32>
    %cst_280 = arith.constant dense<0.000000e+00> : vector<8x128xf32>
    %651 = tpu.matmul %642, %447, %cst_280 {dimension_numbers = #tpu.dot_dimension_numbers<[1], [0], [0], [1], [0, 0, 1, 1], [], []>} : vector<8x32xf32>, vector<32x128xf32>, vector<8x128xf32> -> vector<8x128xf32>
    %652 = arith.addf %650, %651 : vector<8x128xf32>
    %c24_281 = arith.constant 24 : index
    %c0_282 = arith.constant 0 : index
    %653 = vector.load %arg10[%c24_281, %c0_282] : memref<64x128xf32, #tpu.memory_space<vmem>>, vector<8x128xf32>
    %cst_283 = arith.constant dense<0.000000e+00> : vector<8x128xf32>
    %654 = tpu.matmul %644, %449, %cst_283 {dimension_numbers = #tpu.dot_dimension_numbers<[1], [0], [0], [1], [0, 0, 1, 1], [], []>} : vector<8x32xf32>, vector<32x128xf32>, vector<8x128xf32> -> vector<8x128xf32>
    %655 = arith.addf %653, %654 : vector<8x128xf32>
    %656 = arith.negf %652 : vector<8x128xf32>
    %657 = math.exp %656 : vector<8x128xf32>
    %cst_284 = arith.constant 1.000000e+00 : f32
    %658 = vector.broadcast %cst_284 : f32 to vector<8x128xf32>
    %659 = arith.addf %658, %657 : vector<8x128xf32>
    %660 = arith.divf %658, %659 : vector<8x128xf32>
    %661 = math.tanh %652 : vector<8x128xf32>
    %662 = arith.negf %655 : vector<8x128xf32>
    %663 = math.exp %662 : vector<8x128xf32>
    %cst_285 = arith.constant 1.000000e+00 : f32
    %664 = vector.broadcast %cst_285 : f32 to vector<8x128xf32>
    %665 = arith.addf %664, %663 : vector<8x128xf32>
    %666 = arith.divf %664, %665 : vector<8x128xf32>
    %667 = math.tanh %655 : vector<8x128xf32>
    %668 = vector.extract_strided_slice %660 {offsets = [0, 32], sizes = [8, 32], strides = [1, 1]} : vector<8x128xf32> to vector<8x32xf32>
    %669 = arith.mulf %668, %643 : vector<8x32xf32>
    %670 = vector.extract_strided_slice %660 {offsets = [0, 0], sizes = [8, 32], strides = [1, 1]} : vector<8x128xf32> to vector<8x32xf32>
    %671 = vector.extract_strided_slice %661 {offsets = [0, 64], sizes = [8, 32], strides = [1, 1]} : vector<8x128xf32> to vector<8x32xf32>
    %672 = arith.mulf %670, %671 : vector<8x32xf32>
    %673 = arith.addf %669, %672 : vector<8x32xf32>
    %674 = vector.extract_strided_slice %660 {offsets = [0, 96], sizes = [8, 32], strides = [1, 1]} : vector<8x128xf32> to vector<8x32xf32>
    %675 = math.tanh %673 : vector<8x32xf32>
    %676 = arith.mulf %674, %675 : vector<8x32xf32>
    %677 = vector.extract_strided_slice %666 {offsets = [0, 32], sizes = [8, 32], strides = [1, 1]} : vector<8x128xf32> to vector<8x32xf32>
    %678 = arith.mulf %677, %645 : vector<8x32xf32>
    %679 = vector.extract_strided_slice %666 {offsets = [0, 0], sizes = [8, 32], strides = [1, 1]} : vector<8x128xf32> to vector<8x32xf32>
    %680 = vector.extract_strided_slice %667 {offsets = [0, 64], sizes = [8, 32], strides = [1, 1]} : vector<8x128xf32> to vector<8x32xf32>
    %681 = arith.mulf %679, %680 : vector<8x32xf32>
    %682 = arith.addf %678, %681 : vector<8x32xf32>
    %683 = vector.extract_strided_slice %666 {offsets = [0, 96], sizes = [8, 32], strides = [1, 1]} : vector<8x128xf32> to vector<8x32xf32>
    %684 = math.tanh %682 : vector<8x32xf32>
    %685 = arith.mulf %683, %684 : vector<8x32xf32>
    %cst_286 = arith.constant 0.000000e+00 : f32
    %686 = vector.broadcast %cst_286 : f32 to vector<8x32xf32>
    %687 = arith.cmpf ogt, %647, %686 : vector<8x32xf32>
    %cst_287 = arith.constant 0.000000e+00 : f32
    %688 = vector.broadcast %cst_287 : f32 to vector<8x32xf32>
    %689 = arith.cmpf ogt, %649, %688 : vector<8x32xf32>
    %690 = arith.select %687, %676, %642 : vector<8x32xi1>, vector<8x32xf32>
    %691 = arith.select %687, %673, %643 : vector<8x32xi1>, vector<8x32xf32>
    %692 = arith.select %689, %685, %644 : vector<8x32xi1>, vector<8x32xf32>
    %693 = arith.select %689, %682, %645 : vector<8x32xi1>, vector<8x32xf32>
    %c0_288 = arith.constant 0 : index
    %c40_289 = arith.constant 40 : index
    %c0_290 = arith.constant 0 : index
    %694 = vector.load %arg2[%c0_288, %c40_289, %c0_290] : memref<1x64x32xf32, #tpu.memory_space<vmem>>, vector<1x8x32xf32>
    %695 = vector.shape_cast %694 : vector<1x8x32xf32> to vector<8x32xf32>
    %c0_291 = arith.constant 0 : index
    %c16_292 = arith.constant 16 : index
    %c0_293 = arith.constant 0 : index
    %696 = vector.load %arg2[%c0_291, %c16_292, %c0_293] : memref<1x64x32xf32, #tpu.memory_space<vmem>>, vector<1x8x32xf32>
    %697 = vector.shape_cast %696 : vector<1x8x32xf32> to vector<8x32xf32>
    %c40_294 = arith.constant 40 : index
    %c0_295 = arith.constant 0 : index
    %698 = vector.load %arg9[%c40_294, %c0_295] : memref<64x128xf32, #tpu.memory_space<vmem>>, vector<8x128xf32>
    %cst_296 = arith.constant dense<0.000000e+00> : vector<8x128xf32>
    %699 = tpu.matmul %690, %447, %cst_296 {dimension_numbers = #tpu.dot_dimension_numbers<[1], [0], [0], [1], [0, 0, 1, 1], [], []>} : vector<8x32xf32>, vector<32x128xf32>, vector<8x128xf32> -> vector<8x128xf32>
    %700 = arith.addf %698, %699 : vector<8x128xf32>
    %c16_297 = arith.constant 16 : index
    %c0_298 = arith.constant 0 : index
    %701 = vector.load %arg10[%c16_297, %c0_298] : memref<64x128xf32, #tpu.memory_space<vmem>>, vector<8x128xf32>
    %cst_299 = arith.constant dense<0.000000e+00> : vector<8x128xf32>
    %702 = tpu.matmul %692, %449, %cst_299 {dimension_numbers = #tpu.dot_dimension_numbers<[1], [0], [0], [1], [0, 0, 1, 1], [], []>} : vector<8x32xf32>, vector<32x128xf32>, vector<8x128xf32> -> vector<8x128xf32>
    %703 = arith.addf %701, %702 : vector<8x128xf32>
    %704 = arith.negf %700 : vector<8x128xf32>
    %705 = math.exp %704 : vector<8x128xf32>
    %cst_300 = arith.constant 1.000000e+00 : f32
    %706 = vector.broadcast %cst_300 : f32 to vector<8x128xf32>
    %707 = arith.addf %706, %705 : vector<8x128xf32>
    %708 = arith.divf %706, %707 : vector<8x128xf32>
    %709 = math.tanh %700 : vector<8x128xf32>
    %710 = arith.negf %703 : vector<8x128xf32>
    %711 = math.exp %710 : vector<8x128xf32>
    %cst_301 = arith.constant 1.000000e+00 : f32
    %712 = vector.broadcast %cst_301 : f32 to vector<8x128xf32>
    %713 = arith.addf %712, %711 : vector<8x128xf32>
    %714 = arith.divf %712, %713 : vector<8x128xf32>
    %715 = math.tanh %703 : vector<8x128xf32>
    %716 = vector.extract_strided_slice %708 {offsets = [0, 32], sizes = [8, 32], strides = [1, 1]} : vector<8x128xf32> to vector<8x32xf32>
    %717 = arith.mulf %716, %691 : vector<8x32xf32>
    %718 = vector.extract_strided_slice %708 {offsets = [0, 0], sizes = [8, 32], strides = [1, 1]} : vector<8x128xf32> to vector<8x32xf32>
    %719 = vector.extract_strided_slice %709 {offsets = [0, 64], sizes = [8, 32], strides = [1, 1]} : vector<8x128xf32> to vector<8x32xf32>
    %720 = arith.mulf %718, %719 : vector<8x32xf32>
    %721 = arith.addf %717, %720 : vector<8x32xf32>
    %722 = vector.extract_strided_slice %708 {offsets = [0, 96], sizes = [8, 32], strides = [1, 1]} : vector<8x128xf32> to vector<8x32xf32>
    %723 = math.tanh %721 : vector<8x32xf32>
    %724 = arith.mulf %722, %723 : vector<8x32xf32>
    %725 = vector.extract_strided_slice %714 {offsets = [0, 32], sizes = [8, 32], strides = [1, 1]} : vector<8x128xf32> to vector<8x32xf32>
    %726 = arith.mulf %725, %693 : vector<8x32xf32>
    %727 = vector.extract_strided_slice %714 {offsets = [0, 0], sizes = [8, 32], strides = [1, 1]} : vector<8x128xf32> to vector<8x32xf32>
    %728 = vector.extract_strided_slice %715 {offsets = [0, 64], sizes = [8, 32], strides = [1, 1]} : vector<8x128xf32> to vector<8x32xf32>
    %729 = arith.mulf %727, %728 : vector<8x32xf32>
    %730 = arith.addf %726, %729 : vector<8x32xf32>
    %731 = vector.extract_strided_slice %714 {offsets = [0, 96], sizes = [8, 32], strides = [1, 1]} : vector<8x128xf32> to vector<8x32xf32>
    %732 = math.tanh %730 : vector<8x32xf32>
    %733 = arith.mulf %731, %732 : vector<8x32xf32>
    %cst_302 = arith.constant 0.000000e+00 : f32
    %734 = vector.broadcast %cst_302 : f32 to vector<8x32xf32>
    %735 = arith.cmpf ogt, %695, %734 : vector<8x32xf32>
    %cst_303 = arith.constant 0.000000e+00 : f32
    %736 = vector.broadcast %cst_303 : f32 to vector<8x32xf32>
    %737 = arith.cmpf ogt, %697, %736 : vector<8x32xf32>
    %738 = arith.select %735, %724, %690 : vector<8x32xi1>, vector<8x32xf32>
    %739 = arith.select %735, %721, %691 : vector<8x32xi1>, vector<8x32xf32>
    %740 = arith.select %737, %733, %692 : vector<8x32xi1>, vector<8x32xf32>
    %741 = arith.select %737, %730, %693 : vector<8x32xi1>, vector<8x32xf32>
    %c0_304 = arith.constant 0 : index
    %c48_305 = arith.constant 48 : index
    %c0_306 = arith.constant 0 : index
    %742 = vector.load %arg2[%c0_304, %c48_305, %c0_306] : memref<1x64x32xf32, #tpu.memory_space<vmem>>, vector<1x8x32xf32>
    %743 = vector.shape_cast %742 : vector<1x8x32xf32> to vector<8x32xf32>
    %c0_307 = arith.constant 0 : index
    %c8_308 = arith.constant 8 : index
    %c0_309 = arith.constant 0 : index
    %744 = vector.load %arg2[%c0_307, %c8_308, %c0_309] : memref<1x64x32xf32, #tpu.memory_space<vmem>>, vector<1x8x32xf32>
    %745 = vector.shape_cast %744 : vector<1x8x32xf32> to vector<8x32xf32>
    %c48_310 = arith.constant 48 : index
    %c0_311 = arith.constant 0 : index
    %746 = vector.load %arg9[%c48_310, %c0_311] : memref<64x128xf32, #tpu.memory_space<vmem>>, vector<8x128xf32>
    %cst_312 = arith.constant dense<0.000000e+00> : vector<8x128xf32>
    %747 = tpu.matmul %738, %447, %cst_312 {dimension_numbers = #tpu.dot_dimension_numbers<[1], [0], [0], [1], [0, 0, 1, 1], [], []>} : vector<8x32xf32>, vector<32x128xf32>, vector<8x128xf32> -> vector<8x128xf32>
    %748 = arith.addf %746, %747 : vector<8x128xf32>
    %c8_313 = arith.constant 8 : index
    %c0_314 = arith.constant 0 : index
    %749 = vector.load %arg10[%c8_313, %c0_314] : memref<64x128xf32, #tpu.memory_space<vmem>>, vector<8x128xf32>
    %cst_315 = arith.constant dense<0.000000e+00> : vector<8x128xf32>
    %750 = tpu.matmul %740, %449, %cst_315 {dimension_numbers = #tpu.dot_dimension_numbers<[1], [0], [0], [1], [0, 0, 1, 1], [], []>} : vector<8x32xf32>, vector<32x128xf32>, vector<8x128xf32> -> vector<8x128xf32>
    %751 = arith.addf %749, %750 : vector<8x128xf32>
    %752 = arith.negf %748 : vector<8x128xf32>
    %753 = math.exp %752 : vector<8x128xf32>
    %cst_316 = arith.constant 1.000000e+00 : f32
    %754 = vector.broadcast %cst_316 : f32 to vector<8x128xf32>
    %755 = arith.addf %754, %753 : vector<8x128xf32>
    %756 = arith.divf %754, %755 : vector<8x128xf32>
    %757 = math.tanh %748 : vector<8x128xf32>
    %758 = arith.negf %751 : vector<8x128xf32>
    %759 = math.exp %758 : vector<8x128xf32>
    %cst_317 = arith.constant 1.000000e+00 : f32
    %760 = vector.broadcast %cst_317 : f32 to vector<8x128xf32>
    %761 = arith.addf %760, %759 : vector<8x128xf32>
    %762 = arith.divf %760, %761 : vector<8x128xf32>
    %763 = math.tanh %751 : vector<8x128xf32>
    %764 = vector.extract_strided_slice %756 {offsets = [0, 32], sizes = [8, 32], strides = [1, 1]} : vector<8x128xf32> to vector<8x32xf32>
    %765 = arith.mulf %764, %739 : vector<8x32xf32>
    %766 = vector.extract_strided_slice %756 {offsets = [0, 0], sizes = [8, 32], strides = [1, 1]} : vector<8x128xf32> to vector<8x32xf32>
    %767 = vector.extract_strided_slice %757 {offsets = [0, 64], sizes = [8, 32], strides = [1, 1]} : vector<8x128xf32> to vector<8x32xf32>
    %768 = arith.mulf %766, %767 : vector<8x32xf32>
    %769 = arith.addf %765, %768 : vector<8x32xf32>
    %770 = vector.extract_strided_slice %756 {offsets = [0, 96], sizes = [8, 32], strides = [1, 1]} : vector<8x128xf32> to vector<8x32xf32>
    %771 = math.tanh %769 : vector<8x32xf32>
    %772 = arith.mulf %770, %771 : vector<8x32xf32>
    %773 = vector.extract_strided_slice %762 {offsets = [0, 32], sizes = [8, 32], strides = [1, 1]} : vector<8x128xf32> to vector<8x32xf32>
    %774 = arith.mulf %773, %741 : vector<8x32xf32>
    %775 = vector.extract_strided_slice %762 {offsets = [0, 0], sizes = [8, 32], strides = [1, 1]} : vector<8x128xf32> to vector<8x32xf32>
    %776 = vector.extract_strided_slice %763 {offsets = [0, 64], sizes = [8, 32], strides = [1, 1]} : vector<8x128xf32> to vector<8x32xf32>
    %777 = arith.mulf %775, %776 : vector<8x32xf32>
    %778 = arith.addf %774, %777 : vector<8x32xf32>
    %779 = vector.extract_strided_slice %762 {offsets = [0, 96], sizes = [8, 32], strides = [1, 1]} : vector<8x128xf32> to vector<8x32xf32>
    %780 = math.tanh %778 : vector<8x32xf32>
    %781 = arith.mulf %779, %780 : vector<8x32xf32>
    %cst_318 = arith.constant 0.000000e+00 : f32
    %782 = vector.broadcast %cst_318 : f32 to vector<8x32xf32>
    %783 = arith.cmpf ogt, %743, %782 : vector<8x32xf32>
    %cst_319 = arith.constant 0.000000e+00 : f32
    %784 = vector.broadcast %cst_319 : f32 to vector<8x32xf32>
    %785 = arith.cmpf ogt, %745, %784 : vector<8x32xf32>
    %786 = arith.select %783, %772, %738 : vector<8x32xi1>, vector<8x32xf32>
    %787 = arith.select %783, %769, %739 : vector<8x32xi1>, vector<8x32xf32>
    %788 = arith.select %785, %781, %740 : vector<8x32xi1>, vector<8x32xf32>
    %789 = arith.select %785, %778, %741 : vector<8x32xi1>, vector<8x32xf32>
    %c0_320 = arith.constant 0 : index
    %c56_321 = arith.constant 56 : index
    %c0_322 = arith.constant 0 : index
    %790 = vector.load %arg2[%c0_320, %c56_321, %c0_322] : memref<1x64x32xf32, #tpu.memory_space<vmem>>, vector<1x8x32xf32>
    %791 = vector.shape_cast %790 : vector<1x8x32xf32> to vector<8x32xf32>
    %c0_323 = arith.constant 0 : index
    %c0_324 = arith.constant 0 : index
    %c0_325 = arith.constant 0 : index
    %792 = vector.load %arg2[%c0_323, %c0_324, %c0_325] : memref<1x64x32xf32, #tpu.memory_space<vmem>>, vector<1x8x32xf32>
    %793 = vector.shape_cast %792 : vector<1x8x32xf32> to vector<8x32xf32>
    %c56_326 = arith.constant 56 : index
    %c0_327 = arith.constant 0 : index
    %794 = vector.load %arg9[%c56_326, %c0_327] : memref<64x128xf32, #tpu.memory_space<vmem>>, vector<8x128xf32>
    %cst_328 = arith.constant dense<0.000000e+00> : vector<8x128xf32>
    %795 = tpu.matmul %786, %447, %cst_328 {dimension_numbers = #tpu.dot_dimension_numbers<[1], [0], [0], [1], [0, 0, 1, 1], [], []>} : vector<8x32xf32>, vector<32x128xf32>, vector<8x128xf32> -> vector<8x128xf32>
    %796 = arith.addf %794, %795 : vector<8x128xf32>
    %c0_329 = arith.constant 0 : index
    %c0_330 = arith.constant 0 : index
    %797 = vector.load %arg10[%c0_329, %c0_330] : memref<64x128xf32, #tpu.memory_space<vmem>>, vector<8x128xf32>
    %cst_331 = arith.constant dense<0.000000e+00> : vector<8x128xf32>
    %798 = tpu.matmul %788, %449, %cst_331 {dimension_numbers = #tpu.dot_dimension_numbers<[1], [0], [0], [1], [0, 0, 1, 1], [], []>} : vector<8x32xf32>, vector<32x128xf32>, vector<8x128xf32> -> vector<8x128xf32>
    %799 = arith.addf %797, %798 : vector<8x128xf32>
    %800 = arith.negf %796 : vector<8x128xf32>
    %801 = math.exp %800 : vector<8x128xf32>
    %cst_332 = arith.constant 1.000000e+00 : f32
    %802 = vector.broadcast %cst_332 : f32 to vector<8x128xf32>
    %803 = arith.addf %802, %801 : vector<8x128xf32>
    %804 = arith.divf %802, %803 : vector<8x128xf32>
    %805 = math.tanh %796 : vector<8x128xf32>
    %806 = arith.negf %799 : vector<8x128xf32>
    %807 = math.exp %806 : vector<8x128xf32>
    %cst_333 = arith.constant 1.000000e+00 : f32
    %808 = vector.broadcast %cst_333 : f32 to vector<8x128xf32>
    %809 = arith.addf %808, %807 : vector<8x128xf32>
    %810 = arith.divf %808, %809 : vector<8x128xf32>
    %811 = math.tanh %799 : vector<8x128xf32>
    %812 = vector.extract_strided_slice %804 {offsets = [0, 32], sizes = [8, 32], strides = [1, 1]} : vector<8x128xf32> to vector<8x32xf32>
    %813 = arith.mulf %812, %787 : vector<8x32xf32>
    %814 = vector.extract_strided_slice %804 {offsets = [0, 0], sizes = [8, 32], strides = [1, 1]} : vector<8x128xf32> to vector<8x32xf32>
    %815 = vector.extract_strided_slice %805 {offsets = [0, 64], sizes = [8, 32], strides = [1, 1]} : vector<8x128xf32> to vector<8x32xf32>
    %816 = arith.mulf %814, %815 : vector<8x32xf32>
    %817 = arith.addf %813, %816 : vector<8x32xf32>
    %818 = vector.extract_strided_slice %810 {offsets = [0, 32], sizes = [8, 32], strides = [1, 1]} : vector<8x128xf32> to vector<8x32xf32>
    %819 = arith.mulf %818, %789 : vector<8x32xf32>
    %820 = vector.extract_strided_slice %810 {offsets = [0, 0], sizes = [8, 32], strides = [1, 1]} : vector<8x128xf32> to vector<8x32xf32>
    %821 = vector.extract_strided_slice %811 {offsets = [0, 64], sizes = [8, 32], strides = [1, 1]} : vector<8x128xf32> to vector<8x32xf32>
    %822 = arith.mulf %820, %821 : vector<8x32xf32>
    %823 = arith.addf %819, %822 : vector<8x32xf32>
    %cst_334 = arith.constant 0.000000e+00 : f32
    %824 = vector.broadcast %cst_334 : f32 to vector<8x32xf32>
    %825 = arith.cmpf ogt, %791, %824 : vector<8x32xf32>
    %cst_335 = arith.constant 0.000000e+00 : f32
    %826 = vector.broadcast %cst_335 : f32 to vector<8x32xf32>
    %827 = arith.cmpf ogt, %793, %826 : vector<8x32xf32>
    %828 = arith.select %825, %817, %787 : vector<8x32xi1>, vector<8x32xf32>
    %829 = arith.select %827, %823, %789 : vector<8x32xi1>, vector<8x32xf32>
    %c0_336 = arith.constant 0 : index
    %c0_337 = arith.constant 0 : index
    %830 = vector.load %arg6[%c0_336, %c0_337] : memref<8x64xf32, #tpu.memory_space<vmem>>, vector<8x32xf32>
    tpu.vector_store %arg6[%c0_336, %c0_337], %828 {strides = array<i32>} : memref<8x64xf32, #tpu.memory_space<vmem>>, vector<8x32xf32>,
    %c0_338 = arith.constant 0 : index
    %c32_339 = arith.constant 32 : index
    %831 = vector.load %arg6[%c0_338, %c32_339] : memref<8x64xf32, #tpu.memory_space<vmem>>, vector<8x32xf32>
    tpu.vector_store %arg6[%c0_338, %c32_339], %829 {strides = array<i32>} : memref<8x64xf32, #tpu.memory_space<vmem>>, vector<8x32xf32>,
    return
  }
  func.func @transform_0(%arg0: i32) -> (i32, i32, i32) {
    %c0_i32 = arith.constant 0 : i32
    %c0_i32_0 = arith.constant 0 : i32
    %c0_i32_1 = arith.constant 0 : i32
    return %arg0, %c0_i32, %c0_i32_0 : i32, i32, i32
  }
  func.func @transform_1(%arg0: i32) -> (i32, i32, i32) {
    %c0_i32 = arith.constant 0 : i32
    %c0_i32_0 = arith.constant 0 : i32
    %c0_i32_1 = arith.constant 0 : i32
    return %arg0, %c0_i32, %c0_i32_0 : i32, i32, i32
  }
  func.func @transform_2(%arg0: i32) -> (i32, i32, i32, i32) {
    %c0_i32 = arith.constant 0 : i32
    %c0_i32_0 = arith.constant 0 : i32
    %c0_i32_1 = arith.constant 0 : i32
    %c0_i32_2 = arith.constant 0 : i32
    %c0_i32_3 = arith.constant 0 : i32
    return %c0_i32, %c0_i32_0, %c0_i32_1, %c0_i32_2 : i32, i32, i32, i32
  }
  func.func @transform_3(%arg0: i32) -> (i32, i32, i32, i32) {
    %c0_i32 = arith.constant 0 : i32
    %c0_i32_0 = arith.constant 0 : i32
    %c0_i32_1 = arith.constant 0 : i32
    %c0_i32_2 = arith.constant 0 : i32
    %c0_i32_3 = arith.constant 0 : i32
    return %c0_i32, %c0_i32_0, %c0_i32_1, %c0_i32_2 : i32, i32, i32, i32
  }
  func.func @transform_4(%arg0: i32) -> (i32, i32, i32) {
    %c0_i32 = arith.constant 0 : i32
    %c0_i32_0 = arith.constant 0 : i32
    %c0_i32_1 = arith.constant 0 : i32
    %c0_i32_2 = arith.constant 0 : i32
    return %c0_i32, %c0_i32_0, %c0_i32_1 : i32, i32, i32
  }
  func.func @transform_5(%arg0: i32) -> (i32, i32) {
    %c0_i32 = arith.constant 0 : i32
    %c0_i32_0 = arith.constant 0 : i32
    return %arg0, %c0_i32 : i32, i32
  }
}

</mosaic_0001>

<bundles_post_ra>
// kernel: pass_ex_bert_encoder_forward.1
= control target key start
LH: loop header
LB: loop body
LE: loop exit
PB: predicated region body
PF: predicated region fallthrough
CT: control target
= control target key end

     0   :  { %vm42_vm0 = vcmask 261120   ;;  %v3332_v13 = vmov 0.0   ;;  %s3334_s18 = smov 32   ;;  %s3335_s19 = smov 96   ;;  %s4558_s2 = inlined_call_operand.vmem [shape: f32[2,2,32,256], index: 2, kind: input, shape index: {}]   ;;  %s4559_s3 = inlined_call_operand.vmem [shape: f32[2,2,32,128], index: 3, kind: input, shape index: {}]   ;;  %s4560_s0 = inlined_call_operand.vmem [shape: f32[1,64,32], index: 0, kind: input, shape index: {}]   ;;  %s4561_s4 = inlined_call_operand.vmem [shape: f32[2,1,256], index: 4, kind: input, shape index: {}]   ;;  %s4562_s1 = inlined_call_operand.vmem [shape: f32[1,64,32], index: 1, kind: input, shape index: {}]   ;;  %s4563_s5 = inlined_call_operand.vmem [shape: f32[8,64], index: 5, kind: output, shape index: {}]  }
   0x1   :  { %v27_v0 = vld [vmem:[%s4558_s2 + $0x38] sm:$0xff]  ;;  %v25_v2 = vld [vmem:[%s4558_s2 + $0x28] sm:$0xff]  ;;  %v3381_v3 = vld [vmem:[%s4559_s3 + $0x10] sm:$0xff] }
   0x2   :  { %v3372_v1 = vld [vmem:[%s4559_s3 + $0x18] sm:$0xff]  ;;  %120 = vmatpush.msra.mxu1 %v27_v0  ;;  %v26_v4 = vld [vmem:[%s4558_s2 + $0x30] sm:$0xff]  ;;  %v3392_v6 = vld [vmem:[%s4559_s3 + $0x8] sm:$0xff] }
   0x3   :  { %192 = vmatpush.msra.mxu2 %v3372_v1  ;;  %79 = vmatpush.msra.mxu0 %v26_v4  ;;  %v23_v5 = vld [vmem:[%s4558_s2 + $0x18] sm:$0xff]  ;;  %v24_v7 = vld [vmem:[%s4558_s2 + $0x20] sm:$0xff]  ;;  %v22_v8 = vld [vmem:[%s4558_s2 + $0x10] sm:$0xff] }
   0x4   :  { %121 = vmatpush.msra.mxu1 %v25_v2  ;;  %v21_v9 = vld [vmem:[%s4558_s2 + $0x8] sm:$0xff]  ;;  %v3407_v10 = vld [vmem:[%s4559_s3] sm:$0xff]  ;;  %v3431_v15 = vld [vmem:[%s4559_s3 + $0x38] sm:$0xff] }
   0x5   :  { %193 = vmatpush.msra.mxu2 %v3381_v3  ;;  %80 = vmatpush.msra.mxu0 %v24_v7  ;;  %v29_v11 = vld [vmem:[%s4560_s0] sm:$0xff]  ;;  %v30_v14 = vld [vmem:[%s4560_s0 + $0x8] sm:$0xff]  ;;  %v3436_v16 = vld [vmem:[%s4559_s3 + $0x30] sm:$0xff] }
   0x6   :  { %122 = vmatpush.msra.mxu1 %v23_v5  ;;  %v20_v12 = vld [vmem:[%s4558_s2] sm:$0xff]  ;;  %214 = vmatpush.msra.mxu3 %v3431_v15  ;;  %v31_v17 = vld [vmem:[%s4560_s0 + $0x10] sm:$0xff]  ;;  %v3452_v18 = vld [vmem:[%s4559_s3 + $0x28] sm:$0xff] }
   0x7   :  { %194 = vmatpush.msra.mxu2 %v3392_v6  ;;  %81 = vmatpush.msra.mxu0 %v22_v8  ;;  %v3457_v19 = vld [vmem:[%s4559_s3 + $0x20] sm:$0xff]  ;;  %v32_v20 = vld [vmem:[%s4560_s0 + $0x18] sm:$0xff]  ;;  %v34_v22 = vld [vmem:[%s4560_s0 + $0x28] sm:$0xff] }
   0x8   :  { %123 = vmatpush.msra.mxu1 %v21_v9  ;;  %215 = vmatpush.msra.mxu3 %v3436_v16  ;;  %v33_v21 = vld [vmem:[%s4560_s0 + $0x20] sm:$0xff]  ;;  %v35_v23 = vld [vmem:[%s4560_s0 + $0x30] sm:$0xff]  ;;  %v36_v24 = vld [vmem:[%s4560_s0 + $0x38] sm:$0xff]  ;;  %s3333_s0 = smov 64  }
   0x9   :  { %195 = vmatpush.msra.mxu2 %v3407_v10  ;;  %2939 = vmatmul.msk.f32.vlgmr.msra.gmra.mxu1 %vm42_vm0, %v29_v11  ;;  %v28_v25 = vld [vmem:[%s4561_s4] sm:$0x3] }
   0xa   :  { %196 = vmatmul.f32.vlgmr.msra.gmra.mxu2 %v3332_v13  ;;  %82 = vmatpush.msra.mxu0 %v20_v12  ;;  %v39_v26 = vperm.slane %v28_v25, 1  ;;  %v3499_v27 = vperm.slane %v28_v25, 0 }
   0xb   :  { %341 = vmatpush.msrb.mxu2 %v3372_v1  ;;  %2931 = vmatmul.msk.f32.vlgmr.msra.gmra.mxu0 %vm42_vm0, %v29_v11 }
   0xc   :  { %216 = vmatpush.msra.mxu3 %v3452_v18 }
   0xd   :  { %342 = vmatpush.msrb.mxu2 %v3381_v3 }
   0xe   :  { %217 = vmatpush.msra.mxu3 %v3457_v19 }
   0xf   :  { %343 = vmatpush.msrb.mxu2 %v3392_v6  ;;  %218 = vmatmul.f32.vlgmr.msra.gmra.mxu3 %v3332_v13 }
  0x10   :  { %366 = vmatpush.msrb.mxu3 %v3431_v15 }
  0x11   :  { %344 = vmatpush.msrb.mxu2 %v3407_v10  ;;  %2940 = vmatmul.msk.f32.gmra.mxu1 %vm42_vm0, %v30_v14 }
  0x12   :  { %367 = vmatpush.msrb.mxu3 %v3436_v16 }
  0x13   :  { %501 = vmatpush.msra.mxu2 %v3372_v1  ;;  %2932 = vmatmul.msk.f32.gmra.mxu0 %vm42_vm0, %v30_v14 }
  0x14   :  { %368 = vmatpush.msrb.mxu3 %v3452_v18 }
  0x15   :  { %502 = vmatpush.msra.mxu2 %v3381_v3 }
  0x16   :  { %369 = vmatpush.msrb.mxu3 %v3457_v19 }
  0x17   :  { %503 = vmatpush.msra.mxu2 %v3392_v6 }
  0x18   :  { %526 = vmatpush.msra.mxu3 %v3431_v15 }
  0x19   :  { %504 = vmatpush.msra.mxu2 %v3407_v10  ;;  %2941 = vmatmul.msk.f32.gmra.mxu1 %vm42_vm0, %v31_v17 }
  0x1a   :  { %527 = vmatpush.msra.mxu3 %v3436_v16 }
  0x1b   :  { %2933 = vmatmul.msk.f32.gmra.mxu0 %vm42_vm0, %v31_v17 }
  0x1c   :  { %528 = vmatpush.msra.mxu3 %v3452_v18 }
  0x1e   :  { %529 = vmatpush.msra.mxu3 %v3457_v19 }
  0x21   :  { %2942 = vmatmul.msk.f32.gmra.mxu1 %vm42_vm0, %v32_v20 }
  0x23   :  { %2934 = vmatmul.msk.f32.gmra.mxu0 %vm42_vm0, %v32_v20 }
  0x29   :  { %2943 = vmatmul.msk.f32.gmra.mxu1 %vm42_vm0, %v33_v21 }
  0x2b   :  { %2935 = vmatmul.msk.f32.gmra.mxu0 %vm42_vm0, %v33_v21 }
  0x31   :  { %2944 = vmatmul.msk.f32.gmra.mxu1 %vm42_vm0, %v34_v22 }
  0x33   :  { %2936 = vmatmul.msk.f32.gmra.mxu0 %vm42_vm0, %v34_v22 }
  0x39   :  { %2945 = vmatmul.msk.f32.gmra.mxu1 %vm42_vm0, %v35_v23 }
  0x3b   :  { %2937 = vmatmul.msk.f32.gmra.mxu0 %vm42_vm0, %v35_v23 }
  0x41   :  { %2946 = vmatmul.msk.f32.gmra.mxu1 %vm42_vm0, %v36_v24 }
  0x43   :  { %2938 = vmatmul.msk.f32.gmra.mxu0 %vm42_vm0, %v36_v24 }
  0x86   :  { %v125_v28 = vpop.f32.mrf.mxu1 }
  0x87   :  { %v3501_v29 = vadd.f32 %v125_v28, %v39_v26 }
  0x88   :  { %v84_v30 = vpop.f32.mrf.mxu0 }
  0x89   :  { %v85_v31 = vadd.f32 %v84_v30, %v3499_v27 }
  0x8d   :  { %v197_v32 = vpop.f32.mrf.mxu2 }
  0x8e   :  { %v200_v33 = vadd.f32 %v197_v32, %v85_v31  ;;  %v128_v34 = vpop.f32.mrf.mxu1 }
  0x8f   :  { %v3504_v35 = vadd.f32 %v128_v34, %v39_v26 }
  0x90   :  { %3072 = vtanh.f32 %v200_v33  ;;  %v2951_v52 = vmul.f32 -1.442695, %v200_v33 }
  0x92   :  { %v219_v48 = vpop.f32.mrf.mxu3 }
  0x96   :  { %v3073_v36 = vpop.eup %3072  ;;  %v131_v37 = vpop.f32.mrf.mxu1 }
  0x97   :  { %265 = vrot.lane.b32.xlu1 %v3073_v36, %s3333_s0  ;;  %v3507_v38 = vadd.f32 %v131_v37, %v39_v26 }
  0x9e   :  { %v134_v39 = vpop.f32.mrf.mxu1 }
  0x9f   :  { %v3509_v40 = vadd.f32 %v134_v39, %v39_v26 }
  0xa6   :  { %v137_v41 = vpop.f32.mrf.mxu1 }
  0xa7   :  { %v3511_v42 = vadd.f32 %v137_v41, %v39_v26 }
  0xae   :  { %v140_v43 = vpop.f32.mrf.mxu1 }
  0xaf   :  { %v3513_v44 = vadd.f32 %v140_v43, %v39_v26 }
  0xb6   :  { %v143_v45 = vpop.f32.mrf.mxu1 }
  0xb7   :  { %v3515_v46 = vadd.f32 %v143_v45, %v39_v26 }
  0xbe   :  { %v146_v47 = vpop.f32.mrf.mxu1 }
  0xbf   :  { %v147_v49 = vadd.f32 %v146_v47, %v39_v26  ;;  %v3528_v47 = vld [vmem:[%s4562_s1] sm:$0xff] }
  0xc0   :  { %vm297_vm9 = vcmp.gt.f32.partialorder %v3528_v47, 0.0 }
  0xc1   :  { %v222_v50 = vadd.f32 %v219_v48, %v147_v49 }
  0xc3   :  { %3074 = vtanh.f32 %v222_v50  ;;  %v2952_v5 = vmul.f32 -1.442695, %v222_v50 }
  0xc4   :  { %3076 = vpow2.f32 %v2951_v52 }
  0xc9   :  { %v3075_v51 = vpop.eup %3074 }
  0xca   :  { %282 = vrot.lane.b32.xlu0 %v3075_v51, %s3333_s0  ;;  %v3077_v53 = vpop.eup %3076  ;;  %v175_v51 = vld [vmem:[%s4562_s1 + $0x38] sm:$0xff] }
  0xcb   :  { %v226_v54 = vadd.f32 1.0, %v3077_v53  ;;  %vm298_vm10 = vcmp.gt.f32.partialorder %v175_v51, 0.0 }
  0xcd   :  { %3078 = vrcp.f32 %v226_v54  ;;  %vm232_vm1 = vweird.f32 %v226_v54  ;;  %v238_v59 = vand.u32 2147483648, %v226_v54  ;;  %v236_v61 = vand.u32 2147483647, %v226_v54 }
  0xce   :  { %3080 = vpow2.f32 %v2952_v5 }
  0xcf   :  { %v239_v62 = vor.u32 1.1754944e-38, %v238_v59  ;;  %vm237_vm4 = vcmp.eq.f32.partialorder %v236_v61, 8.507059e+37 }
  0xd3   :  { %v3079_v55 = vpop.eup %3078 }
  0xd4   :  { %v228_v56 = vmul.f32 %v3079_v55, %v226_v54  ;;  %vm233_vm2 = vweird.f32 %v3079_v55  ;;  %v3081_v7 = vpop.eup %3080 }
  0xd5   :  { %vm234_vm3 = vmor %vm232_vm1, %vm233_vm2  ;;  %v246_v8 = vadd.f32 1.0, %v3081_v7 }
  0xd6   :  { %v229_v57 = vsub.f32 1.0, %v228_v56 }
  0xd7   :  { %3082 = vrcp.f32 %v246_v8  ;;  %v258_v20 = vand.u32 2147483648, %v246_v8  ;;  %vm252_vm6 = vweird.f32 %v246_v8  ;;  %v256_v21 = vand.u32 2147483647, %v246_v8 }
  0xd8   :  { %v230_v58 = vmul.f32 %v3079_v55, %v229_v57  ;;  %v87_v57 = vpop.f32.mrf.mxu0 }
  0xd9   :  { %v259_v23 = vor.u32 1.1754944e-38, %v258_v20  ;;  %vm257_vm8 = vcmp.eq.f32.partialorder %v256_v21, 8.507059e+37 }
  0xda   :  { %v231_v60 = vadd.f32 %v3079_v55, %v230_v58  ;;  %v88_v58 = vadd.f32 %v87_v57, %v3499_v27 }
  0xdc   :  { %v235_v63 = vsel %vm234_vm3, %v3079_v55, %v231_v60 }
  0xdd   :  { %v240_v2 = vsel %vm237_vm4, %v239_v62, %v235_v63  ;;  %v3083_v9 = vpop.eup %3082 }
  0xde   :  { %v248_v11 = vmul.f32 %v3083_v9, %v246_v8  ;;  %vm253_vm5 = vweird.f32 %v3083_v9  ;;  %v263_v28 = vmul.f32 0.0, %v240_v2 }
  0xdf   :  { %vm254_vm7 = vmor %vm252_vm6, %vm253_vm5 }
  0xe0   :  { %v249_v12 = vsub.f32 1.0, %v248_v11 }
  0xe2   :  { %v250_v14 = vmul.f32 %v3083_v9, %v249_v12 }
  0xe4   :  { %v251_v17 = vadd.f32 %v3083_v9, %v250_v14 }
  0xe6   :  { %v255_v22 = vsel %vm254_vm7, %v3083_v9, %v251_v17 }
  0xe7   :  { %v260_v25 = vsel %vm257_vm8, %v259_v23, %v255_v22 }
  0xe8   :  { %v280_v33 = vmul.f32 0.0, %v260_v25 }
 0x109   :  { %v266_v0 = vpop.permute.xlu1 %265 }
 0x10a   :  { %v268_v4 = vmul.f32 %v266_v0, %v240_v2 }
 0x10c   :  { %270 = vrot.lane.b32.xlu2 %v268_v4, %s3334_s18 }
 0x13c   :  { %v283_v24 = vpop.permute.xlu0 %282 }
 0x13d   :  { %v285_v26 = vmul.f32 %v283_v24, %v260_v25 }
 0x13f   :  { %287 = vrot.lane.b32.xlu0 %v285_v26, %s3334_s18 }
 0x166   :  { %v271_v30 = vpop.permute.xlu2 %270 }
 0x167   :  { %v273_v31 = vadd.f32 %v271_v30, %v263_v28 }
 0x169   :  { %3084 = vtanh.f32 %v273_v31 }
 0x16f   :  { %v3085_v32 = vpop.eup %3084 }
 0x170   :  { %276 = vrot.lane.b32.xlu0 %v3085_v32, %s3333_s0 }
 0x1b1   :  { %v288_v34 = vpop.permute.xlu0 %287 }
 0x1b2   :  { %v290_v36 = vadd.f32 %v288_v34, %v280_v33 }
 0x1b4   :  { %3086 = vtanh.f32 %v290_v36 }
 0x1ba   :  { %v3087_v37 = vpop.eup %3086 }
 0x1bb   :  { %293 = vrot.lane.b32.xlu1 %v3087_v37, %s3333_s0 }
 0x1e2   :  { %v277_v39 = vpop.permute.xlu0 %276 }
 0x1e3   :  { %v279_v41 = vmul.f32 %v277_v39, %v240_v2 }
 0x1e5   :  { %300 = vrot.lane.b32.xlu1 %v279_v41, %s3334_s18 }
 0x22d   :  { %v294_v43 = vpop.permute.xlu1 %293 }
 0x22e   :  { %v296_v45 = vmul.f32 %v294_v43, %v260_v25 }
 0x230   :  { %310 = vrot.lane.b32.xlu2 %v296_v45, %s3334_s18 }
 0x238   :  { %315 = vrot.lane.b32.xlu2 %v290_v36, %s3335_s19 }
 0x257   :  { %v301_v48 = vpop.permute.xlu1 %300 }
 0x258   :  { %v319_v49 = vmul.f32 %v301_v48, %v3528_v47  ;;  %v3534_v50 = vsel %vm297_vm9, %v301_v48, 0.0 }
 0x259   :  { %2953 = vmatmul.msk.f32.vlgmr.msrb.gmra.mxu2 %vm42_vm0, %v3534_v50 }
 0x25a   :  { %320 = vst.msk [vmem:[#allocation2] sm:$0xff] %vm42_vm0, %v319_v49  ;;  %661 = vmatpush.msrb.mxu2 %v3372_v1 }
 0x25c   :  { %662 = vmatpush.msrb.mxu2 %v3381_v3 }
 0x25e   :  { %663 = vmatpush.msrb.mxu2 %v3392_v6 }
 0x260   :  { %664 = vmatpush.msrb.mxu2 %v3407_v10 }
 0x28a   :  { %v311_v52 = vpop.permute.xlu2 %310 }
 0x28b   :  { %v321_v53 = vmul.f32 %v311_v52, %v175_v51  ;;  %v3546_v54 = vsel %vm298_vm10, %v311_v52, 0.0 }
 0x28c   :  { %2954 = vmatmul.msk.f32.vlgmr.msrb.gmra.mxu3 %vm42_vm0, %v3546_v54 }
 0x28d   :  { %322 = vst.msk [vmem:[#allocation3 + $0x38] sm:$0xff] %vm42_vm0, %v321_v53  ;;  %686 = vmatpush.msrb.mxu3 %v3431_v15 }
 0x28f   :  { %687 = vmatpush.msrb.mxu3 %v3436_v16 }
 0x291   :  { %688 = vmatpush.msrb.mxu3 %v3452_v18 }
 0x292   :  { %v316_v55 = vpop.permute.xlu2 %315 }
 0x293   :  { %v3554_v56 = vsel %vm298_vm10, %v316_v55, 0.0  ;;  %689 = vmatpush.msrb.mxu3 %v3457_v19 }
 0x294   :  { %437 = vrot.lane.b32.xlu1 %v3554_v56, %s3334_s18 }
 0x2dc   :  { %v346_v59 = vpop.f32.mrf.mxu2 }
 0x2dd   :  { %v349_v60 = vadd.f32 %v346_v59, %v88_v58 }
 0x2df   :  { %3088 = vtanh.f32 %v349_v60  ;;  %v2955_v2 = vmul.f32 -1.442695, %v349_v60 }
 0x2e5   :  { %v3089_v61 = vpop.eup %3088 }
 0x2e6   :  { %421 = vrot.lane.b32.xlu1 %v3089_v61, %s3333_s0 }
 0x306   :  { %v438_v12 = vpop.permute.xlu1 %437 }
 0x30f   :  { %v371_v62 = vpop.f32.mrf.mxu3 }
 0x310   :  { %v374_v63 = vadd.f32 %v371_v62, %v3515_v46 }
 0x312   :  { %3090 = vtanh.f32 %v374_v63  ;;  %v2956_v25 = vmul.f32 -1.442695, %v374_v63 }
 0x313   :  { %3092 = vpow2.f32 %v2955_v2 }
 0x318   :  { %v3091_v0 = vpop.eup %3090 }
 0x319   :  { %442 = vrot.lane.b32.xlu0 %v3091_v0, %s3333_s0  ;;  %v3093_v4 = vpop.eup %3092 }
 0x31a   :  { %v378_v5 = vadd.f32 1.0, %v3093_v4  ;;  %v324_v4 = vld [vmem:[%s4562_s1 + $0x30] sm:$0xff] }
 0x31b   :  { %vm458_vm4 = vcmp.gt.f32.partialorder %v324_v4, 0.0 }
 0x31c   :  { %3094 = vrcp.f32 %v378_v5  ;;  %v390_v17 = vand.u32 2147483648, %v378_v5  ;;  %vm384_vm12 = vweird.f32 %v378_v5  ;;  %v388_v46 = vand.u32 2147483647, %v378_v5 }
 0x31d   :  { %3096 = vpow2.f32 %v2956_v25 }
 0x31e   :  { %v391_v21 = vor.u32 1.1754944e-38, %v390_v17  ;;  %vm389_vm14 = vcmp.eq.f32.partialorder %v388_v46, 8.507059e+37 }
 0x321   :  { %305 = vrot.lane.b32.xlu0 %v273_v31, %s3335_s19 }
 0x322   :  { %v3095_v7 = vpop.eup %3094 }
 0x323   :  { %v380_v8 = vmul.f32 %v3095_v7, %v378_v5  ;;  %vm385_vm11 = vweird.f32 %v3095_v7  ;;  %v3097_v26 = vpop.eup %3096 }
 0x324   :  { %vm386_vm13 = vmor %vm384_vm12, %vm385_vm11  ;;  %v398_v28 = vadd.f32 1.0, %v3097_v26 }
 0x325   :  { %v381_v9 = vsub.f32 1.0, %v380_v8 }
 0x326   :  { %3098 = vrcp.f32 %v398_v28  ;;  %v410_v36 = vand.u32 2147483648, %v398_v28  ;;  %vm404_vm1 = vweird.f32 %v398_v28  ;;  %v408_v37 = vand.u32 2147483647, %v398_v28 }
 0x327   :  { %v382_v11 = vmul.f32 %v3095_v7, %v381_v9 }
 0x328   :  { %v411_v41 = vor.u32 1.1754944e-38, %v410_v36  ;;  %vm409_vm3 = vcmp.eq.f32.partialorder %v408_v37, 8.507059e+37 }
 0x329   :  { %v383_v14 = vadd.f32 %v3095_v7, %v382_v11 }
 0x32b   :  { %v387_v20 = vsel %vm386_vm13, %v3095_v7, %v383_v14 }
 0x32c   :  { %v392_v22 = vsel %vm389_vm14, %v391_v21, %v387_v20  ;;  %v3099_v30 = vpop.eup %3098  ;;  %v90_v20 = vpop.f32.mrf.mxu0 }
 0x32d   :  { %v400_v31 = vmul.f32 %v3099_v30, %v398_v28  ;;  %vm405_vm15 = vweird.f32 %v3099_v30  ;;  %v91_v21 = vadd.f32 %v90_v20, %v3499_v27 }
 0x32e   :  { %vm406_vm2 = vmor %vm404_vm1, %vm405_vm15 }
 0x32f   :  { %v401_v32 = vsub.f32 1.0, %v400_v31 }
 0x331   :  { %v402_v33 = vmul.f32 %v3099_v30, %v401_v32 }
 0x333   :  { %v403_v34 = vadd.f32 %v3099_v30, %v402_v33 }
 0x335   :  { %v407_v39 = vsel %vm406_vm2, %v3099_v30, %v403_v34 }
 0x336   :  { %v412_v43 = vsel %vm409_vm3, %v411_v41, %v407_v39 }
 0x337   :  { %v440_v52 = vmul.f32 %v438_v12, %v412_v43 }
 0x358   :  { %v422_v23 = vpop.permute.xlu1 %421 }
 0x359   :  { %v424_v24 = vmul.f32 %v422_v23, %v392_v22 }
 0x35b   :  { %426 = vrot.lane.b32.xlu1 %v424_v24, %s3334_s18 }
 0x38b   :  { %v443_v45 = vpop.permute.xlu0 %442 }
 0x38c   :  { %v445_v48 = vmul.f32 %v443_v45, %v412_v43 }
 0x38e   :  { %447 = vrot.lane.b32.xlu2 %v445_v48, %s3334_s18 }
 0x393   :  { %v306_v49 = vpop.permute.xlu0 %305 }
 0x394   :  { %v3568_v51 = vsel %vm297_vm9, %v306_v49, 0.0 }
 0x395   :  { %416 = vrot.lane.b32.xlu0 %v3568_v51, %s3334_s18 }
 0x3cd   :  { %v427_v60 = vpop.permute.xlu1 %426 }
 0x3e8   :  { %v448_v53 = vpop.permute.xlu2 %447 }
 0x3e9   :  { %v450_v55 = vadd.f32 %v448_v53, %v440_v52 }
 0x3eb   :  { %3100 = vtanh.f32 %v450_v55 }
 0x3f1   :  { %v3101_v57 = vpop.eup %3100 }
 0x3f2   :  { %453 = vrot.lane.b32.xlu2 %v3101_v57, %s3333_s0 }
 0x407   :  { %v417_v58 = vpop.permute.xlu0 %416 }
 0x408   :  { %v419_v59 = vmul.f32 %v417_v58, %v392_v22 }
 0x40a   :  { %v429_v61 = vadd.f32 %v427_v60, %v419_v59 }
 0x40c   :  { %3102 = vtanh.f32 %v429_v61 }
 0x412   :  { %v3103_v62 = vpop.eup %3102 }
 0x413   :  { %432 = vrot.lane.b32.xlu0 %v3103_v62, %s3333_s0 }
 0x44c   :  { %v454_v47 = vpop.permute.xlu2 %453 }
 0x44d   :  { %v456_v63 = vmul.f32 %v454_v47, %v412_v43 }
 0x44f   :  { %470 = vrot.lane.b32.xlu2 %v456_v63, %s3334_s18 }
 0x457   :  { %475 = vrot.lane.b32.xlu2 %v450_v55, %s3335_s19 }
 0x485   :  { %v433_v0 = vpop.permute.xlu0 %432 }
 0x486   :  { %v435_v2 = vmul.f32 %v433_v0, %v392_v22 }
 0x488   :  { %460 = vrot.lane.b32.xlu1 %v435_v2, %s3334_s18 }
 0x4a9   :  { %v471_v5 = vpop.permute.xlu2 %470 }
 0x4aa   :  { %v3581_v7 = vsel %vm458_vm4, %v471_v5, %v3546_v54  ;;  %v481_v8 = vmul.f32 %v471_v5, %v324_v4  ;;  %v3598_v54 = vld [vmem:[%s4562_s1 + $0x8] sm:$0xff] }
 0x4ab   :  { %2958 = vmatmul.msk.f32.vlgmr.msra.gmra.mxu3 %vm42_vm0, %v3581_v7  ;;  %vm457_vm5 = vcmp.gt.f32.partialorder %v3598_v54, 0.0 }
 0x4ac   :  { %482 = vst.msk [vmem:[#allocation3 + $0x30] sm:$0xff] %vm42_vm0, %v481_v8  ;;  %846 = vmatpush.msra.mxu3 %v3431_v15 }
 0x4ae   :  { %847 = vmatpush.msra.mxu3 %v3436_v16 }
 0x4b0   :  { %848 = vmatpush.msra.mxu3 %v3452_v18 }
 0x4b1   :  { %v476_v9 = vpop.permute.xlu2 %475 }
 0x4b2   :  { %v3590_v11 = vsel %vm458_vm4, %v476_v9, %v3554_v56  ;;  %849 = vmatpush.msra.mxu3 %v3457_v19 }
 0x4b3   :  { %597 = vrot.lane.b32.xlu1 %v3590_v11, %s3334_s18 }
 0x4fa   :  { %v461_v12 = vpop.permute.xlu1 %460 }
 0x4fb   :  { %v3604_v14 = vsel %vm457_vm5, %v461_v12, %v3534_v50  ;;  %v479_v56 = vmul.f32 %v461_v12, %v3598_v54 }
 0x4fc   :  { %2957 = vmatmul.msk.f32.vlgmr.msra.gmra.mxu2 %vm42_vm0, %v3604_v14 }
 0x4fd   :  { %480 = vst.msk [vmem:[#allocation2 + $0x8] sm:$0xff] %vm42_vm0, %v479_v56  ;;  %821 = vmatpush.msra.mxu2 %v3372_v1 }
 0x4ff   :  { %822 = vmatpush.msra.mxu2 %v3381_v3 }
 0x501   :  { %823 = vmatpush.msra.mxu2 %v3392_v6 }
 0x503   :  { %824 = vmatpush.msra.mxu2 %v3407_v10 }
 0x52e   :  { %v531_v17 = vpop.f32.mrf.mxu3 }
 0x52f   :  { %v534_v46 = vadd.f32 %v531_v17, %v3513_v44 }
 0x531   :  { %3104 = vtanh.f32 %v534_v46  ;;  %v2960_v22 = vmul.f32 -1.442695, %v534_v46 }
 0x533   :  { %3106 = vpow2.f32 %v2960_v22 }
 0x537   :  { %v3105_v50 = vpop.eup %3104 }
 0x538   :  { %602 = vrot.lane.b32.xlu0 %v3105_v50, %s3333_s0 }
 0x539   :  { %v3107_v25 = vpop.eup %3106 }
 0x53a   :  { %v558_v28 = vadd.f32 1.0, %v3107_v25 }
 0x53c   :  { %v570_v34 = vand.u32 2147483648, %v558_v28  ;;  %vm564_vm7 = vweird.f32 %v558_v28  ;;  %v568_v36 = vand.u32 2147483647, %v558_v28 }
 0x53e   :  { %v571_v39 = vor.u32 1.1754944e-38, %v570_v34  ;;  %vm569_vm9 = vcmp.eq.f32.partialorder %v568_v36, 8.507059e+37  ;;  %v3664_v36 = vld [vmem:[%s4562_s1 + $0x10] sm:$0xff] }
 0x53f   :  { %vm617_vm15 = vcmp.gt.f32.partialorder %v3664_v36, 0.0 }
 0x540   :  { %465 = vrot.lane.b32.xlu0 %v429_v61, %s3335_s19  ;;  %v598_v61 = vpop.permute.xlu1 %597 }
 0x57f   :  { %v506_v23 = vpop.f32.mrf.mxu2 }
 0x580   :  { %v509_v24 = vadd.f32 %v506_v23, %v91_v21 }
 0x582   :  { %3108 = vtanh.f32 %v509_v24  ;;  %v2959_v52 = vmul.f32 -1.442695, %v509_v24  ;;  %v3635_v24 = vld [vmem:[%s4562_s1 + $0x28] sm:$0xff] }
 0x583   :  { %3110 = vrcp.f32 %v558_v28  ;;  %vm618_vm14 = vcmp.gt.f32.partialorder %v3635_v24, 0.0 }
 0x584   :  { %3112 = vpow2.f32 %v2959_v52 }
 0x588   :  { %v3109_v26 = vpop.eup %3108 }
 0x589   :  { %581 = vrot.lane.b32.xlu1 %v3109_v26, %s3333_s0  ;;  %v3111_v44 = vpop.eup %3110 }
 0x58a   :  { %v560_v30 = vmul.f32 %v3111_v44, %v558_v28  ;;  %vm565_vm6 = vweird.f32 %v3111_v44  ;;  %v3113_v53 = vpop.eup %3112 }
 0x58b   :  { %vm566_vm8 = vmor %vm564_vm7, %vm565_vm6  ;;  %v538_v55 = vadd.f32 1.0, %v3113_v53 }
 0x58c   :  { %v561_v31 = vsub.f32 1.0, %v560_v30 }
 0x58d   :  { %3114 = vrcp.f32 %v538_v55  ;;  %v550_v47 = vand.u32 2147483648, %v538_v55  ;;  %vm544_vm11 = vweird.f32 %v538_v55  ;;  %v548_v63 = vand.u32 2147483647, %v538_v55 }
 0x58e   :  { %v562_v32 = vmul.f32 %v3111_v44, %v561_v31 }
 0x58f   :  { %v551_v0 = vor.u32 1.1754944e-38, %v550_v47  ;;  %vm549_vm13 = vcmp.eq.f32.partialorder %v548_v63, 8.507059e+37 }
 0x590   :  { %v563_v33 = vadd.f32 %v3111_v44, %v562_v32 }
 0x592   :  { %v567_v37 = vsel %vm566_vm8, %v3111_v44, %v563_v33 }
 0x593   :  { %v572_v41 = vsel %vm569_vm9, %v571_v39, %v567_v37  ;;  %v3115_v57 = vpop.eup %3114 }
 0x594   :  { %v540_v58 = vmul.f32 %v3115_v57, %v538_v55  ;;  %vm545_vm10 = vweird.f32 %v3115_v57  ;;  %v600_v8 = vmul.f32 %v598_v61, %v572_v41  ;;  %v93_v61 = vpop.f32.mrf.mxu0 }
 0x595   :  { %vm546_vm12 = vmor %vm544_vm11, %vm545_vm10 }
 0x596   :  { %v541_v59 = vsub.f32 1.0, %v540_v58 }
 0x598   :  { %v542_v60 = vmul.f32 %v3115_v57, %v541_v59 }
 0x59a   :  { %v543_v62 = vadd.f32 %v3115_v57, %v542_v60 }
 0x5aa   :  { %v603_v43 = vpop.permute.xlu0 %602 }
 0x5ab   :  { %v605_v45 = vmul.f32 %v603_v43, %v572_v41 }
 0x5ad   :  { %607 = vrot.lane.b32.xlu2 %v605_v45, %s3334_s18 }
 0x5b2   :  { %v466_v48 = vpop.permute.xlu0 %465 }
 0x5b3   :  { %v3623_v49 = vsel %vm457_vm5, %v466_v48, %v3568_v51  ;;  %v547_v51 = vsel %vm546_vm12, %v3115_v57, %v543_v62  ;;  %v94_v62 = vadd.f32 %v93_v61, %v3499_v27 }
 0x5b4   :  { %576 = vrot.lane.b32.xlu0 %v3623_v49, %s3334_s18  ;;  %v552_v2 = vsel %vm549_vm13, %v551_v0, %v547_v51 }
 0x5fb   :  { %v582_v4 = vpop.permute.xlu1 %581 }
 0x5fc   :  { %v584_v5 = vmul.f32 %v582_v4, %v552_v2 }
 0x5fe   :  { %586 = vrot.lane.b32.xlu1 %v584_v5, %s3334_s18 }
 0x607   :  { %v608_v9 = vpop.permute.xlu2 %607 }
 0x608   :  { %v610_v12 = vadd.f32 %v608_v9, %v600_v8 }
 0x60a   :  { %3116 = vtanh.f32 %v610_v12 }
 0x610   :  { %v3117_v56 = vpop.eup %3116 }
 0x611   :  { %613 = vrot.lane.b32.xlu2 %v3117_v56, %s3333_s0 }
 0x626   :  { %v577_v46 = vpop.permute.xlu0 %576 }
 0x627   :  { %v579_v20 = vmul.f32 %v577_v46, %v552_v2 }
 0x66b   :  { %v614_v17 = vpop.permute.xlu2 %613 }
 0x66c   :  { %v616_v50 = vmul.f32 %v614_v17, %v572_v41 }
 0x66e   :  { %630 = vrot.lane.b32.xlu2 %v616_v50, %s3334_s18 }
 0x670   :  { %v587_v21 = vpop.permute.xlu1 %586 }
 0x671   :  { %v589_v22 = vadd.f32 %v587_v21, %v579_v20 }
 0x673   :  { %3118 = vtanh.f32 %v589_v22 }
 0x676   :  { %635 = vrot.lane.b32.xlu2 %v610_v12, %s3335_s19 }
 0x679   :  { %v3119_v23 = vpop.eup %3118 }
 0x67a   :  { %592 = vrot.lane.b32.xlu0 %v3119_v23, %s3333_s0 }
 0x6c8   :  { %v631_v25 = vpop.permute.xlu2 %630 }
 0x6c9   :  { %v3641_v26 = vsel %vm618_vm14, %v631_v25, %v3581_v7  ;;  %v641_v28 = vmul.f32 %v631_v25, %v3635_v24 }
 0x6ca   :  { %2962 = vmatmul.msk.f32.vlgmr.msrb.gmra.mxu3 %vm42_vm0, %v3641_v26 }
 0x6cb   :  { %642 = vst.msk [vmem:[#allocation3 + $0x28] sm:$0xff] %vm42_vm0, %v641_v28  ;;  %1006 = vmatpush.msrb.mxu3 %v3431_v15 }
 0x6cd   :  { %1007 = vmatpush.msrb.mxu3 %v3436_v16 }
 0x6cf   :  { %1008 = vmatpush.msrb.mxu3 %v3452_v18 }
 0x6d0   :  { %v636_v7 = vpop.permute.xlu2 %635 }
 0x6d1   :  { %1009 = vmatpush.msrb.mxu3 %v3457_v19  ;;  %v3655_v31 = vsel %vm618_vm14, %v636_v7, %v3590_v11 }
 0x6ec   :  { %v593_v44 = vpop.permute.xlu0 %592 }
 0x6ed   :  { %v595_v30 = vmul.f32 %v593_v44, %v552_v2 }
 0x6ef   :  { %620 = vrot.lane.b32.xlu1 %v595_v30, %s3334_s18 }
 0x6f7   :  { %757 = vrot.lane.b32.xlu1 %v3655_v31, %s3334_s18 }
 0x74d   :  { %v691_v32 = vpop.f32.mrf.mxu3 }
 0x74e   :  { %v694_v33 = vadd.f32 %v691_v32, %v3511_v42 }
 0x750   :  { %3120 = vtanh.f32 %v694_v33  ;;  %v2964_v39 = vmul.f32 -1.442695, %v694_v33 }
 0x752   :  { %3122 = vpow2.f32 %v2964_v39 }
 0x756   :  { %v3121_v34 = vpop.eup %3120 }
 0x757   :  { %762 = vrot.lane.b32.xlu0 %v3121_v34, %s3333_s0 }
 0x758   :  { %v3123_v41 = vpop.eup %3122 }
 0x75f   :  { %625 = vrot.lane.b32.xlu0 %v589_v22, %s3335_s19 }
 0x761   :  { %v621_v11 = vpop.permute.xlu1 %620 }
 0x762   :  { %v3671_v37 = vsel %vm617_vm15, %v621_v11, %v3604_v14  ;;  %v639_v42 = vmul.f32 %v621_v11, %v3664_v36  ;;  %v718_v14 = vadd.f32 1.0, %v3123_v41  ;;  %v3699_v41 = vld [vmem:[%s4562_s1 + $0x20] sm:$0xff] }
 0x763   :  { %2961 = vmatmul.msk.f32.vlgmr.msrb.gmra.mxu2 %vm42_vm0, %v3671_v37  ;;  %vm778_vm10 = vcmp.gt.f32.partialorder %v3699_v41, 0.0 }
 0x764   :  { %640 = vst.msk [vmem:[#allocation2 + $0x10] sm:$0xff] %vm42_vm0, %v639_v42  ;;  %981 = vmatpush.msrb.mxu2 %v3372_v1  ;;  %3124 = vrcp.f32 %v718_v14  ;;  %v730_v55 = vand.u32 2147483648, %v718_v14  ;;  %vm724_vm2 = vweird.f32 %v718_v14  ;;  %v728_v1 = vand.u32 2147483647, %v718_v14 }
 0x766   :  { %982 = vmatpush.msrb.mxu2 %v3381_v3  ;;  %v731_v57 = vor.u32 1.1754944e-38, %v730_v55  ;;  %vm729_vm4 = vcmp.eq.f32.partialorder %v728_v1, 8.507059e+37  ;;  %v3729_v55 = vld [vmem:[%s4562_s1 + $0x18] sm:$0xff] }
 0x767   :  { %vm777_vm11 = vcmp.gt.f32.partialorder %v3729_v55, 0.0 }
 0x768   :  { %983 = vmatpush.msrb.mxu2 %v3392_v6 }
 0x769   :  { %v758_v0 = vpop.permute.xlu1 %757 }
 0x76a   :  { %984 = vmatpush.msrb.mxu2 %v3407_v10  ;;  %v3125_v43 = vpop.eup %3124 }
 0x76b   :  { %v720_v45 = vmul.f32 %v3125_v43, %v718_v14  ;;  %vm725_vm1 = vweird.f32 %v3125_v43 }
 0x76c   :  { %vm726_vm3 = vmor %vm724_vm2, %vm725_vm1 }
 0x76d   :  { %v721_v48 = vsub.f32 1.0, %v720_v45 }
 0x76f   :  { %v722_v52 = vmul.f32 %v3125_v43, %v721_v48 }
 0x771   :  { %v723_v53 = vadd.f32 %v3125_v43, %v722_v52 }
 0x773   :  { %v727_v3 = vsel %vm726_vm3, %v3125_v43, %v723_v53 }
 0x774   :  { %v732_v6 = vsel %vm729_vm4, %v731_v57, %v727_v3 }
 0x775   :  { %v760_v2 = vmul.f32 %v758_v0, %v732_v6 }
 0x7c9   :  { %v763_v10 = vpop.permute.xlu0 %762 }
 0x7ca   :  { %v765_v58 = vmul.f32 %v763_v10, %v732_v6  ;;  %v3756_v10 = vld [vmem:[%s4559_s3 + $0x8] sm:$0xff] }
 0x7cc   :  { %767 = vrot.lane.b32.xlu2 %v765_v58, %s3334_s18  ;;  %v3762_v58 = vld [vmem:[%s4559_s3] sm:$0xff] }
 0x7d1   :  { %v626_v59 = vpop.permute.xlu0 %625 }
 0x7d2   :  { %v3685_v60 = vsel %vm617_vm15, %v626_v59, %v3623_v49 }
 0x7d3   :  { %736 = vrot.lane.b32.xlu0 %v3685_v60, %s3334_s18 }
 0x7e6   :  { %v666_v47 = vpop.f32.mrf.mxu2 }
 0x7e7   :  { %v669_v63 = vadd.f32 %v666_v47, %v94_v62 }
 0x7e9   :  { %3126 = vtanh.f32 %v669_v63  ;;  %v2963_v49 = vmul.f32 -1.442695, %v669_v63 }
 0x7ef   :  { %v3127_v51 = vpop.eup %3126 }
 0x7f0   :  { %741 = vrot.lane.b32.xlu1 %v3127_v51, %s3333_s0 }
 0x826   :  { %v768_v4 = vpop.permute.xlu2 %767 }
 0x827   :  { %v770_v5 = vadd.f32 %v768_v4, %v760_v2 }
 0x829   :  { %3128 = vtanh.f32 %v770_v5 }
 0x82a   :  { %3130 = vpow2.f32 %v2963_v49 }
 0x82f   :  { %v3129_v8 = vpop.eup %3128 }
 0x830   :  { %773 = vrot.lane.b32.xlu2 %v3129_v8, %s3333_s0  ;;  %v3131_v9 = vpop.eup %3130 }
 0x831   :  { %v698_v12 = vadd.f32 1.0, %v3131_v9 }
 0x833   :  { %3132 = vrcp.f32 %v698_v12  ;;  %v710_v21 = vand.u32 2147483648, %v698_v12  ;;  %vm704_vm7 = vweird.f32 %v698_v12  ;;  %v708_v22 = vand.u32 2147483647, %v698_v12 }
 0x835   :  { %v711_v25 = vor.u32 1.1754944e-38, %v710_v21  ;;  %vm709_vm9 = vcmp.eq.f32.partialorder %v708_v22, 8.507059e+37 }
 0x839   :  { %v3133_v56 = vpop.eup %3132 }
 0x83a   :  { %v700_v17 = vmul.f32 %v3133_v56, %v698_v12  ;;  %vm705_vm6 = vweird.f32 %v3133_v56 }
 0x83b   :  { %vm706_vm8 = vmor %vm704_vm7, %vm705_vm6 }
 0x83c   :  { %v701_v46 = vsub.f32 1.0, %v700_v17 }
 0x83e   :  { %v702_v50 = vmul.f32 %v3133_v56, %v701_v46 }
 0x840   :  { %v703_v20 = vadd.f32 %v3133_v56, %v702_v50 }
 0x842   :  { %v707_v23 = vsel %vm706_vm8, %v3133_v56, %v703_v20  ;;  %v96_v20 = vpop.f32.mrf.mxu0 }
 0x843   :  { %v712_v28 = vsel %vm709_vm9, %v711_v25, %v707_v23  ;;  %v97_v21 = vadd.f32 %v96_v20, %v3499_v27 }
 0x845   :  { %v737_v33 = vpop.permute.xlu0 %736 }
 0x846   :  { %v739_v34 = vmul.f32 %v737_v33, %v712_v28 }
 0x862   :  { %v742_v44 = vpop.permute.xlu1 %741 }
 0x863   :  { %v744_v30 = vmul.f32 %v742_v44, %v712_v28 }
 0x865   :  { %746 = vrot.lane.b32.xlu1 %v744_v30, %s3334_s18 }
 0x88a   :  { %v774_v7 = vpop.permute.xlu2 %773 }
 0x88b   :  { %v776_v32 = vmul.f32 %v774_v7, %v732_v6  ;;  %v3744_v6 = vld [vmem:[%s4559_s3 + $0x18] sm:$0xff] }
 0x88d   :  { %790 = vrot.lane.b32.xlu2 %v776_v32, %s3334_s18 }
 0x895   :  { %795 = vrot.lane.b32.xlu2 %v770_v5, %s3335_s19 }
 0x8d7   :  { %v747_v11 = vpop.permute.xlu1 %746 }
 0x8d8   :  { %v749_v42 = vadd.f32 %v747_v11, %v739_v34 }
 0x8da   :  { %3134 = vtanh.f32 %v749_v42 }
 0x8e0   :  { %v3135_v39 = vpop.eup %3134 }
 0x8e1   :  { %752 = vrot.lane.b32.xlu0 %v3135_v39, %s3333_s0 }
 0x8e7   :  { %v791_v14 = vpop.permute.xlu2 %790 }
 0x8e8   :  { %v3705_v43 = vsel %vm778_vm10, %v791_v14, %v3641_v26  ;;  %v801_v45 = vmul.f32 %v791_v14, %v3699_v41 }
 0x8e9   :  { %2966 = vmatmul.msk.f32.vlgmr.msra.gmra.mxu3 %vm42_vm0, %v3705_v43 }
 0x8ea   :  { %802 = vst.msk [vmem:[#allocation3 + $0x20] sm:$0xff] %vm42_vm0, %v801_v45  ;;  %1166 = vmatpush.msra.mxu3 %v3431_v15 }
 0x8ec   :  { %1167 = vmatpush.msra.mxu3 %v3436_v16 }
 0x8ee   :  { %1168 = vmatpush.msra.mxu3 %v3452_v18 }
 0x8ef   :  { %v796_v26 = vpop.permute.xlu2 %795 }
 0x8f0   :  { %1169 = vmatpush.msra.mxu3 %v3457_v19  ;;  %v3719_v53 = vsel %vm778_vm10, %v796_v26, %v3655_v31 }
 0x953   :  { %v753_v48 = vpop.permute.xlu0 %752 }
 0x954   :  { %v755_v52 = vmul.f32 %v753_v48, %v712_v28 }
 0x956   :  { %780 = vrot.lane.b32.xlu1 %v755_v52, %s3334_s18 }
 0x95e   :  { %917 = vrot.lane.b32.xlu1 %v3719_v53, %s3334_s18 }
 0x96c   :  { %v851_v15 = vpop.f32.mrf.mxu3 }
 0x96d   :  { %v854_v16 = vadd.f32 %v851_v15, %v3509_v40 }
 0x96f   :  { %3136 = vtanh.f32 %v854_v16  ;;  %v2968_v19 = vmul.f32 -1.442695, %v854_v16 }
 0x971   :  { %3138 = vpow2.f32 %v2968_v19 }
 0x975   :  { %v3137_v18 = vpop.eup %3136 }
 0x976   :  { %922 = vrot.lane.b32.xlu0 %v3137_v18, %s3333_s0 }
 0x977   :  { %v3139_v31 = vpop.eup %3138 }
 0x978   :  { %v878_v1 = vadd.f32 1.0, %v3139_v31 }
 0x97a   :  { %3140 = vrcp.f32 %v878_v1  ;;  %v890_v51 = vand.u32 2147483648, %v878_v1  ;;  %vm884_vm13 = vweird.f32 %v878_v1  ;;  %v888_v0 = vand.u32 2147483647, %v878_v1 }
 0x97c   :  { %v891_v4 = vor.u32 1.1754944e-38, %v890_v51  ;;  %vm889_vm2 = vcmp.eq.f32.partialorder %v888_v0, 8.507059e+37 }
 0x97e   :  { %785 = vrot.lane.b32.xlu0 %v749_v42, %s3335_s19 }
 0x980   :  { %v3141_v59 = vpop.eup %3140 }
 0x981   :  { %v880_v61 = vmul.f32 %v3141_v59, %v878_v1  ;;  %vm885_vm12 = vweird.f32 %v3141_v59  ;;  %v3328_v1 = vld [vmem:[%s4559_s3 + $0x38] sm:$0xff] }
 0x982   :  { %vm886_vm1 = vmor %vm884_vm13, %vm885_vm12 }
 0x983   :  { %v881_v62 = vsub.f32 1.0, %v880_v61 }
 0x985   :  { %v882_v47 = vmul.f32 %v3141_v59, %v881_v62 }
 0x987   :  { %v883_v63 = vadd.f32 %v3141_v59, %v882_v47 }
 0x989   :  { %v887_v2 = vsel %vm886_vm1, %v3141_v59, %v883_v63 }
 0x98a   :  { %v892_v5 = vsel %vm889_vm2, %v891_v4, %v887_v2 }
 0x9c8   :  { %v781_v3 = vpop.permute.xlu1 %780 }
 0x9c9   :  { %v3735_v40 = vsel %vm777_vm11, %v781_v3, %v3671_v37  ;;  %v799_v57 = vmul.f32 %v781_v3, %v3729_v55  ;;  %v3750_v37 = vld [vmem:[%s4559_s3 + $0x10] sm:$0xff] }
 0x9ca   :  { %2965 = vmatmul.msk.f32.vlgmr.msra.gmra.mxu2 %vm42_vm0, %v3735_v40  ;;  %v3329_v3 = vld [vmem:[%s4559_s3 + $0x30] sm:$0xff] }
 0x9cb   :  { %800 = vst.msk [vmem:[#allocation2 + $0x18] sm:$0xff] %vm42_vm0, %v799_v57  ;;  %1141 = vmatpush.msra.mxu2 %v3744_v6  ;;  %v3331_v57 = vld [vmem:[%s4559_s3 + $0x20] sm:$0xff] }
 0x9cd   :  { %1142 = vmatpush.msra.mxu2 %v3750_v37 }
 0x9cf   :  { %1143 = vmatpush.msra.mxu2 %v3756_v10 }
 0x9d0   :  { %v918_v56 = vpop.permute.xlu1 %917 }
 0x9d1   :  { %1144 = vmatpush.msra.mxu2 %v3762_v58  ;;  %v920_v17 = vmul.f32 %v918_v56, %v892_v5 }
 0x9e8   :  { %v923_v8 = vpop.permute.xlu0 %922 }
 0x9e9   :  { %v925_v49 = vmul.f32 %v923_v8, %v892_v5 }
 0x9eb   :  { %927 = vrot.lane.b32.xlu2 %v925_v49, %s3334_s18 }
 0x9f0   :  { %v786_v9 = vpop.permute.xlu0 %785 }
 0x9f1   :  { %v3769_v12 = vsel %vm777_vm11, %v786_v9, %v3685_v60 }
 0x9f2   :  { %896 = vrot.lane.b32.xlu0 %v3769_v12, %s3334_s18 }
 0xa45   :  { %v928_v46 = vpop.permute.xlu2 %927 }
 0xa46   :  { %v930_v50 = vadd.f32 %v928_v46, %v920_v17 }
 0xa48   :  { %3142 = vtanh.f32 %v930_v50 }
 0xa4d   :  { %v826_v22 = vpop.f32.mrf.mxu2 }
 0xa4e   :  { %v3143_v23 = vpop.eup %3142  ;;  %v829_v25 = vadd.f32 %v826_v22, %v97_v21 }
 0xa4f   :  { %933 = vrot.lane.b32.xlu2 %v3143_v23, %s3333_s0 }
 0xa50   :  { %3144 = vtanh.f32 %v829_v25  ;;  %v2967_v60 = vmul.f32 -1.442695, %v829_v25 }
 0xa52   :  { %3146 = vpow2.f32 %v2967_v60 }
 0xa56   :  { %v3145_v28 = vpop.eup %3144 }
 0xa57   :  { %901 = vrot.lane.b32.xlu1 %v3145_v28, %s3333_s0 }
 0xa58   :  { %v3147_v44 = vpop.eup %3146 }
 0xa59   :  { %v858_v30 = vadd.f32 1.0, %v3147_v44 }
 0xa5b   :  { %3148 = vrcp.f32 %v858_v30  ;;  %v870_v14 = vand.u32 2147483648, %v858_v30  ;;  %vm864_vm4 = vweird.f32 %v858_v30  ;;  %v868_v45 = vand.u32 2147483647, %v858_v30 }
 0xa5d   :  { %v871_v52 = vor.u32 1.1754944e-38, %v870_v14  ;;  %vm869_vm7 = vcmp.eq.f32.partialorder %v868_v45, 8.507059e+37 }
 0xa61   :  { %v3149_v33 = vpop.eup %3148 }
 0xa62   :  { %v860_v34 = vmul.f32 %v3149_v33, %v858_v30  ;;  %vm865_vm3 = vweird.f32 %v3149_v33 }
 0xa63   :  { %vm866_vm6 = vmor %vm864_vm4, %vm865_vm3 }
 0xa64   :  { %v861_v11 = vsub.f32 1.0, %v860_v34  ;;  %v897_v59 = vpop.permute.xlu0 %896 }
 0xa66   :  { %v862_v42 = vmul.f32 %v3149_v33, %v861_v11 }
 0xa68   :  { %v863_v39 = vadd.f32 %v3149_v33, %v862_v42 }
 0xa6a   :  { %v867_v48 = vsel %vm866_vm6, %v3149_v33, %v863_v39 }
 0xa6b   :  { %v872_v26 = vsel %vm869_vm7, %v871_v52, %v867_v48 }
 0xa6c   :  { %v899_v61 = vmul.f32 %v897_v59, %v872_v26 }
 0xaa9   :  { %v934_v7 = vpop.permute.xlu2 %933 }
 0xaaa   :  { %v936_v32 = vmul.f32 %v934_v7, %v892_v5 }
 0xaac   :  { %950 = vrot.lane.b32.xlu2 %v936_v32, %s3334_s18 }
 0xab4   :  { %955 = vrot.lane.b32.xlu2 %v930_v50, %s3335_s19 }
 0xac9   :  { %v902_v15 = vpop.permute.xlu1 %901 }
 0xaca   :  { %v904_v16 = vmul.f32 %v902_v15, %v872_v26 }
 0xacc   :  { %906 = vrot.lane.b32.xlu1 %v904_v16, %s3334_s18 }
 0xb06   :  { %v951_v18 = vpop.permute.xlu2 %950 }
 0xb07   :  { %v3782_v19 = vsel %vm777_vm11, %v951_v18, %v3705_v43  ;;  %v961_v31 = vmul.f32 %v951_v18, %v3729_v55  ;;  %v3330_v43 = vld [vmem:[%s4559_s3 + $0x28] sm:$0xff] }
 0xb08   :  { %2970 = vmatmul.msk.f32.vlgmr.msrb.gmra.mxu3 %vm42_vm0, %v3782_v19 }
 0xb09   :  { %962 = vst.msk [vmem:[#allocation3 + $0x18] sm:$0xff] %vm42_vm0, %v961_v31  ;;  %1326 = vmatpush.msrb.mxu3 %v3328_v1 }
 0xb0b   :  { %1327 = vmatpush.msrb.mxu3 %v3329_v3 }
 0xb0d   :  { %1328 = vmatpush.msrb.mxu3 %v3330_v43 }
 0xb0e   :  { %v956_v8 = vpop.permute.xlu2 %955 }
 0xb0f   :  { %1329 = vmatpush.msrb.mxu3 %v3331_v57  ;;  %v3808_v49 = vsel %vm777_vm11, %v956_v8, %v3719_v53 }
 0xb3e   :  { %v907_v62 = vpop.permute.xlu1 %906 }
 0xb3f   :  { %v909_v47 = vadd.f32 %v907_v62, %v899_v61 }
 0xb41   :  { %3150 = vtanh.f32 %v909_v47 }
 0xb47   :  { %v3151_v63 = vpop.eup %3150 }
 0xb48   :  { %912 = vrot.lane.b32.xlu0 %v3151_v63, %s3333_s0 }
 0xb8b   :  { %v1011_v51 = vpop.f32.mrf.mxu3 }
 0xb8c   :  { %v1014_v0 = vadd.f32 %v1011_v51, %v3507_v38 }
 0xb8e   :  { %3152 = vtanh.f32 %v1014_v0  ;;  %v2972_v38 = vmul.f32 -1.442695, %v1014_v0 }
 0xb90   :  { %3154 = vpow2.f32 %v2972_v38 }
 0xb94   :  { %v3153_v2 = vpop.eup %3152 }
 0xb95   :  { %1082 = vrot.lane.b32.xlu0 %v3153_v2, %s3333_s0 }
 0xb96   :  { %v3155_v9 = vpop.eup %3154 }
 0xb97   :  { %v1038_v56 = vadd.f32 1.0, %v3155_v9 }
 0xb99   :  { %3156 = vrcp.f32 %v1038_v56  ;;  %v1050_v22 = vand.u32 2147483648, %v1038_v56  ;;  %vm1044_vm9 = vweird.f32 %v1038_v56  ;;  %v1048_v23 = vand.u32 2147483647, %v1038_v56 }
 0xb9b   :  { %v1051_v55 = vor.u32 1.1754944e-38, %v1050_v22  ;;  %vm1049_vm11 = vcmp.eq.f32.partialorder %v1048_v23, 8.507059e+37 }
 0xb9d   :  { %945 = vrot.lane.b32.xlu0 %v909_v47, %s3335_s19 }
 0xb9f   :  { %v3157_v17 = vpop.eup %3156 }
 0xba0   :  { %v1040_v46 = vmul.f32 %v3157_v17, %v1038_v56  ;;  %vm1045_vm8 = vweird.f32 %v3157_v17 }
 0xba1   :  { %vm1046_vm12 = vmor %vm1044_vm9, %vm1045_vm8 }
 0xba2   :  { %v1041_v50 = vsub.f32 1.0, %v1040_v46 }
 0xba4   :  { %v1042_v20 = vmul.f32 %v3157_v17, %v1041_v50 }
 0xba6   :  { %v1043_v21 = vadd.f32 %v3157_v17, %v1042_v20 }
 0xba8   :  { %v1047_v53 = vsel %vm1046_vm12, %v3157_v17, %v1043_v21 }
 0xba9   :  { %v1052_v25 = vsel %vm1049_vm11, %v1051_v55, %v1047_v53 }
 0xbba   :  { %v913_v4 = vpop.permute.xlu0 %912 }
 0xbbb   :  { %v915_v5 = vmul.f32 %v913_v4, %v872_v26 }
 0xbbd   :  { %940 = vrot.lane.b32.xlu1 %v915_v5, %s3334_s18 }
 0xbc5   :  { %1077 = vrot.lane.b32.xlu1 %v3808_v49, %s3334_s18 }
 0xc07   :  { %v1083_v28 = vpop.permute.xlu0 %1082 }
 0xc08   :  { %v1085_v60 = vmul.f32 %v1083_v28, %v1052_v25 }
 0xc0a   :  { %1087 = vrot.lane.b32.xlu2 %v1085_v60, %s3334_s18 }
 0xc0f   :  { %v946_v44 = vpop.permute.xlu0 %945 }
 0xc10   :  { %v3816_v30 = vsel %vm778_vm10, %v946_v44, %v3769_v12 }
 0xc11   :  { %1056 = vrot.lane.b32.xlu0 %v3816_v30, %s3334_s18 }
 0xc2f   :  { %v941_v7 = vpop.permute.xlu1 %940 }
 0xc30   :  { %v3823_v32 = vsel %vm778_vm10, %v941_v7, %v3735_v40  ;;  %v959_v33 = vmul.f32 %v941_v7, %v3699_v41  ;;  %v99_v41 = vpop.f32.mrf.mxu0 }
 0xc31   :  { %2969 = vmatmul.msk.f32.vlgmr.msrb.gmra.mxu2 %vm42_vm0, %v3823_v32  ;;  %v100_v39 = vadd.f32 %v99_v41, %v3499_v27 }
 0xc32   :  { %960 = vst.msk [vmem:[#allocation2 + $0x20] sm:$0xff] %vm42_vm0, %v959_v33  ;;  %1301 = vmatpush.msrb.mxu2 %v3744_v6 }
 0xc34   :  { %1302 = vmatpush.msrb.mxu2 %v3750_v37 }
 0xc36   :  { %1303 = vmatpush.msrb.mxu2 %v3756_v10 }
 0xc37   :  { %v1078_v12 = vpop.permute.xlu1 %1077 }
 0xc38   :  { %1304 = vmatpush.msrb.mxu2 %v3762_v58  ;;  %v1080_v34 = vmul.f32 %v1078_v12, %v1052_v25 }
 0xc64   :  { %v1088_v11 = vpop.permute.xlu2 %1087 }
 0xc65   :  { %v1090_v40 = vadd.f32 %v1088_v11, %v1080_v34 }
 0xc67   :  { %3158 = vtanh.f32 %v1090_v40 }
 0xc6d   :  { %v3159_v42 = vpop.eup %3158 }
 0xc6e   :  { %1093 = vrot.lane.b32.xlu2 %v3159_v42, %s3333_s0 }
 0xc83   :  { %v1057_v51 = vpop.permute.xlu0 %1056 }
 0xcb4   :  { %v986_v14 = vpop.f32.mrf.mxu2 }
 0xcb5   :  { %v989_v45 = vadd.f32 %v986_v14, %v100_v39 }
 0xcb7   :  { %3160 = vtanh.f32 %v989_v45  ;;  %v2971_v58 = vmul.f32 -1.442695, %v989_v45 }
 0xcb9   :  { %3162 = vpow2.f32 %v2971_v58 }
 0xcbd   :  { %v3161_v6 = vpop.eup %3160 }
 0xcbe   :  { %1061 = vrot.lane.b32.xlu1 %v3161_v6, %s3333_s0 }
 0xcbf   :  { %v3163_v48 = vpop.eup %3162 }
 0xcc0   :  { %v1018_v52 = vadd.f32 1.0, %v3163_v48 }
 0xcc2   :  { %3164 = vrcp.f32 %v1018_v52  ;;  %v1030_v57 = vand.u32 2147483648, %v1018_v52  ;;  %vm1024_vm13 = vweird.f32 %v1018_v52  ;;  %v1028_v59 = vand.u32 2147483647, %v1018_v52 }
 0xcc4   :  { %v1031_v62 = vor.u32 1.1754944e-38, %v1030_v57  ;;  %vm1029_vm2 = vcmp.eq.f32.partialorder %v1028_v59, 8.507059e+37  ;;  %v3900_v57 = vld [vmem:[#allocation2] sm:$0xff]  ;;  %v3904_v59 = vld [vmem:[#allocation2 + $0x8] sm:$0xff] }
 0xcc8   :  { %v1094_v37 = vpop.permute.xlu2 %1093  ;;  %v3165_v26 = vpop.eup %3164 }
 0xcc9   :  { %v1096_v10 = vmul.f32 %v1094_v37, %v1052_v25  ;;  %v1020_v15 = vmul.f32 %v3165_v26, %v1018_v52  ;;  %vm1025_vm10 = vweird.f32 %v3165_v26  ;;  %v2988_v52 = vld [vmem:[%s4558_s2 + $0xb8] sm:$0xff] }
 0xcca   :  { %vm1026_vm1 = vmor %vm1024_vm13, %vm1025_vm10 }
 0xccb   :  { %1110 = vrot.lane.b32.xlu2 %v1096_v10, %s3334_s18  ;;  %v1021_v16 = vsub.f32 1.0, %v1020_v15  ;;  %v2984_v15 = vld [vmem:[%s4558_s2 + $0x98] sm:$0xff] }
 0xccd   :  { %v1022_v31 = vmul.f32 %v3165_v26, %v1021_v16  ;;  %v2982_v16 = vld [vmem:[%s4558_s2 + $0x88] sm:$0xff] }
 0xccf   :  { %v1023_v43 = vadd.f32 %v3165_v26, %v1022_v31 }
 0xcd1   :  { %v1027_v61 = vsel %vm1026_vm1, %v3165_v26, %v1023_v43  ;;  %v2986_v26 = vld [vmem:[%s4558_s2 + $0xa8] sm:$0xff] }
 0xcd2   :  { %v1032_v47 = vsel %vm1029_vm2, %v1031_v62, %v1027_v61  ;;  %v3908_v62 = vld [vmem:[#allocation2 + $0x10] sm:$0xff] }
 0xcd3   :  { %1115 = vrot.lane.b32.xlu2 %v1090_v40, %s3335_s19  ;;  %v1059_v0 = vmul.f32 %v1057_v51, %v1032_v47 }
 0xd25   :  { %v1111_v18 = vpop.permute.xlu2 %1110 }
 0xd26   :  { %v3841_v1 = vsel %vm617_vm15, %v1111_v18, %v3782_v19  ;;  %v1121_v3 = vmul.f32 %v1111_v18, %v3664_v36 }
 0xd27   :  { %2974 = vmatmul.msk.f32.vlgmr.msra.gmra.mxu3 %vm42_vm0, %v3841_v1 }
 0xd28   :  { %1122 = vst.msk [vmem:[#allocation3 + $0x10] sm:$0xff] %vm42_vm0, %v1121_v3  ;;  %1648 = vmatpush.msra.mxu3 %v2988_v52  ;;  %v2983_v52 = vld [vmem:[%s4558_s2 + $0x90] sm:$0xff] }
 0xd2a   :  { %1649 = vmatpush.msra.mxu3 %v2986_v26 }
 0xd2c   :  { %1650 = vmatpush.msra.mxu3 %v2984_v15 }
 0xd2d   :  { %v1116_v44 = vpop.permute.xlu2 %1115 }
 0xd2e   :  { %v3856_v34 = vsel %vm617_vm15, %v1116_v44, %v3808_v49  ;;  %1651 = vmatpush.msra.mxu3 %v2982_v16 }
 0xd30   :  { %v1062_v63 = vpop.permute.xlu1 %1061 }
 0xd31   :  { %v1064_v19 = vmul.f32 %v1062_v63, %v1032_v47  ;;  %v3912_v63 = vld [vmem:[#allocation2 + $0x18] sm:$0xff] }
 0xd33   :  { %1066 = vrot.lane.b32.xlu1 %v1064_v19, %s3334_s18 }
 0xda5   :  { %v1067_v2 = vpop.permute.xlu1 %1066 }
 0xda6   :  { %v1069_v4 = vadd.f32 %v1067_v2, %v1059_v0  ;;  %v3916_v0 = vld [vmem:[#allocation2 + $0x20] sm:$0xff] }
 0xda8   :  { %3166 = vtanh.f32 %v1069_v4 }
 0xdaa   :  { %v1171_v5 = vpop.f32.mrf.mxu3 }
 0xdab   :  { %v1174_v8 = vadd.f32 %v1171_v5, %v3504_v35 }
 0xdad   :  { %3168 = vtanh.f32 %v1174_v8  ;;  %v2976_v56 = vmul.f32 -1.442695, %v1174_v8 }
 0xdae   :  { %v3167_v38 = vpop.eup %3166 }
 0xdaf   :  { %1072 = vrot.lane.b32.xlu0 %v3167_v38, %s3333_s0  ;;  %3170 = vpow2.f32 %v2976_v56 }
 0xdb3   :  { %v3169_v9 = vpop.eup %3168 }
 0xdb5   :  { %v3171_v17 = vpop.eup %3170 }
 0xdb6   :  { %v1198_v46 = vadd.f32 1.0, %v3171_v17 }
 0xdb7   :  { %1242 = vrot.lane.b32.xlu0 %v3169_v9, %s3333_s0 }
 0xdb8   :  { %3172 = vrcp.f32 %v1198_v46  ;;  %v1210_v55 = vand.u32 2147483648, %v1198_v46  ;;  %vm1204_vm4 = vweird.f32 %v1198_v46  ;;  %v1208_v25 = vand.u32 2147483647, %v1198_v46 }
 0xdba   :  { %v1211_v60 = vor.u32 1.1754944e-38, %v1210_v55  ;;  %vm1209_vm7 = vcmp.eq.f32.partialorder %v1208_v25, 8.507059e+37 }
 0xdbe   :  { %v3173_v50 = vpop.eup %3172 }
 0xdbf   :  { %1105 = vrot.lane.b32.xlu0 %v1069_v4, %s3335_s19  ;;  %v1200_v20 = vmul.f32 %v3173_v50, %v1198_v46  ;;  %vm1205_vm3 = vweird.f32 %v3173_v50 }
 0xdc0   :  { %vm1206_vm6 = vmor %vm1204_vm4, %vm1205_vm3 }
 0xdc1   :  { %v1201_v21 = vsub.f32 1.0, %v1200_v20 }
 0xdc3   :  { %v1202_v22 = vmul.f32 %v3173_v50, %v1201_v21 }
 0xdc5   :  { %v1203_v53 = vadd.f32 %v3173_v50, %v1202_v22 }
 0xdc7   :  { %v1207_v28 = vsel %vm1206_vm6, %v3173_v50, %v1203_v53 }
 0xdc8   :  { %v1212_v7 = vsel %vm1209_vm7, %v1211_v60, %v1207_v28 }
 0xe21   :  { %v1073_v23 = vpop.permute.xlu0 %1072 }
 0xe22   :  { %v1075_v35 = vmul.f32 %v1073_v23, %v1032_v47 }
 0xe24   :  { %1100 = vrot.lane.b32.xlu1 %v1075_v35, %s3334_s18 }
 0xe29   :  { %v1243_v33 = vpop.permute.xlu0 %1242 }
 0xe2a   :  { %v1245_v12 = vmul.f32 %v1243_v33, %v1212_v7 }
 0xe2c   :  { %1237 = vrot.lane.b32.xlu1 %v3856_v34, %s3334_s18  ;;  %1247 = vrot.lane.b32.xlu2 %v1245_v12, %s3334_s18 }
 0xe31   :  { %v1106_v11 = vpop.permute.xlu0 %1105 }
 0xe32   :  { %v3864_v40 = vsel %vm618_vm14, %v1106_v11, %v3816_v30 }
 0xe33   :  { %1216 = vrot.lane.b32.xlu0 %v3864_v40, %s3334_s18 }
 0xe86   :  { %v1248_v30 = vpop.permute.xlu2 %1247 }
 0xe96   :  { %v1101_v42 = vpop.permute.xlu1 %1100 }
 0xe97   :  { %v3871_v36 = vsel %vm618_vm14, %v1101_v42, %v3823_v32  ;;  %v1119_v49 = vmul.f32 %v1101_v42, %v3635_v24  ;;  %v102_v24 = vpop.f32.mrf.mxu0 }
 0xe98   :  { %2973 = vmatmul.msk.f32.vlgmr.msra.gmra.mxu2 %vm42_vm0, %v3871_v36  ;;  %v103_v32 = vadd.f32 %v102_v24, %v3499_v27 }
 0xe99   :  { %1120 = vst.msk [vmem:[#allocation2 + $0x28] sm:$0xff] %vm42_vm0, %v1119_v49 }
 0xe9e   :  { %v1238_v41 = vpop.permute.xlu1 %1237 }
 0xe9f   :  { %v1240_v39 = vmul.f32 %v1238_v41, %v1212_v7 }
 0xea0   :  { %v3920_v8 = vld [vmem:[#allocation2 + $0x28] sm:$0xff] }
 0xea1   :  { %v1250_v14 = vadd.f32 %v1248_v30, %v1240_v39 }
 0xea3   :  { %3174 = vtanh.f32 %v1250_v14 }
 0xea5   :  { %v1217_v20 = vpop.permute.xlu0 %1216 }
 0xea9   :  { %v3175_v45 = vpop.eup %3174 }
 0xeaa   :  { %1253 = vrot.lane.b32.xlu2 %v3175_v45, %s3333_s0 }
 0xf04   :  { %v1254_v6 = vpop.permute.xlu2 %1253 }
 0xf05   :  { %v1256_v37 = vmul.f32 %v1254_v6, %v1212_v7 }
 0xf07   :  { %1270 = vrot.lane.b32.xlu2 %v1256_v37, %s3334_s18 }
 0xf0f   :  { %1275 = vrot.lane.b32.xlu2 %v1250_v14, %s3335_s19 }
 0xf1b   :  { %v1146_v10 = vpop.f32.mrf.mxu2 }
 0xf1c   :  { %v1149_v58 = vadd.f32 %v1146_v10, %v103_v32  ;;  %v3938_v10 = vld [vmem:[%s4562_s1 + $0x30] sm:$0xff] }
 0xf1d   :  { %vm1257_vm1 = vcmp.gt.f32.partialorder %v3938_v10, 0.0 }
 0xf1e   :  { %3176 = vtanh.f32 %v1149_v58  ;;  %v2975_v43 = vmul.f32 -1.442695, %v1149_v58 }
 0xf20   :  { %3178 = vpow2.f32 %v2975_v43 }
 0xf24   :  { %v3177_v48 = vpop.eup %3176 }
 0xf25   :  { %1221 = vrot.lane.b32.xlu1 %v3177_v48, %s3333_s0 }
 0xf26   :  { %v3179_v61 = vpop.eup %3178 }
 0xf61   :  { %v1271_v18 = vpop.permute.xlu2 %1270 }
 0xf62   :  { %v1273_v31 = vsel %vm457_vm5, %v1271_v18, %v3841_v1  ;;  %v1281_v3 = vmul.f32 %v1271_v18, %v3598_v54  ;;  %v1178_v1 = vadd.f32 1.0, %v3179_v61  ;;  %v2987_v54 = vld [vmem:[%s4558_s2 + $0xb0] sm:$0xff] }
 0xf63   :  { %2978 = vmatmul.msk.f32.vlgmr.msrb.gmra.mxu3 %vm42_vm0, %v1273_v31  ;;  %1607 = vmatpush.msra.mxu2 %v2987_v54 }
 0xf64   :  { %1282 = vst.msk [vmem:[#allocation3 + $0x8] sm:$0xff] %vm42_vm0, %v1281_v3  ;;  %3180 = vrcp.f32 %v1178_v1  ;;  %v1190_v5 = vand.u32 2147483648, %v1178_v1  ;;  %vm1184_vm15 = vweird.f32 %v1178_v1  ;;  %v1188_v38 = vand.u32 2147483647, %v1178_v1 }
 0xf66   :  { %v1191_v56 = vor.u32 1.1754944e-38, %v1190_v5  ;;  %vm1189_vm9 = vcmp.eq.f32.partialorder %v1188_v38, 8.507059e+37  ;;  %v2992_v5 = vld [vmem:[%s4558_s2 + $0xd8] sm:$0xff]  ;;  %v2990_v38 = vld [vmem:[%s4558_s2 + $0xc8] sm:$0xff] }
 0xf69   :  { %v1276_v45 = vpop.permute.xlu2 %1275 }
 0xf6a   :  { %v3181_v47 = vpop.eup %3180  ;;  %v1278_v32 = vsel %vm457_vm5, %v1276_v45, %v3856_v34  ;;  %v2985_v34 = vld [vmem:[%s4558_s2 + $0xa0] sm:$0xff] }
 0xf6b   :  { %3022 = vmatmul.msk.f32.vlgmr.msra.gmra.mxu3 %vm42_vm0, %v3900_v57  ;;  %v1180_v19 = vmul.f32 %v3181_v47, %v1178_v1  ;;  %vm1185_vm14 = vweird.f32 %v3181_v47  ;;  %1608 = vmatpush.msra.mxu2 %v2985_v34 }
 0xf6c   :  { %vm1186_vm8 = vmor %vm1184_vm15, %vm1185_vm14 }
 0xf6d   :  { %v1181_v51 = vsub.f32 1.0, %v1180_v19  ;;  %1609 = vmatpush.msra.mxu2 %v2983_v52 }
 0xf6f   :  { %v1182_v2 = vmul.f32 %v3181_v47, %v1181_v51 }
 0xf71   :  { %v1183_v4 = vadd.f32 %v3181_v47, %v1182_v2  ;;  %v2993_v2 = vld [vmem:[%s4558_s2 + $0xe0] sm:$0xff] }
 0xf73   :  { %3023 = vmatmul.msk.f32.gmra.mxu3 %vm42_vm0, %v3904_v59  ;;  %v1187_v9 = vsel %vm1186_vm8, %v3181_v47, %v1183_v4  ;;  %v2991_v4 = vld [vmem:[%s4558_s2 + $0xd0] sm:$0xff] }
 0xf74   :  { %v1192_v17 = vsel %vm1189_vm9, %v1191_v56, %v1187_v9  ;;  %v4008_v9 = vld [vmem:[%s4562_s1] sm:$0xff] }
 0xf75   :  { %v1219_v21 = vmul.f32 %v1217_v20, %v1192_v17  ;;  %v1458_v20 = vld [vmem:[#allocation3 + $0x8] sm:$0xff] }
 0xf7b   :  { %3024 = vmatmul.msk.f32.gmra.mxu3 %vm42_vm0, %v3908_v62 }
 0xf83   :  { %3025 = vmatmul.msk.f32.gmra.mxu3 %vm42_vm0, %v3912_v63 }
 0xf8b   :  { %3026 = vmatmul.msk.f32.gmra.mxu3 %vm42_vm0, %v3916_v0 }
 0xf93   :  { %3027 = vmatmul.msk.f32.gmra.mxu3 %vm42_vm0, %v3920_v8 }
 0xf97   :  { %v1222_v46 = vpop.permute.xlu1 %1221 }
 0xf98   :  { %v1224_v50 = vmul.f32 %v1222_v46, %v1192_v17 }
 0xf9a   :  { %1226 = vrot.lane.b32.xlu1 %v1224_v50, %s3334_s18 }
 0xfe6   :  { %v1331_v35 = vpop.f32.mrf.mxu3 }
 0xfe7   :  { %v1334_v53 = vadd.f32 %v1331_v35, %v3501_v29 }
 0xfe9   :  { %v2980_v28 = vmul.f32 -1.442695, %v1334_v53 }
0x100c   :  { %v1227_v22 = vpop.permute.xlu1 %1226 }
0x100d   :  { %v1229_v23 = vadd.f32 %v1227_v22, %v1219_v21 }
0x100f   :  { %3182 = vtanh.f32 %v1229_v23 }
0x1010   :  { %3184 = vtanh.f32 %v1334_v53  ;;  %v1460_v53 = vld [vmem:[#allocation3 + $0x18] sm:$0xff] }
0x1011   :  { %3186 = vpow2.f32 %v2980_v28  ;;  %v4028_v28 = vld [vmem:[%s4559_s3 + $0x50] sm:$0xff] }
0x1015   :  { %v3183_v55 = vpop.eup %3182 }
0x1016   :  { %1232 = vrot.lane.b32.xlu0 %v3183_v55, %s3333_s0  ;;  %v3185_v25 = vpop.eup %3184 }
0x1017   :  { %v3187_v60 = vpop.eup %3186 }
0x1018   :  { %v1358_v44 = vadd.f32 1.0, %v3187_v60  ;;  %v4035_v60 = vld [vmem:[%s4559_s3 + $0x48] sm:$0xff] }
0x101a   :  { %3188 = vrcp.f32 %v1358_v44  ;;  %v1370_v41 = vand.u32 2147483648, %v1358_v44  ;;  %vm1364_vm11 = vweird.f32 %v1358_v44  ;;  %v1368_v39 = vand.u32 2147483647, %v1358_v44 }
0x101c   :  { %v1371_v14 = vor.u32 1.1754944e-38, %v1370_v41  ;;  %vm1369_vm13 = vcmp.eq.f32.partialorder %v1368_v39, 8.507059e+37 }
0x101e   :  { %1402 = vrot.lane.b32.xlu0 %v3185_v25, %s3333_s0  ;;  %v4023_v25 = vld [vmem:[%s4559_s3 + $0x58] sm:$0xff] }
0x1020   :  { %v3189_v7 = vpop.eup %3188 }
0x1021   :  { %v1360_v33 = vmul.f32 %v3189_v7, %v1358_v44  ;;  %vm1365_vm12 = vweird.f32 %v3189_v7 }
0x1022   :  { %vm1366_vm10 = vmor %vm1364_vm11, %vm1365_vm12 }
0x1023   :  { %v1361_v12 = vsub.f32 1.0, %v1360_v33  ;;  %v1461_v33 = vld [vmem:[#allocation3 + $0x20] sm:$0xff] }
0x1025   :  { %v1362_v11 = vmul.f32 %v3189_v7, %v1361_v12 }
0x1026   :  { %1265 = vrot.lane.b32.xlu0 %v1229_v23, %s3335_s19  ;;  %v1459_v23 = vld [vmem:[#allocation3 + $0x10] sm:$0xff] }
0x1027   :  { %v1363_v49 = vadd.f32 %v3189_v7, %v1362_v11 }
0x1029   :  { %v1367_v30 = vsel %vm1366_vm10, %v3189_v7, %v1363_v49  ;;  %v4042_v7 = vld [vmem:[%s4559_s3 + $0x40] sm:$0xff]  ;;  %v1462_v49 = vld [vmem:[#allocation3 + $0x28] sm:$0xff]  ;;  %vm1844_vm10 = vcmp.gt.f32.partialorder %v4008_v9, 0.0 }
0x102a   :  { %v1372_v6 = vsel %vm1369_vm13, %v1371_v14, %v1367_v30 }
0x1088   :  { %v1233_v42 = vpop.permute.xlu0 %1232 }
0x1089   :  { %v1235_v29 = vmul.f32 %v1233_v42, %v1192_v17 }
0x108b   :  { %1260 = vrot.lane.b32.xlu1 %v1235_v29, %s3334_s18 }
0x1090   :  { %v1403_v37 = vpop.permute.xlu0 %1402 }
0x1091   :  { %v1405_v24 = vmul.f32 %v1403_v37, %v1372_v6  ;;  %v1464_v37 = vld [vmem:[#allocation3 + $0x38] sm:$0xff] }
0x1093   :  { %1397 = vrot.lane.b32.xlu1 %v1278_v32, %s3334_s18  ;;  %1407 = vrot.lane.b32.xlu2 %v1405_v24, %s3334_s18 }
0x1098   :  { %v1266_v58 = vpop.permute.xlu0 %1265 }
0x1099   :  { %v1268_v48 = vsel %vm1257_vm1, %v1266_v58, %v3864_v40  ;;  %v2981_v40 = vld [vmem:[%s4558_s2 + $0x80] sm:$0xff] }
0x109a   :  { %1376 = vrot.lane.b32.xlu0 %v1268_v48, %s3334_s18  ;;  %1610 = vmatpush.msra.mxu2 %v2981_v40 }
0x10ed   :  { %v1408_v3 = vpop.permute.xlu2 %1407 }
0x10fd   :  { %v1261_v26 = vpop.permute.xlu1 %1260 }
0x10fe   :  { %v1263_v15 = vsel %vm1257_vm1, %v1261_v26, %v3871_v36  ;;  %v1279_v16 = vmul.f32 %v1261_v26, %v3938_v10 }
0x10ff   :  { %2977 = vmatmul.msk.f32.vlgmr.msrb.gmra.mxu2 %vm42_vm0, %v1263_v15 }
0x1100   :  { %1280 = vst.msk [vmem:[#allocation2 + $0x30] sm:$0xff] %vm42_vm0, %v1279_v16  ;;  %1884 = vmatpush.msrb.mxu2 %v4023_v25 }
0x1102   :  { %1885 = vmatpush.msrb.mxu2 %v4028_v28 }
0x1104   :  { %1886 = vmatpush.msrb.mxu2 %v4035_v60 }
0x1105   :  { %v1398_v18 = vpop.permute.xlu1 %1397 }
0x1106   :  { %v1400_v31 = vmul.f32 %v1398_v18, %v1372_v6  ;;  %1887 = vmatpush.msrb.mxu2 %v4042_v7 }
0x1107   :  { %3014 = vmatmul.msk.f32.vlgmr.msra.gmra.mxu2 %vm42_vm0, %v3900_v57  ;;  %v1455_v43 = vld [vmem:[#allocation2 + $0x30] sm:$0xff] }
0x1108   :  { %v1410_v61 = vadd.f32 %v1408_v3, %v1400_v31  ;;  %3028 = vmatmul.msk.f32.gmra.mxu3 %vm42_vm0, %v1455_v43  ;;  %2196 = vmatpush.msra.mxu2 %v4023_v25  ;;  %v4088_v3 = vld [vmem:[%s4561_s4 + $0x2] sm:$0x3] }
0x110a   :  { %3190 = vtanh.f32 %v1410_v61  ;;  %2197 = vmatpush.msra.mxu2 %v4028_v28 }
0x110c   :  { %2198 = vmatpush.msra.mxu2 %v4035_v60  ;;  %v1377_v34 = vpop.permute.xlu0 %1376 }
0x110e   :  { %2199 = vmatpush.msra.mxu2 %v4042_v7 }
0x110f   :  { %3015 = vmatmul.msk.f32.gmra.mxu2 %vm42_vm0, %v3904_v59  ;;  %v105_v59 = vpop.f32.mrf.mxu0 }
0x1110   :  { %v3191_v36 = vpop.eup %3190  ;;  %v106_v47 = vadd.f32 %v105_v59, %v3499_v27  ;;  %v2994_v27 = vld [vmem:[%s4558_s2 + $0xe8] sm:$0xff] }
0x1111   :  { %1413 = vrot.lane.b32.xlu2 %v3191_v36, %s3333_s0  ;;  %v4091_v36 = vperm.slane %v4088_v3, 0 }
0x1117   :  { %3016 = vmatmul.msk.f32.gmra.mxu2 %vm42_vm0, %v3908_v62 }
0x111f   :  { %3017 = vmatmul.msk.f32.gmra.mxu2 %vm42_vm0, %v3912_v63  ;;  %v2995_v63 = vld [vmem:[%s4558_s2 + $0xf0] sm:$0xff] }
0x1120   :  { %1501 = vmatpush.msrb.mxu0 %v2995_v63  ;;  %v4110_v63 = vld [vmem:[%s4559_s3 + $0x68] sm:$0xff] }
0x1122   :  { %1502 = vmatpush.msrb.mxu0 %v2993_v2  ;;  %v4120_v2 = vld [vmem:[%s4559_s3 + $0x60] sm:$0xff] }
0x1124   :  { %1503 = vmatpush.msrb.mxu0 %v2991_v4 }
0x1127   :  { %3018 = vmatmul.msk.f32.gmra.mxu2 %vm42_vm0, %v3916_v0  ;;  %v2996_v0 = vld [vmem:[%s4558_s2 + $0xf8] sm:$0xff] }
0x1128   :  { %1542 = vmatpush.msrb.mxu1 %v2996_v0 }
0x112a   :  { %1543 = vmatpush.msrb.mxu1 %v2994_v27 }
0x112c   :  { %1544 = vmatpush.msrb.mxu1 %v2992_v5 }
0x112e   :  { %1545 = vmatpush.msrb.mxu1 %v2990_v38  ;;  %v4148_v38 = vpop.f32.mrf.mxu3 }
0x112f   :  { %3019 = vmatmul.msk.f32.gmra.mxu2 %vm42_vm0, %v3920_v8  ;;  %v2989_v8 = vld [vmem:[%s4558_s2 + $0xc0] sm:$0xff] }
0x1130   :  { %1504 = vmatpush.msrb.mxu0 %v2989_v8 }
0x1132   :  { %1739 = vmatpush.msra.mxu0 %v4023_v25 }
0x1134   :  { %1740 = vmatpush.msra.mxu0 %v4028_v28 }
0x1136   :  { %1741 = vmatpush.msra.mxu0 %v4035_v60 }
0x1137   :  { %3020 = vmatmul.msk.f32.gmra.mxu2 %vm42_vm0, %v1455_v43 }
0x1138   :  { %1742 = vmatpush.msra.mxu0 %v4042_v7 }
0x116b   :  { %v1414_v57 = vpop.permute.xlu2 %1413 }
0x116c   :  { %v1416_v1 = vmul.f32 %v1414_v57, %v1372_v6  ;;  %v1463_v6 = vld [vmem:[#allocation3 + $0x30] sm:$0xff] }
0x116e   :  { %1424 = vrot.lane.b32.xlu2 %v1416_v1, %s3334_s18 }
0x1182   :  { %v1306_v19 = vpop.f32.mrf.mxu2 }
0x1183   :  { %v1309_v62 = vadd.f32 %v1306_v19, %v106_v47  ;;  %v4098_v19 = vld [vmem:[%s4559_s3 + $0x78] sm:$0xff] }
0x1184   :  { %1761 = vmatpush.msra.mxu1 %v4098_v19  ;;  %1909 = vmatpush.msrb.mxu3 %v4098_v19 }
0x1185   :  { %3192 = vtanh.f32 %v1309_v62  ;;  %v2979_v46 = vmul.f32 -1.442695, %v1309_v62  ;;  %v4103_v62 = vld [vmem:[%s4559_s3 + $0x70] sm:$0xff] }
0x1186   :  { %1762 = vmatpush.msra.mxu1 %v4103_v62  ;;  %1910 = vmatpush.msrb.mxu3 %v4103_v62 }
0x1187   :  { %3194 = vpow2.f32 %v2979_v46 }
0x1188   :  { %1763 = vmatpush.msra.mxu1 %v4110_v63  ;;  %1911 = vmatpush.msrb.mxu3 %v4110_v63 }
0x118a   :  { %v1612_v43 = vpop.f32.mrf.mxu2  ;;  %1764 = vmatpush.msra.mxu1 %v4120_v2  ;;  %1912 = vmatpush.msrb.mxu3 %v4120_v2 }
0x118b   :  { %v3193_v51 = vpop.eup %3192 }
0x118c   :  { %1381 = vrot.lane.b32.xlu1 %v3193_v51, %s3333_s0  ;;  %2221 = vmatpush.msra.mxu3 %v4098_v19 }
0x118d   :  { %v3195_v21 = vpop.eup %3194 }
0x118e   :  { %v1338_v22 = vadd.f32 1.0, %v3195_v21  ;;  %2222 = vmatpush.msra.mxu3 %v4103_v62 }
0x1190   :  { %3196 = vrcp.f32 %v1338_v22  ;;  %v1350_v42 = vand.u32 2147483648, %v1338_v22  ;;  %vm1344_vm2 = vweird.f32 %v1338_v22  ;;  %v1348_v29 = vand.u32 2147483647, %v1338_v22  ;;  %2223 = vmatpush.msra.mxu3 %v4110_v63 }
0x1192   :  { %v1351_v39 = vor.u32 1.1754944e-38, %v1350_v42  ;;  %vm1349_vm4 = vcmp.eq.f32.partialorder %v1348_v29, 8.507059e+37  ;;  %2224 = vmatpush.msra.mxu3 %v4120_v2 }
0x1196   :  { %v3197_v35 = vpop.eup %3196 }
0x1197   :  { %v1340_v55 = vmul.f32 %v3197_v35, %v1338_v22  ;;  %vm1345_vm5 = vweird.f32 %v3197_v35 }
0x1198   :  { %vm1346_vm3 = vmor %vm1344_vm2, %vm1345_vm5 }
0x1199   :  { %v1341_v44 = vsub.f32 1.0, %v1340_v55 }
0x119b   :  { %v1342_v12 = vmul.f32 %v3197_v35, %v1341_v44 }
0x119d   :  { %v1343_v11 = vadd.f32 %v3197_v35, %v1342_v12 }
0x119f   :  { %v1347_v41 = vsel %vm1346_vm3, %v3197_v35, %v1343_v11 }
0x11a0   :  { %v1352_v30 = vsel %vm1349_vm4, %v1351_v39, %v1347_v41 }
0x11a1   :  { %v1379_v52 = vmul.f32 %v1377_v34, %v1352_v30 }
0x11c8   :  { %v1425_v56 = vpop.permute.xlu2 %1424 }
0x11c9   :  { %v1427_v17 = vmul.f32 %v1425_v56, %v4008_v9 }
0x11cb   :  { %1428 = vst.msk [vmem:[#allocation3] sm:$0xff] %vm42_vm0, %v1427_v17  ;;  %v4152_v17 = vpop.f32.mrf.mxu3 }
0x11d2   :  { %v1457_v50 = vld [vmem:[#allocation3] sm:$0xff] }
0x11d3   :  { %2998 = vmatmul.msk.f32.vlgmr.msrb.gmra.mxu0 %vm42_vm0, %v1457_v50  ;;  %3006 = vmatmul.msk.f32.vlgmr.msrb.gmra.mxu1 %vm42_vm0, %v1457_v50  ;;  %v4156_v50 = vpop.f32.mrf.mxu3 }
0x11d4   :  { %2040 = vmatpush.msrb.mxu0 %v4023_v25  ;;  %2065 = vmatpush.msrb.mxu1 %v4098_v19 }
0x11d6   :  { %2041 = vmatpush.msrb.mxu0 %v4028_v28  ;;  %2066 = vmatpush.msrb.mxu1 %v4103_v62 }
0x11d8   :  { %2042 = vmatpush.msrb.mxu0 %v4035_v60  ;;  %2067 = vmatpush.msrb.mxu1 %v4110_v63 }
0x11da   :  { %2043 = vmatpush.msrb.mxu0 %v4042_v7  ;;  %2068 = vmatpush.msrb.mxu1 %v4120_v2 }
0x11db   :  { %2999 = vmatmul.msk.f32.gmra.mxu0 %vm42_vm0, %v1458_v20  ;;  %3007 = vmatmul.msk.f32.gmra.mxu1 %vm42_vm0, %v1458_v20  ;;  %v4160_v21 = vpop.f32.mrf.mxu3 }
0x11e3   :  { %3000 = vmatmul.msk.f32.gmra.mxu0 %vm42_vm0, %v1459_v23  ;;  %3008 = vmatmul.msk.f32.gmra.mxu1 %vm42_vm0, %v1459_v23  ;;  %v4164_v23 = vpop.f32.mrf.mxu3 }
0x11eb   :  { %3001 = vmatmul.msk.f32.gmra.mxu0 %vm42_vm0, %v1460_v53  ;;  %3009 = vmatmul.msk.f32.gmra.mxu1 %vm42_vm0, %v1460_v53  ;;  %v4168_v44 = vpop.f32.mrf.mxu3 }
0x11f3   :  { %3002 = vmatmul.msk.f32.gmra.mxu0 %vm42_vm0, %v1461_v33  ;;  %3010 = vmatmul.msk.f32.gmra.mxu1 %vm42_vm0, %v1461_v33  ;;  %v4172_v11 = vpop.f32.mrf.mxu3 }
0x11fb   :  { %3003 = vmatmul.msk.f32.gmra.mxu0 %vm42_vm0, %v1462_v49  ;;  %3011 = vmatmul.msk.f32.gmra.mxu1 %vm42_vm0, %v1462_v49 }
0x11fe   :  { %v1382_v14 = vpop.permute.xlu1 %1381 }
0x11ff   :  { %v1384_v45 = vmul.f32 %v1382_v14, %v1352_v30 }
0x1201   :  { %1386 = vrot.lane.b32.xlu1 %v1384_v45, %s3334_s18 }
0x1203   :  { %3004 = vmatmul.msk.f32.gmra.mxu0 %vm42_vm0, %v1463_v6  ;;  %3012 = vmatmul.msk.f32.gmra.mxu1 %vm42_vm0, %v1463_v6 }
0x120b   :  { %3005 = vmatmul.msk.f32.gmra.mxu0 %vm42_vm0, %v1464_v37  ;;  %3013 = vmatmul.msk.f32.gmra.mxu1 %vm42_vm0, %v1464_v37 }
0x1213   :  { %1743 = vmatmul.f32.vlgmr.msra.gmra.mxu0 %v3332_v13  ;;  %1765 = vmatmul.f32.vlgmr.msra.gmra.mxu1 %v3332_v13  ;;  %v4140_v13 = vld [vmem:[%s4562_s1 + $0x38] sm:$0xff] }
0x1214   :  { %2350 = vmatpush.msra.mxu0 %v4023_v25  ;;  %2375 = vmatpush.msra.mxu1 %v4098_v19  ;;  %vm4564_vm13 = vcmp.gt.f32.partialorder %v4140_v13, 0.0 }
0x1216   :  { %2351 = vmatpush.msra.mxu0 %v4028_v28  ;;  %2376 = vmatpush.msra.mxu1 %v4103_v62 }
0x1218   :  { %2352 = vmatpush.msra.mxu0 %v4035_v60  ;;  %2377 = vmatpush.msra.mxu1 %v4110_v63 }
0x121a   :  { %2353 = vmatpush.msra.mxu0 %v4042_v7  ;;  %2378 = vmatpush.msra.mxu1 %v4120_v2 }
0x1250   :  { %v1506_v24 = vpop.f32.mrf.mxu0  ;;  %v4146_v8 = vpop.f32.mrf.mxu1 }
0x1251   :  { %v1613_v61 = vadd.f32 %v1612_v43, %v1506_v24 }
0x1253   :  { %v1682_v57 = vadd.f32 %v4091_v36, %v1613_v61 }
0x1258   :  { %v4070_v32 = vpop.f32.mrf.mxu0  ;;  %v4150_v56 = vpop.f32.mrf.mxu1 }
0x1260   :  { %v4072_v58 = vpop.f32.mrf.mxu0  ;;  %v4154_v46 = vpop.f32.mrf.mxu1 }
0x1268   :  { %v4074_v48 = vpop.f32.mrf.mxu0  ;;  %v4158_v20 = vpop.f32.mrf.mxu1 }
0x1270   :  { %v4076_v54 = vpop.f32.mrf.mxu0  ;;  %v4162_v22 = vpop.f32.mrf.mxu1 }
0x1273   :  { %v1387_v40 = vpop.permute.xlu1 %1386 }
0x1274   :  { %v1389_v26 = vadd.f32 %v1387_v40, %v1379_v52 }
0x1276   :  { %3198 = vtanh.f32 %v1389_v26 }
0x1278   :  { %v4078_v15 = vpop.f32.mrf.mxu0  ;;  %v4166_v35 = vpop.f32.mrf.mxu1 }
0x127c   :  { %v3199_v16 = vpop.eup %3198 }
0x127d   :  { %1392 = vrot.lane.b32.xlu0 %v3199_v16, %s3333_s0 }
0x1280   :  { %v4081_v18 = vpop.f32.mrf.mxu0  ;;  %v4170_v33 = vpop.f32.mrf.mxu1 }
0x1288   :  { %v4083_v31 = vpop.f32.mrf.mxu0  ;;  %v1568_v42 = vpop.f32.mrf.mxu1 }
0x1290   :  { %v1744_v1 = vpop.f32.mrf.mxu0  ;;  %v1766_v14 = vpop.f32.mrf.mxu1 }
0x1291   :  { %v1747_v59 = vadd.f32 %v1744_v1, %v1682_v57 }
0x1293   :  { %3200 = vtanh.f32 %v1747_v59  ;;  %v3038_v53 = vmul.f32 -1.442695, %v1747_v59 }
0x1295   :  { %3202 = vpow2.f32 %v3038_v53 }
0x1299   :  { %v3201_v47 = vpop.eup %3200 }
0x129a   :  { %1812 = vrot.lane.b32.xlu0 %v3201_v47, %s3333_s0 }
0x129b   :  { %v3203_v55 = vpop.eup %3202 }
0x129c   :  { %v1773_v12 = vadd.f32 1.0, %v3203_v55 }
0x129e   :  { %3204 = vrcp.f32 %v1773_v12  ;;  %v1785_v40 = vand.u32 2147483648, %v1773_v12  ;;  %vm1779_vm7 = vweird.f32 %v1773_v12  ;;  %v1783_v26 = vand.u32 2147483647, %v1773_v12 }
0x12a0   :  { %v1786_v43 = vor.u32 1.1754944e-38, %v1785_v40  ;;  %vm1784_vm15 = vcmp.eq.f32.partialorder %v1783_v26, 8.507059e+37 }
0x12a4   :  { %v3205_v29 = vpop.eup %3204 }
0x12a5   :  { %v1775_v49 = vmul.f32 %v3205_v29, %v1773_v12  ;;  %vm1780_vm6 = vweird.f32 %v3205_v29 }
0x12a6   :  { %vm1781_vm14 = vmor %vm1779_vm7, %vm1780_vm6 }
0x12a7   :  { %v1776_v6 = vsub.f32 1.0, %v1775_v49 }
0x12a9   :  { %v1777_v24 = vmul.f32 %v3205_v29, %v1776_v6 }
0x12ab   :  { %v1778_v34 = vadd.f32 %v3205_v29, %v1777_v24 }
0x12ad   :  { %v1782_v16 = vsel %vm1781_vm14, %v3205_v29, %v1778_v34 }
0x12ae   :  { %v1787_v61 = vsel %vm1784_vm15, %v1786_v43, %v1782_v16 }
0x12ef   :  { %v1393_v51 = vpop.permute.xlu0 %1392 }
0x12f0   :  { %v1395_v0 = vmul.f32 %v1393_v51, %v1352_v30  ;;  %v4175_v30 = vperm.slane %v4088_v3, 1 }
0x12f2   :  { %1418 = vrot.lane.b32.xlu1 %v1395_v0, %s3334_s18 }
0x130c   :  { %v1813_v3 = vpop.permute.xlu0 %1812 }
0x130d   :  { %v1815_v57 = vmul.f32 %v1813_v3, %v1787_v61 }
0x1364   :  { %v1419_v27 = vpop.permute.xlu1 %1418 }
0x1365   :  { %v1421_v4 = vmul.f32 %v1419_v27, %v4140_v13 }
0x1367   :  { %1422 = vst.msk [vmem:[#allocation2 + $0x38] sm:$0xff] %vm42_vm0, %v1421_v4 }
0x136e   :  { %v1456_v5 = vld [vmem:[#allocation2 + $0x38] sm:$0xff] }
0x136f   :  { %3021 = vmatmul.msk.f32.gmra.mxu2 %vm42_vm0, %v1456_v5  ;;  %3029 = vmatmul.msk.f32.gmra.mxu3 %vm42_vm0, %v1456_v5 }
0x13f2   :  { %v1674_v41 = vpop.f32.mrf.mxu3 }
0x13f3   :  { %v1675_v39 = vadd.f32 %v1674_v41, %v1568_v42 }
0x13f5   :  { %v1697_v45 = vadd.f32 %v4175_v30, %v1675_v39  ;;  %v1810_v39 = vmul.f32 0.0, %v1787_v61 }
0x13f7   :  { %v1769_v37 = vadd.f32 %v1766_v14, %v1697_v45 }
0x13f9   :  { %3206 = vtanh.f32 %v1769_v37  ;;  %v3039_v1 = vmul.f32 -1.442695, %v1769_v37 }
0x13fb   :  { %3208 = vpow2.f32 %v3039_v1 }
0x13ff   :  { %v3207_v52 = vpop.eup %3206 }
0x1400   :  { %1829 = vrot.lane.b32.xlu2 %v3207_v52, %s3333_s0 }
0x1401   :  { %v3209_v59 = vpop.eup %3208 }
0x1402   :  { %v1793_v47 = vadd.f32 1.0, %v3209_v59 }
0x1404   :  { %3210 = vrcp.f32 %v1793_v47  ;;  %v1805_v53 = vand.u32 2147483648, %v1793_v47  ;;  %vm1799_vm9 = vweird.f32 %v1793_v47  ;;  %v1803_v55 = vand.u32 2147483647, %v1793_v47 }
0x1406   :  { %v1806_v42 = vor.u32 1.1754944e-38, %v1805_v53  ;;  %vm1804_vm11 = vcmp.eq.f32.partialorder %v1803_v55, 8.507059e+37 }
0x1408   :  { %1817 = vrot.lane.b32.xlu2 %v1815_v57, %s3334_s18 }
0x140a   :  { %v3211_v51 = vpop.eup %3210 }
0x140b   :  { %v1795_v0 = vmul.f32 %v3211_v51, %v1793_v47  ;;  %vm1800_vm8 = vweird.f32 %v3211_v51 }
0x140c   :  { %vm1801_vm12 = vmor %vm1799_vm9, %vm1800_vm8 }
0x140d   :  { %v1796_v27 = vsub.f32 1.0, %v1795_v0 }
0x140f   :  { %v1797_v4 = vmul.f32 %v3211_v51, %v1796_v27 }
0x1411   :  { %v1798_v5 = vadd.f32 %v3211_v51, %v1797_v4 }
0x1413   :  { %v1802_v12 = vsel %vm1801_vm12, %v3211_v51, %v1798_v5 }
0x1414   :  { %v1807_v49 = vsel %vm1804_vm11, %v1806_v42, %v1802_v12 }
0x1415   :  { %v1827_v37 = vmul.f32 0.0, %v1807_v49 }
0x145a   :  { %v1830_v29 = vpop.permute.xlu2 %1829 }
0x145b   :  { %v1832_v41 = vmul.f32 %v1830_v29, %v1807_v49 }
0x145d   :  { %1834 = vrot.lane.b32.xlu1 %v1832_v41, %s3334_s18 }
0x1462   :  { %v1818_v14 = vpop.permute.xlu2 %1817 }
0x1463   :  { %v1820_v45 = vadd.f32 %v1818_v14, %v1810_v39 }
0x1465   :  { %3212 = vtanh.f32 %v1820_v45 }
0x146b   :  { %v3213_v6 = vpop.eup %3212 }
0x146c   :  { %1823 = vrot.lane.b32.xlu1 %v3213_v6, %s3333_s0 }
0x14cf   :  { %v1835_v24 = vpop.permute.xlu1 %1834 }
0x14d0   :  { %v1837_v34 = vadd.f32 %v1835_v24, %v1827_v37 }
0x14d2   :  { %3214 = vtanh.f32 %v1837_v34  ;;  %1862 = vrot.lane.b32.xlu1 %v1837_v34, %s3335_s19 }
0x14d8   :  { %v3215_v52 = vpop.eup %3214 }
0x14d9   :  { %1840 = vrot.lane.b32.xlu0 %v3215_v52, %s3333_s0 }
0x14de   :  { %v1824_v40 = vpop.permute.xlu1 %1823 }
0x14df   :  { %v1826_v26 = vmul.f32 %v1824_v40, %v1787_v61  ;;  %v1615_v61 = vpop.f32.mrf.mxu2 }
0x14e0   :  { %v1616_v53 = vadd.f32 %v1615_v61, %v4070_v32  ;;  %v1672_v32 = vadd.f32 %v4172_v11, %v4170_v33 }
0x14e1   :  { %1847 = vrot.lane.b32.xlu0 %v1826_v26, %s3334_s18 }
0x14e2   :  { %v1684_v55 = vadd.f32 %v4091_v36, %v1616_v53  ;;  %v1695_v14 = vadd.f32 %v4175_v30, %v1672_v32 }
0x14e7   :  { %v4198_v1 = vpop.f32.mrf.mxu2 }
0x14e9   :  { %1852 = vrot.lane.b32.xlu0 %v1820_v45, %s3335_s19 }
0x14ef   :  { %v4205_v51 = vpop.f32.mrf.mxu2 }
0x14f7   :  { %v4213_v0 = vpop.f32.mrf.mxu2 }
0x14ff   :  { %v4215_v27 = vpop.f32.mrf.mxu2 }
0x1507   :  { %v4217_v4 = vpop.f32.mrf.mxu2 }
0x150f   :  { %v4219_v5 = vpop.f32.mrf.mxu2 }
0x1544   :  { %v1863_v52 = vpop.permute.xlu1 %1862 }
0x1545   :  { %v4236_v26 = vsel %vm4564_vm13, %v1863_v52, 0.0 }
0x154b   :  { %v1841_v16 = vpop.permute.xlu0 %1840 }
0x154c   :  { %v1843_v43 = vmul.f32 %v1841_v16, %v1807_v49 }
0x154e   :  { %1857 = vrot.lane.b32.xlu2 %v1843_v43, %s3334_s18 }
0x1553   :  { %v1848_v3 = vpop.permute.xlu0 %1847 }
0x1554   :  { %v4190_v57 = vsel %vm1844_vm10, %v1848_v3, 0.0 }
0x1555   :  { %3040 = vmatmul.msk.f32.vlgmr.msrb.gmra.mxu2 %vm42_vm0, %v4190_v57 }
0x1556   :  { %2502 = vmatpush.msrb.mxu2 %v4023_v25 }
0x1558   :  { %2503 = vmatpush.msrb.mxu2 %v4028_v28 }
0x155a   :  { %2504 = vmatpush.msrb.mxu2 %v4035_v60 }
0x155b   :  { %v1853_v49 = vpop.permute.xlu0 %1852 }
0x155c   :  { %2505 = vmatpush.msrb.mxu2 %v4042_v7  ;;  %v4226_v41 = vsel %vm1844_vm10, %v1853_v49, 0.0 }
0x15a8   :  { %v1858_v59 = vpop.permute.xlu2 %1857 }
0x15a9   :  { %v4203_v47 = vsel %vm4564_vm13, %v1858_v59, 0.0 }
0x15aa   :  { %3041 = vmatmul.msk.f32.vlgmr.msrb.gmra.mxu3 %vm42_vm0, %v4203_v47 }
0x15ab   :  { %2527 = vmatpush.msrb.mxu3 %v4098_v19 }
0x15ad   :  { %2528 = vmatpush.msrb.mxu3 %v4103_v62 }
0x15af   :  { %2529 = vmatpush.msrb.mxu3 %v4110_v63 }
0x15b1   :  { %2530 = vmatpush.msrb.mxu3 %v4120_v2 }
0x15d8   :  { %v1889_v12 = vpop.f32.mrf.mxu2 }
0x15d9   :  { %v1892_v42 = vadd.f32 %v1889_v12, %v1684_v55 }
0x15db   :  { %3216 = vtanh.f32 %v1892_v42  ;;  %v3042_v39 = vmul.f32 -1.442695, %v1892_v42 }
0x15dd   :  { %3218 = vpow2.f32 %v3042_v39 }
0x15e1   :  { %v3217_v29 = vpop.eup %3216 }
0x15e2   :  { %1964 = vrot.lane.b32.xlu1 %v3217_v29, %s3333_s0 }
0x15e3   :  { %v3219_v37 = vpop.eup %3218 }
0x15e4   :  { %v1921_v24 = vadd.f32 1.0, %v3219_v37 }
0x15e6   :  { %v1933_v3 = vand.u32 2147483648, %v1921_v24  ;;  %vm1927_vm2 = vweird.f32 %v1921_v24  ;;  %v1931_v61 = vand.u32 2147483647, %v1921_v24 }
0x15e8   :  { %v1934_v53 = vor.u32 1.1754944e-38, %v1933_v3  ;;  %vm1932_vm4 = vcmp.eq.f32.partialorder %v1931_v61, 8.507059e+37 }
0x15ea   :  { %1959 = vrot.lane.b32.xlu1 %v4226_v41, %s3334_s18 }
0x162d   :  { %v1914_v45 = vpop.f32.mrf.mxu3 }
0x162e   :  { %v1917_v6 = vadd.f32 %v1914_v45, %v1695_v14 }
0x1630   :  { %3220 = vtanh.f32 %v1917_v6  ;;  %v3043_v29 = vmul.f32 -1.442695, %v1917_v6 }
0x1631   :  { %3222 = vrcp.f32 %v1921_v24 }
0x1632   :  { %3224 = vpow2.f32 %v3043_v29 }
0x1636   :  { %v3221_v34 = vpop.eup %3220 }
0x1637   :  { %1985 = vrot.lane.b32.xlu2 %v3221_v34, %s3333_s0  ;;  %v3223_v40 = vpop.eup %3222 }
0x1638   :  { %v1923_v33 = vmul.f32 %v3223_v40, %v1921_v24  ;;  %vm1928_vm5 = vweird.f32 %v3223_v40  ;;  %v3225_v49 = vpop.eup %3224 }
0x1639   :  { %vm1929_vm3 = vmor %vm1927_vm2, %vm1928_vm5  ;;  %v1941_v39 = vadd.f32 1.0, %v3225_v49 }
0x163a   :  { %v1924_v11 = vsub.f32 1.0, %v1923_v33 }
0x163b   :  { %3226 = vrcp.f32 %v1941_v39  ;;  %v1953_v24 = vand.u32 2147483648, %v1941_v39  ;;  %vm1947_vm7 = vweird.f32 %v1941_v39  ;;  %v1951_v52 = vand.u32 2147483647, %v1941_v39 }
0x163c   :  { %v1925_v16 = vmul.f32 %v3223_v40, %v1924_v11 }
0x163d   :  { %v1954_v33 = vor.u32 1.1754944e-38, %v1953_v24  ;;  %vm1952_vm15 = vcmp.eq.f32.partialorder %v1951_v52, 8.507059e+37 }
0x163e   :  { %v1926_v43 = vadd.f32 %v3223_v40, %v1925_v16 }
0x163f   :  { %1980 = vrot.lane.b32.xlu2 %v4236_v26, %s3334_s18 }
0x1640   :  { %v1930_v59 = vsel %vm1929_vm3, %v3223_v40, %v1926_v43 }
0x1641   :  { %v1935_v12 = vsel %vm1932_vm4, %v1934_v53, %v1930_v59  ;;  %v3227_v32 = vpop.eup %3226 }
0x1642   :  { %v1943_v14 = vmul.f32 %v3227_v32, %v1941_v39  ;;  %vm1948_vm6 = vweird.f32 %v3227_v32 }
0x1643   :  { %vm1949_vm14 = vmor %vm1947_vm7, %vm1948_vm6 }
0x1644   :  { %v1944_v45 = vsub.f32 1.0, %v1943_v14 }
0x1646   :  { %v1945_v37 = vmul.f32 %v3227_v32, %v1944_v45 }
0x1648   :  { %v1946_v34 = vadd.f32 %v3227_v32, %v1945_v37 }
0x164a   :  { %v1950_v40 = vsel %vm1949_vm14, %v3227_v32, %v1946_v34  ;;  %v4251_v34 = vld [vmem:[%s4562_s1 + $0x8] sm:$0xff] }
0x164b   :  { %v1955_v16 = vsel %vm1952_vm15, %v1954_v33, %v1950_v40  ;;  %vm2000_vm8 = vcmp.gt.f32.partialorder %v4251_v34, 0.0 }
0x1654   :  { %v1965_v55 = vpop.permute.xlu1 %1964 }
0x1655   :  { %v1967_v42 = vmul.f32 %v1965_v55, %v1935_v12 }
0x1657   :  { %1969 = vrot.lane.b32.xlu2 %v1967_v42, %s3334_s18 }
0x165c   :  { %v1960_v3 = vpop.permute.xlu1 %1959 }
0x165d   :  { %v1962_v61 = vmul.f32 %v1960_v3, %v1935_v12 }
0x1691   :  { %v1986_v11 = vpop.permute.xlu2 %1985 }
0x1692   :  { %v1988_v6 = vmul.f32 %v1986_v11, %v1955_v16 }
0x1694   :  { %1990 = vrot.lane.b32.xlu0 %v1988_v6, %s3334_s18 }
0x1699   :  { %v1981_v43 = vpop.permute.xlu2 %1980 }
0x169a   :  { %v1983_v42 = vmul.f32 %v1981_v43, %v1955_v16 }
0x16b1   :  { %v1970_v59 = vpop.permute.xlu2 %1969 }
0x16b2   :  { %v1972_v53 = vadd.f32 %v1970_v59, %v1962_v61 }
0x16b4   :  { %3228 = vtanh.f32 %v1972_v53 }
0x16ba   :  { %v3229_v55 = vpop.eup %3228 }
0x16bb   :  { %1975 = vrot.lane.b32.xlu1 %v3229_v55, %s3333_s0 }
0x1706   :  { %v1991_v29 = vpop.permute.xlu0 %1990 }
0x1707   :  { %v1993_v49 = vadd.f32 %v1991_v29, %v1983_v42 }
0x1709   :  { %3230 = vtanh.f32 %v1993_v49  ;;  %2018 = vrot.lane.b32.xlu1 %v1993_v49, %s3335_s19 }
0x170f   :  { %v3231_v39 = vpop.eup %3230 }
0x1710   :  { %1996 = vrot.lane.b32.xlu0 %v3231_v39, %s3333_s0 }
0x172d   :  { %v1976_v32 = vpop.permute.xlu1 %1975 }
0x172e   :  { %v1978_v14 = vmul.f32 %v1976_v32, %v1935_v12 }
0x1730   :  { %2003 = vrot.lane.b32.xlu0 %v1978_v14, %s3334_s18 }
0x1738   :  { %2008 = vrot.lane.b32.xlu0 %v1972_v53, %s3335_s19 }
0x177b   :  { %v2019_v53 = vpop.permute.xlu1 %2018 }
0x1782   :  { %v1997_v45 = vpop.permute.xlu0 %1996 }
0x1783   :  { %v1999_v37 = vmul.f32 %v1997_v45, %v1955_v16 }
0x1785   :  { %2013 = vrot.lane.b32.xlu2 %v1999_v37, %s3334_s18 }
0x17a2   :  { %v2004_v24 = vpop.permute.xlu0 %2003 }
0x17a3   :  { %v4257_v12 = vsel %vm2000_vm8, %v2004_v24, %v4190_v57  ;;  %v1619_v57 = vadd.f32 %v4198_v1, %v4072_v58  ;;  %v1669_v58 = vadd.f32 %v4168_v44, %v4166_v35 }
0x17a4   :  { %3044 = vmatmul.msk.f32.vlgmr.msrb.gmra.mxu0 %vm42_vm0, %v4257_v12 }
0x17a5   :  { %2654 = vmatpush.msrb.mxu0 %v4023_v25  ;;  %v1686_v33 = vadd.f32 %v4091_v36, %v1619_v57  ;;  %v1693_v1 = vadd.f32 %v4175_v30, %v1669_v58 }
0x17a7   :  { %2655 = vmatpush.msrb.mxu0 %v4028_v28 }
0x17a9   :  { %2656 = vmatpush.msrb.mxu0 %v4035_v60 }
0x17aa   :  { %v2009_v6 = vpop.permute.xlu0 %2008 }
0x17ab   :  { %2657 = vmatpush.msrb.mxu0 %v4042_v7  ;;  %v4283_v43 = vsel %vm2000_vm8, %v2009_v6, %v4226_v41  ;;  %v4294_v41 = vsel %vm1257_vm1, %v2019_v53, %v4236_v26 }
0x17df   :  { %v2014_v52 = vpop.permute.xlu2 %2013 }
0x17e0   :  { %v4268_v40 = vsel %vm1257_vm1, %v2014_v52, %v4203_v47 }
0x17e1   :  { %3045 = vmatmul.msk.f32.vlgmr.msrb.gmra.mxu1 %vm42_vm0, %v4268_v40 }
0x17e2   :  { %2679 = vmatpush.msrb.mxu1 %v4098_v19 }
0x17e4   :  { %2680 = vmatpush.msrb.mxu1 %v4103_v62 }
0x17e6   :  { %2681 = vmatpush.msrb.mxu1 %v4110_v63 }
0x17e8   :  { %2682 = vmatpush.msrb.mxu1 %v4120_v2 }
0x1821   :  { %v2045_v11 = vpop.f32.mrf.mxu0 }
0x1822   :  { %v2048_v16 = vadd.f32 %v2045_v11, %v1686_v33 }
0x1824   :  { %3232 = vtanh.f32 %v2048_v16  ;;  %v3046_v55 = vmul.f32 -1.442695, %v2048_v16 }
0x182a   :  { %v3233_v47 = vpop.eup %3232 }
0x182b   :  { %2120 = vrot.lane.b32.xlu1 %v3233_v47, %s3333_s0 }
0x1833   :  { %2115 = vrot.lane.b32.xlu1 %v4283_v43, %s3334_s18 }
0x185e   :  { %v2070_v3 = vpop.f32.mrf.mxu1 }
0x185f   :  { %v2073_v61 = vadd.f32 %v2070_v3, %v1693_v1 }
0x1861   :  { %3234 = vtanh.f32 %v2073_v61  ;;  %v3047_v32 = vmul.f32 -1.442695, %v2073_v61 }
0x1862   :  { %3236 = vpow2.f32 %v3046_v55 }
0x1867   :  { %v3235_v59 = vpop.eup %3234 }
0x1868   :  { %2141 = vrot.lane.b32.xlu2 %v3235_v59, %s3333_s0  ;;  %v3237_v35 = vpop.eup %3236 }
0x1869   :  { %v2077_v44 = vadd.f32 1.0, %v3237_v35 }
0x186b   :  { %3238 = vrcp.f32 %v2077_v44  ;;  %v2089_v45 = vand.u32 2147483648, %v2077_v44  ;;  %vm2083_vm12 = vweird.f32 %v2077_v44  ;;  %v2087_v37 = vand.u32 2147483647, %v2077_v44 }
0x186c   :  { %3240 = vpow2.f32 %v3047_v32 }
0x186d   :  { %v2090_v24 = vor.u32 1.1754944e-38, %v2089_v45  ;;  %vm2088_vm5 = vcmp.eq.f32.partialorder %v2087_v37, 8.507059e+37 }
0x1870   :  { %2136 = vrot.lane.b32.xlu2 %v4294_v41, %s3334_s18 }
0x1871   :  { %v3239_v42 = vpop.eup %3238 }
0x1872   :  { %v2079_v29 = vmul.f32 %v3239_v42, %v2077_v44  ;;  %vm2084_vm9 = vweird.f32 %v3239_v42  ;;  %v3241_v11 = vpop.eup %3240 }
0x1873   :  { %vm2085_vm11 = vmor %vm2083_vm12, %vm2084_vm9  ;;  %v2097_v16 = vadd.f32 1.0, %v3241_v11 }
0x1874   :  { %v2080_v49 = vsub.f32 1.0, %v2079_v29 }
0x1875   :  { %3242 = vrcp.f32 %v2097_v16  ;;  %v2109_v61 = vand.u32 2147483648, %v2097_v16  ;;  %vm2103_vm3 = vweird.f32 %v2097_v16  ;;  %v2107_v59 = vand.u32 2147483647, %v2097_v16 }
0x1876   :  { %v2081_v39 = vmul.f32 %v3239_v42, %v2080_v49 }
0x1877   :  { %v2110_v55 = vor.u32 1.1754944e-38, %v2109_v61  ;;  %vm2108_vm6 = vcmp.eq.f32.partialorder %v2107_v59, 8.507059e+37 }
0x1878   :  { %v2082_v14 = vadd.f32 %v3239_v42, %v2081_v39 }
0x187a   :  { %v2086_v26 = vsel %vm2085_vm11, %v3239_v42, %v2082_v14 }
0x187b   :  { %v2091_v57 = vsel %vm2088_vm5, %v2090_v24, %v2086_v26  ;;  %v3243_v47 = vpop.eup %3242 }
0x187c   :  { %v2099_v6 = vmul.f32 %v3243_v47, %v2097_v16  ;;  %vm2104_vm2 = vweird.f32 %v3243_v47 }
0x187d   :  { %vm2105_vm4 = vmor %vm2103_vm3, %vm2104_vm2 }
0x187e   :  { %v2100_v58 = vsub.f32 1.0, %v2099_v6  ;;  %v4309_v6 = vld [vmem:[%s4562_s1 + $0x10] sm:$0xff] }
0x187f   :  { %vm2156_vm7 = vcmp.gt.f32.partialorder %v4309_v6, 0.0 }
0x1880   :  { %v2101_v1 = vmul.f32 %v3243_v47, %v2100_v58 }
0x1882   :  { %v2102_v3 = vadd.f32 %v3243_v47, %v2101_v1  ;;  %v4326_v1 = vld [vmem:[%s4562_s1 + $0x28] sm:$0xff] }
0x1883   :  { %vm2157_vm14 = vcmp.gt.f32.partialorder %v4326_v1, 0.0 }
0x1884   :  { %v2106_v53 = vsel %vm2105_vm4, %v3243_v47, %v2102_v3 }
0x1885   :  { %v2111_v44 = vsel %vm2108_vm6, %v2110_v55, %v2106_v53 }
0x189d   :  { %v2121_v52 = vpop.permute.xlu1 %2120 }
0x189e   :  { %v2123_v33 = vmul.f32 %v2121_v52, %v2091_v57 }
0x18a0   :  { %2125 = vrot.lane.b32.xlu2 %v2123_v33, %s3334_s18 }
0x18a5   :  { %v2116_v49 = vpop.permute.xlu1 %2115 }
0x18a6   :  { %v2118_v39 = vmul.f32 %v2116_v49, %v2091_v57 }
0x18c2   :  { %v2142_v35 = vpop.permute.xlu2 %2141 }
0x18c3   :  { %v2144_v42 = vmul.f32 %v2142_v35, %v2111_v44 }
0x18c5   :  { %2146 = vrot.lane.b32.xlu0 %v2144_v42, %s3334_s18 }
0x18ca   :  { %v2137_v29 = vpop.permute.xlu2 %2136 }
0x18cb   :  { %v2139_v37 = vmul.f32 %v2137_v29, %v2111_v44 }
0x18fa   :  { %v2126_v32 = vpop.permute.xlu2 %2125 }
0x18fb   :  { %v2128_v14 = vadd.f32 %v2126_v32, %v2118_v39 }
0x18fd   :  { %3244 = vtanh.f32 %v2128_v14 }
0x1903   :  { %v3245_v45 = vpop.eup %3244 }
0x1904   :  { %2131 = vrot.lane.b32.xlu1 %v3245_v45, %s3333_s0 }
0x1937   :  { %v2147_v26 = vpop.permute.xlu0 %2146 }
0x1938   :  { %v2149_v24 = vadd.f32 %v2147_v26, %v2139_v37 }
0x193a   :  { %3246 = vtanh.f32 %v2149_v24  ;;  %2174 = vrot.lane.b32.xlu1 %v2149_v24, %s3335_s19 }
0x1940   :  { %v3247_v52 = vpop.eup %3246 }
0x1941   :  { %2152 = vrot.lane.b32.xlu0 %v3247_v52, %s3333_s0 }
0x1976   :  { %v2132_v33 = vpop.permute.xlu1 %2131 }
0x1977   :  { %v2134_v11 = vmul.f32 %v2132_v33, %v2091_v57 }
0x1979   :  { %2159 = vrot.lane.b32.xlu0 %v2134_v11, %s3334_s18 }
0x1981   :  { %2164 = vrot.lane.b32.xlu0 %v2128_v14, %s3335_s19 }
0x19ac   :  { %v2175_v59 = vpop.permute.xlu1 %2174 }
0x19b3   :  { %v2153_v16 = vpop.permute.xlu0 %2152 }
0x19b4   :  { %v2155_v47 = vmul.f32 %v2153_v16, %v2111_v44 }
0x19b6   :  { %2169 = vrot.lane.b32.xlu2 %v2155_v47, %s3334_s18 }
0x19eb   :  { %v2160_v58 = vpop.permute.xlu0 %2159 }
0x19ec   :  { %v4315_v57 = vsel %vm2156_vm7, %v2160_v58, %v4257_v12 }
0x19ed   :  { %3048 = vmatmul.msk.f32.vlgmr.msra.gmra.mxu2 %vm42_vm0, %v4315_v57 }
0x19ee   :  { %2806 = vmatpush.msra.mxu2 %v4023_v25  ;;  %v1622_v25 = vadd.f32 %v4205_v51, %v4074_v48  ;;  %v1666_v48 = vadd.f32 %v4164_v23, %v4162_v22 }
0x19f0   :  { %2807 = vmatpush.msra.mxu2 %v4028_v28  ;;  %v1688_v28 = vadd.f32 %v4091_v36, %v1622_v25 }
0x19f2   :  { %2808 = vmatpush.msra.mxu2 %v4035_v60 }
0x19f3   :  { %v2165_v61 = vpop.permute.xlu0 %2164 }
0x19f4   :  { %2809 = vmatpush.msra.mxu2 %v4042_v7 }
0x1a10   :  { %v2170_v12 = vpop.permute.xlu2 %2169 }
0x1a11   :  { %v4332_v3 = vsel %vm2157_vm14, %v2170_v12, %v4268_v40 }
0x1a12   :  { %3049 = vmatmul.msk.f32.vlgmr.msra.gmra.mxu3 %vm42_vm0, %v4332_v3 }
0x1a13   :  { %2831 = vmatpush.msra.mxu3 %v4098_v19  ;;  %v4347_v19 = vsel %vm2156_vm7, %v2165_v61, %v4283_v43  ;;  %v4358_v43 = vsel %vm2157_vm14, %v2175_v59, %v4294_v41 }
0x1a15   :  { %2832 = vmatpush.msra.mxu3 %v4103_v62  ;;  %v1691_v62 = vadd.f32 %v4175_v30, %v1666_v48 }
0x1a17   :  { %2833 = vmatpush.msra.mxu3 %v4110_v63 }
0x1a19   :  { %2834 = vmatpush.msra.mxu3 %v4120_v2 }
0x1a70   :  { %v2201_v60 = vpop.f32.mrf.mxu2 }
0x1a71   :  { %v2204_v7 = vadd.f32 %v2201_v60, %v1688_v28 }
0x1a73   :  { %3248 = vtanh.f32 %v2204_v7  ;;  %v3050_v53 = vmul.f32 -1.442695, %v2204_v7 }
0x1a79   :  { %v3249_v40 = vpop.eup %3248 }
0x1a7a   :  { %2276 = vrot.lane.b32.xlu1 %v3249_v40, %s3333_s0 }
0x1a82   :  { %2271 = vrot.lane.b32.xlu1 %v4347_v19, %s3334_s18 }
0x1a95   :  { %v2226_v63 = vpop.f32.mrf.mxu3 }
0x1a96   :  { %v2229_v2 = vadd.f32 %v2226_v63, %v1691_v62 }
0x1a98   :  { %3250 = vtanh.f32 %v2229_v2  ;;  %v3051_v55 = vmul.f32 -1.442695, %v2229_v2 }
0x1a99   :  { %3252 = vpow2.f32 %v3050_v53 }
0x1a9e   :  { %v3251_v51 = vpop.eup %3250 }
0x1a9f   :  { %2297 = vrot.lane.b32.xlu2 %v3251_v51, %s3333_s0  ;;  %v3253_v22 = vpop.eup %3252 }
0x1aa0   :  { %v2233_v23 = vadd.f32 1.0, %v3253_v22 }
0x1aa2   :  { %3254 = vrcp.f32 %v2233_v23  ;;  %v2245_v14 = vand.u32 2147483648, %v2233_v23  ;;  %vm2239_vm9 = vweird.f32 %v2233_v23  ;;  %v2243_v37 = vand.u32 2147483647, %v2233_v23 }
0x1aa3   :  { %3256 = vpow2.f32 %v3051_v55 }
0x1aa4   :  { %v2246_v24 = vor.u32 1.1754944e-38, %v2245_v14  ;;  %vm2244_vm11 = vcmp.eq.f32.partialorder %v2243_v37, 8.507059e+37 }
0x1aa7   :  { %2292 = vrot.lane.b32.xlu2 %v4358_v43, %s3334_s18 }
0x1aa8   :  { %v3255_v35 = vpop.eup %3254 }
0x1aa9   :  { %v3257_v44 = vpop.eup %3256  ;;  %v2235_v29 = vmul.f32 %v3255_v35, %v2233_v23  ;;  %vm2240_vm15 = vweird.f32 %v3255_v35 }
0x1aaa   :  { %v2253_v42 = vadd.f32 1.0, %v3257_v44  ;;  %vm2241_vm12 = vmor %vm2239_vm9, %vm2240_vm15 }
0x1aab   :  { %v2236_v49 = vsub.f32 1.0, %v2235_v29 }
0x1aac   :  { %3258 = vrcp.f32 %v2253_v42  ;;  %v2265_v12 = vand.u32 2147483648, %v2253_v42  ;;  %vm2259_vm2 = vweird.f32 %v2253_v42  ;;  %v2263_v25 = vand.u32 2147483647, %v2253_v42 }
0x1aad   :  { %v2237_v39 = vmul.f32 %v3255_v35, %v2236_v49  ;;  %v4373_v49 = vld [vmem:[%s4562_s1 + $0x18] sm:$0xff] }
0x1aae   :  { %v2266_v60 = vor.u32 1.1754944e-38, %v2265_v12  ;;  %vm2264_vm4 = vcmp.eq.f32.partialorder %v2263_v25, 8.507059e+37  ;;  %vm2312_vm6 = vcmp.gt.f32.partialorder %v4373_v49, 0.0 }
0x1aaf   :  { %v2238_v41 = vadd.f32 %v3255_v35, %v2237_v39 }
0x1ab1   :  { %v2242_v26 = vsel %vm2241_vm12, %v3255_v35, %v2238_v41  ;;  %v4386_v41 = vld [vmem:[%s4562_s1 + $0x20] sm:$0xff] }
0x1ab2   :  { %v3259_v32 = vpop.eup %3258  ;;  %v2247_v11 = vsel %vm2244_vm11, %v2246_v24, %v2242_v26  ;;  %vm2313_vm15 = vcmp.gt.f32.partialorder %v4386_v41, 0.0 }
0x1ab3   :  { %v2255_v45 = vmul.f32 %v3259_v32, %v2253_v42  ;;  %vm2260_vm5 = vweird.f32 %v3259_v32 }
0x1ab4   :  { %vm2261_vm3 = vmor %vm2259_vm2, %vm2260_vm5 }
0x1ab5   :  { %v2256_v52 = vsub.f32 1.0, %v2255_v45 }
0x1ab7   :  { %v2257_v47 = vmul.f32 %v3259_v32, %v2256_v52  ;;  %v1663_v52 = vadd.f32 %v4160_v21, %v4158_v20 }
0x1ab9   :  { %v2258_v58 = vadd.f32 %v3259_v32, %v2257_v47 }
0x1abb   :  { %v2262_v28 = vsel %vm2261_vm3, %v3259_v32, %v2258_v58 }
0x1abc   :  { %v2267_v40 = vsel %vm2264_vm4, %v2266_v60, %v2262_v28 }
0x1aec   :  { %v2277_v33 = vpop.permute.xlu1 %2276 }
0x1aed   :  { %v2279_v16 = vmul.f32 %v2277_v33, %v2247_v11 }
0x1aef   :  { %2281 = vrot.lane.b32.xlu2 %v2279_v16, %s3334_s18 }
0x1af4   :  { %v2272_v62 = vpop.permute.xlu1 %2271 }
0x1af5   :  { %v2274_v63 = vmul.f32 %v2272_v62, %v2247_v11 }
0x1af9   :  { %v2298_v7 = vpop.permute.xlu2 %2297 }
0x1afa   :  { %v2300_v61 = vmul.f32 %v2298_v7, %v2267_v40 }
0x1afc   :  { %2302 = vrot.lane.b32.xlu0 %v2300_v61, %s3334_s18 }
0x1b01   :  { %v2293_v48 = vpop.permute.xlu2 %2292 }
0x1b02   :  { %v2295_v53 = vmul.f32 %v2293_v48, %v2267_v40 }
0x1b49   :  { %v2282_v2 = vpop.permute.xlu2 %2281 }
0x1b4a   :  { %v2284_v51 = vadd.f32 %v2282_v2, %v2274_v63 }
0x1b4c   :  { %3260 = vtanh.f32 %v2284_v51 }
0x1b52   :  { %v3261_v59 = vpop.eup %3260 }
0x1b53   :  { %2287 = vrot.lane.b32.xlu1 %v3261_v59, %s3333_s0 }
0x1b6e   :  { %v2303_v22 = vpop.permute.xlu0 %2302 }
0x1b6f   :  { %v2305_v23 = vadd.f32 %v2303_v22, %v2295_v53 }
0x1b71   :  { %3262 = vtanh.f32 %v2305_v23  ;;  %2330 = vrot.lane.b32.xlu1 %v2305_v23, %s3335_s19 }
0x1b77   :  { %v3263_v55 = vpop.eup %3262 }
0x1b78   :  { %2308 = vrot.lane.b32.xlu0 %v3263_v55, %s3333_s0 }
0x1bc5   :  { %v2288_v35 = vpop.permute.xlu1 %2287 }
0x1bc6   :  { %v2290_v44 = vmul.f32 %v2288_v35, %v2247_v11 }
0x1bc8   :  { %2315 = vrot.lane.b32.xlu0 %v2290_v44, %s3334_s18 }
0x1bd0   :  { %2320 = vrot.lane.b32.xlu0 %v2284_v51, %s3335_s19 }
0x1be3   :  { %v2331_v20 = vpop.permute.xlu1 %2330 }
0x1be4   :  { %v4414_v21 = vsel %vm2313_vm15, %v2331_v20, %v4358_v43 }
0x1bea   :  { %v2309_v42 = vpop.permute.xlu0 %2308 }
0x1beb   :  { %v2311_v29 = vmul.f32 %v2309_v42, %v2267_v40 }
0x1bed   :  { %2325 = vrot.lane.b32.xlu2 %v2311_v29, %s3334_s18 }
0x1c3a   :  { %v2316_v39 = vpop.permute.xlu0 %2315 }
0x1c3b   :  { %v4379_v32 = vsel %vm2312_vm6, %v2316_v39, %v4315_v57  ;;  %v1625_v57 = vadd.f32 %v4213_v0, %v4076_v54 }
0x1c3c   :  { %3052 = vmatmul.msk.f32.vlgmr.msra.gmra.mxu0 %vm42_vm0, %v4379_v32 }
0x1c3d   :  { %v1690_v37 = vadd.f32 %v4091_v36, %v1625_v57 }
0x1c42   :  { %v2321_v16 = vpop.permute.xlu0 %2320 }
0x1c43   :  { %v4406_v54 = vsel %vm2312_vm6, %v2321_v16, %v4347_v19 }
0x1c47   :  { %v2326_v14 = vpop.permute.xlu2 %2325 }
0x1c48   :  { %v4392_v45 = vsel %vm2313_vm15, %v2326_v14, %v4332_v3  ;;  %v1689_v3 = vadd.f32 %v4175_v30, %v1663_v52 }
0x1c49   :  { %3053 = vmatmul.msk.f32.vlgmr.msra.gmra.mxu1 %vm42_vm0, %v4392_v45 }
0x1cb9   :  { %v2355_v26 = vpop.f32.mrf.mxu0 }
0x1cba   :  { %v2358_v24 = vadd.f32 %v2355_v26, %v1690_v37 }
0x1cbc   :  { %3264 = vtanh.f32 %v2358_v24  ;;  %v3054_v19 = vmul.f32 -1.442695, %v2358_v24 }
0x1cc2   :  { %v3265_v33 = vpop.eup %3264 }
0x1cc3   :  { %2430 = vrot.lane.b32.xlu1 %v3265_v33, %s3333_s0 }
0x1cc6   :  { %v2380_v11 = vpop.f32.mrf.mxu1 }
0x1cc7   :  { %v2383_v47 = vadd.f32 %v2380_v11, %v1689_v3 }
0x1cc9   :  { %3266 = vtanh.f32 %v2383_v47  ;;  %v3055_v58 = vmul.f32 -1.442695, %v2383_v47 }
0x1ccb   :  { %2425 = vrot.lane.b32.xlu1 %v4406_v54, %s3334_s18  ;;  %3268 = vpow2.f32 %v3055_v58 }
0x1ccc   :  { %3270 = vpow2.f32 %v3054_v19 }
0x1ccf   :  { %v3267_v0 = vpop.eup %3266 }
0x1cd0   :  { %2451 = vrot.lane.b32.xlu2 %v3267_v0, %s3333_s0 }
0x1cd1   :  { %v3269_v12 = vpop.eup %3268 }
0x1cd2   :  { %v2407_v25 = vadd.f32 1.0, %v3269_v12  ;;  %v3271_v28 = vpop.eup %3270 }
0x1cd3   :  { %v2387_v7 = vadd.f32 1.0, %v3271_v28 }
0x1cd4   :  { %3272 = vrcp.f32 %v2407_v25  ;;  %v2419_v2 = vand.u32 2147483648, %v2407_v25  ;;  %vm2413_vm12 = vweird.f32 %v2407_v25  ;;  %v2417_v51 = vand.u32 2147483647, %v2407_v25 }
0x1cd5   :  { %3274 = vrcp.f32 %v2387_v7  ;;  %v2399_v29 = vand.u32 2147483648, %v2387_v7  ;;  %vm2393_vm3 = vweird.f32 %v2387_v7  ;;  %v2397_v39 = vand.u32 2147483647, %v2387_v7 }
0x1cd6   :  { %v2420_v22 = vor.u32 1.1754944e-38, %v2419_v2  ;;  %vm2418_vm5 = vcmp.eq.f32.partialorder %v2417_v51, 8.507059e+37  ;;  %v1628_v2 = vadd.f32 %v4215_v27, %v4078_v15 }
0x1cd7   :  { %v2400_v57 = vor.u32 1.1754944e-38, %v2399_v29  ;;  %vm2398_vm13 = vcmp.eq.f32.partialorder %v2397_v39, 8.507059e+37 }
0x1cd8   :  { %2446 = vrot.lane.b32.xlu2 %v4414_v21, %s3334_s18 }
0x1cda   :  { %v3273_v60 = vpop.eup %3272 }
0x1cdb   :  { %v2409_v40 = vmul.f32 %v3273_v60, %v2407_v25  ;;  %v3275_v48 = vpop.eup %3274  ;;  %vm2414_vm9 = vweird.f32 %v3273_v60 }
0x1cdc   :  { %v2389_v43 = vmul.f32 %v3275_v48, %v2387_v7  ;;  %vm2415_vm11 = vmor %vm2413_vm12, %vm2414_vm9  ;;  %vm2394_vm2 = vweird.f32 %v3275_v48 }
0x1cdd   :  { %v2410_v61 = vsub.f32 1.0, %v2409_v40  ;;  %vm2395_vm4 = vmor %vm2393_vm3, %vm2394_vm2 }
0x1cde   :  { %v2390_v59 = vsub.f32 1.0, %v2389_v43 }
0x1cdf   :  { %v2411_v62 = vmul.f32 %v3273_v60, %v2410_v61 }
0x1ce0   :  { %v2391_v35 = vmul.f32 %v3275_v48, %v2390_v59 }
0x1ce1   :  { %v2412_v63 = vadd.f32 %v3273_v60, %v2411_v62  ;;  %v1660_v62 = vadd.f32 %v4156_v50, %v4154_v46 }
0x1ce2   :  { %v2392_v42 = vadd.f32 %v3275_v48, %v2391_v35 }
0x1ce3   :  { %v2416_v53 = vsel %vm2415_vm11, %v3273_v60, %v2412_v63  ;;  %v1687_v43 = vadd.f32 %v4175_v30, %v1660_v62 }
0x1ce4   :  { %v2421_v55 = vsel %vm2418_vm5, %v2420_v22, %v2416_v53  ;;  %v2396_v14 = vsel %vm2395_vm4, %v3275_v48, %v2392_v42 }
0x1ce5   :  { %v2401_v26 = vsel %vm2398_vm13, %v2400_v57, %v2396_v14 }
0x1d2a   :  { %v2452_v23 = vpop.permute.xlu2 %2451 }
0x1d2b   :  { %v2454_v44 = vmul.f32 %v2452_v23, %v2421_v55 }
0x1d2d   :  { %2456 = vrot.lane.b32.xlu0 %v2454_v44, %s3334_s18 }
0x1d32   :  { %v2447_v52 = vpop.permute.xlu2 %2446 }
0x1d33   :  { %v2449_v0 = vmul.f32 %v2447_v52, %v2421_v55 }
0x1d35   :  { %v2431_v37 = vpop.permute.xlu1 %2430 }
0x1d36   :  { %v2433_v24 = vmul.f32 %v2431_v37, %v2401_v26 }
0x1d38   :  { %2435 = vrot.lane.b32.xlu2 %v2433_v24, %s3334_s18 }
0x1d3d   :  { %v2426_v33 = vpop.permute.xlu1 %2425 }
0x1d3e   :  { %v2428_v3 = vmul.f32 %v2426_v33, %v2401_v26 }
0x1d92   :  { %v2436_v11 = vpop.permute.xlu2 %2435 }
0x1d93   :  { %v2438_v16 = vadd.f32 %v2436_v11, %v2428_v3 }
0x1d95   :  { %3276 = vtanh.f32 %v2438_v16 }
0x1d9b   :  { %v3277_v47 = vpop.eup %3276 }
0x1d9c   :  { %2441 = vrot.lane.b32.xlu1 %v3277_v47, %s3333_s0 }
0x1d9f   :  { %v2457_v20 = vpop.permute.xlu0 %2456 }
0x1da0   :  { %v2459_v58 = vadd.f32 %v2457_v20, %v2449_v0 }
0x1da2   :  { %3278 = vtanh.f32 %v2459_v58 }
0x1da4   :  { %2482 = vrot.lane.b32.xlu1 %v2459_v58, %s3335_s19 }
0x1da8   :  { %v3279_v12 = vpop.eup %3278 }
0x1da9   :  { %2462 = vrot.lane.b32.xlu0 %v3279_v12, %s3333_s0 }
0x1e0e   :  { %v2442_v19 = vpop.permute.xlu1 %2441 }
0x1e0f   :  { %v2444_v25 = vmul.f32 %v2442_v19, %v2401_v26 }
0x1e11   :  { %2467 = vrot.lane.b32.xlu0 %v2444_v25, %s3334_s18 }
0x1e16   :  { %v2483_v22 = vpop.permute.xlu1 %2482 }
0x1e17   :  { %v4450_v46 = vsel %vm2312_vm6, %v2483_v22, %v4414_v21 }
0x1e19   :  { %2472 = vrot.lane.b32.xlu0 %v2438_v16, %s3335_s19 }
0x1e1b   :  { %v2463_v28 = vpop.permute.xlu0 %2462 }
0x1e1c   :  { %v2465_v60 = vmul.f32 %v2463_v28, %v2421_v55 }
0x1e1e   :  { %2477 = vrot.lane.b32.xlu2 %v2465_v60, %s3334_s18 }
0x1e78   :  { %v2478_v7 = vpop.permute.xlu2 %2477 }
0x1e79   :  { %v4429_v40 = vsel %vm2312_vm6, %v2478_v7, %v4392_v45 }
0x1e7a   :  { %3057 = vmatmul.msk.f32.vlgmr.msrb.gmra.mxu3 %vm42_vm0, %v4429_v40 }
0x1e83   :  { %v2468_v61 = vpop.permute.xlu0 %2467 }
0x1e84   :  { %v4436_v48 = vsel %vm2313_vm15, %v2468_v61, %v4379_v32  ;;  %v1692_v32 = vadd.f32 %v4091_v36, %v1628_v2 }
0x1e85   :  { %3056 = vmatmul.msk.f32.vlgmr.msrb.gmra.mxu2 %vm42_vm0, %v4436_v48 }
0x1e8b   :  { %v2473_v15 = vpop.permute.xlu0 %2472 }
0x1e8c   :  { %v4458_v27 = vsel %vm2313_vm15, %v2473_v15, %v4406_v54 }
0x1efd   :  { %v2532_v63 = vpop.f32.mrf.mxu3 }
0x1efe   :  { %v2535_v45 = vadd.f32 %v2532_v63, %v1687_v43 }
0x1f00   :  { %3280 = vtanh.f32 %v2535_v45  ;;  %v3059_v23 = vmul.f32 -1.442695, %v2535_v45 }
0x1f06   :  { %v3281_v51 = vpop.eup %3280 }
0x1f07   :  { %2603 = vrot.lane.b32.xlu2 %v3281_v51, %s3333_s0 }
0x1f08   :  { %v2507_v59 = vpop.f32.mrf.mxu2 }
0x1f09   :  { %v2510_v53 = vadd.f32 %v2507_v59, %v1692_v32 }
0x1f0b   :  { %3282 = vtanh.f32 %v2510_v53  ;;  %v3058_v29 = vmul.f32 -1.442695, %v2510_v53 }
0x1f0c   :  { %3284 = vpow2.f32 %v3059_v23 }
0x1f0f   :  { %2598 = vrot.lane.b32.xlu2 %v4450_v46, %s3334_s18 }
0x1f11   :  { %v3283_v50 = vpop.eup %3282 }
0x1f12   :  { %2582 = vrot.lane.b32.xlu1 %v3283_v50, %s3333_s0  ;;  %v3285_v49 = vpop.eup %3284 }
0x1f13   :  { %v2559_v21 = vadd.f32 1.0, %v3285_v49 }
0x1f15   :  { %3286 = vrcp.f32 %v2559_v21  ;;  %v2571_v14 = vand.u32 2147483648, %v2559_v21  ;;  %vm2565_vm6 = vweird.f32 %v2559_v21  ;;  %v2569_v41 = vand.u32 2147483647, %v2559_v21 }
0x1f16   :  { %3288 = vpow2.f32 %v3058_v29 }
0x1f17   :  { %v2572_v57 = vor.u32 1.1754944e-38, %v2571_v14  ;;  %vm2570_vm9 = vcmp.eq.f32.partialorder %v2569_v41, 8.507059e+37 }
0x1f1a   :  { %2577 = vrot.lane.b32.xlu1 %v4458_v27, %s3334_s18 }
0x1f1b   :  { %v3287_v55 = vpop.eup %3286 }
0x1f1c   :  { %v2561_v35 = vmul.f32 %v3287_v55, %v2559_v21  ;;  %vm2566_vm13 = vweird.f32 %v3287_v55  ;;  %v3289_v24 = vpop.eup %3288 }
0x1f1d   :  { %vm2567_vm15 = vmor %vm2565_vm6, %vm2566_vm13  ;;  %v2539_v33 = vadd.f32 1.0, %v3289_v24 }
0x1f1e   :  { %v2562_v44 = vsub.f32 1.0, %v2561_v35  ;;  %v1657_v35 = vadd.f32 %v4152_v17, %v4150_v56  ;;  %v1631_v56 = vadd.f32 %v4217_v4, %v4081_v18 }
0x1f1f   :  { %3290 = vrcp.f32 %v2539_v33  ;;  %v2551_v20 = vand.u32 2147483648, %v2539_v33  ;;  %vm2545_vm11 = vweird.f32 %v2539_v33  ;;  %v2549_v58 = vand.u32 2147483647, %v2539_v33 }
0x1f20   :  { %v2563_v42 = vmul.f32 %v3287_v55, %v2562_v44  ;;  %v1685_v44 = vadd.f32 %v4175_v30, %v1657_v35  ;;  %v1694_v17 = vadd.f32 %v4091_v36, %v1631_v56 }
0x1f21   :  { %v2552_v19 = vor.u32 1.1754944e-38, %v2551_v20  ;;  %vm2550_vm2 = vcmp.eq.f32.partialorder %v2549_v58, 8.507059e+37 }
0x1f22   :  { %v2564_v39 = vadd.f32 %v3287_v55, %v2563_v42 }
0x1f24   :  { %v2568_v54 = vsel %vm2567_vm15, %v3287_v55, %v2564_v39 }
0x1f25   :  { %v2573_v26 = vsel %vm2570_vm9, %v2572_v57, %v2568_v54  ;;  %v3291_v3 = vpop.eup %3290 }
0x1f26   :  { %v2541_v11 = vmul.f32 %v3291_v3, %v2539_v33  ;;  %vm2546_vm12 = vweird.f32 %v3291_v3 }
0x1f27   :  { %vm2547_vm5 = vmor %vm2545_vm11, %vm2546_vm12 }
0x1f28   :  { %v2542_v16 = vsub.f32 1.0, %v2541_v11 }
0x1f2a   :  { %v2543_v47 = vmul.f32 %v3291_v3, %v2542_v16 }
0x1f2c   :  { %v2544_v0 = vadd.f32 %v3291_v3, %v2543_v47 }
0x1f2e   :  { %v2548_v12 = vsel %vm2547_vm5, %v3291_v3, %v2544_v0 }
0x1f2f   :  { %v2553_v28 = vsel %vm2550_vm2, %v2552_v19, %v2548_v12 }
0x1f61   :  { %v2604_v37 = vpop.permute.xlu2 %2603 }
0x1f62   :  { %v2606_v52 = vmul.f32 %v2604_v37, %v2573_v26 }
0x1f64   :  { %2608 = vrot.lane.b32.xlu0 %v2606_v52, %s3334_s18 }
0x1f69   :  { %v2599_v7 = vpop.permute.xlu2 %2598 }
0x1f6a   :  { %v2601_v61 = vmul.f32 %v2599_v7, %v2573_v26 }
0x1f84   :  { %v2583_v25 = vpop.permute.xlu1 %2582 }
0x1f85   :  { %v2585_v60 = vmul.f32 %v2583_v25, %v2553_v28 }
0x1f87   :  { %2587 = vrot.lane.b32.xlu2 %v2585_v60, %s3334_s18 }
0x1f8c   :  { %v2578_v63 = vpop.permute.xlu1 %2577 }
0x1f8d   :  { %v2580_v2 = vmul.f32 %v2578_v63, %v2553_v28 }
0x1fd6   :  { %v2609_v62 = vpop.permute.xlu0 %2608 }
0x1fd7   :  { %v2611_v43 = vadd.f32 %v2609_v62, %v2601_v61 }
0x1fd9   :  { %3292 = vtanh.f32 %v2611_v43 }
0x1fdf   :  { %v3293_v45 = vpop.eup %3292 }
0x1fe0   :  { %2614 = vrot.lane.b32.xlu0 %v3293_v45, %s3333_s0 }
0x1fe1   :  { %v2588_v51 = vpop.permute.xlu2 %2587 }
0x1fe2   :  { %v2590_v32 = vadd.f32 %v2588_v51, %v2580_v2 }
0x1fe4   :  { %3294 = vtanh.f32 %v2590_v32 }
0x1fea   :  { %v3295_v59 = vpop.eup %3294 }
0x1feb   :  { %2593 = vrot.lane.b32.xlu1 %v3295_v59, %s3333_s0 }
0x1ff3   :  { %2634 = vrot.lane.b32.xlu1 %v2611_v43, %s3335_s19 }
0x2052   :  { %v2615_v53 = vpop.permute.xlu0 %2614 }
0x2053   :  { %v2617_v22 = vmul.f32 %v2615_v53, %v2573_v26 }
0x2055   :  { %2629 = vrot.lane.b32.xlu2 %v2617_v22, %s3334_s18 }
0x205d   :  { %v2594_v50 = vpop.permute.xlu1 %2593 }
0x205e   :  { %v2596_v15 = vmul.f32 %v2594_v50, %v2553_v28 }
0x2060   :  { %2619 = vrot.lane.b32.xlu0 %v2596_v15, %s3334_s18 }
0x2065   :  { %v2635_v39 = vpop.permute.xlu1 %2634 }
0x2068   :  { %2624 = vrot.lane.b32.xlu0 %v2590_v32, %s3335_s19 }
0x20af   :  { %v2630_v23 = vpop.permute.xlu2 %2629 }
0x20b0   :  { %v4473_v49 = vsel %vm2156_vm7, %v2630_v23, %v4429_v40 }
0x20b1   :  { %3061 = vmatmul.msk.f32.vlgmr.msrb.gmra.mxu1 %vm42_vm0, %v4473_v49 }
0x20d2   :  { %v2620_v21 = vpop.permute.xlu0 %2619 }
0x20d3   :  { %v4480_v55 = vsel %vm2157_vm14, %v2620_v21, %v4436_v48  ;;  %v4491_v48 = vsel %vm2156_vm7, %v2635_v39, %v4450_v46 }
0x20d4   :  { %3060 = vmatmul.msk.f32.vlgmr.msrb.gmra.mxu0 %vm42_vm0, %v4480_v55 }
0x20da   :  { %v2625_v57 = vpop.permute.xlu0 %2624 }
0x20db   :  { %v4502_v6 = vsel %vm2157_vm14, %v2625_v57, %v4458_v27 }
0x212e   :  { %v2684_v42 = vpop.f32.mrf.mxu1 }
0x212f   :  { %v2687_v40 = vadd.f32 %v2684_v42, %v1685_v44 }
0x2131   :  { %3296 = vtanh.f32 %v2687_v40  ;;  %v3063_v46 = vmul.f32 -1.442695, %v2687_v40 }
0x2137   :  { %v3297_v29 = vpop.eup %3296 }
0x2138   :  { %2755 = vrot.lane.b32.xlu2 %v3297_v29, %s3333_s0 }
0x2140   :  { %2750 = vrot.lane.b32.xlu2 %v4491_v48, %s3334_s18 }
0x2151   :  { %v2659_v14 = vpop.f32.mrf.mxu0 }
0x2152   :  { %v2662_v41 = vadd.f32 %v2659_v14, %v1694_v17 }
0x2154   :  { %3298 = vtanh.f32 %v2662_v41  ;;  %v3062_v20 = vmul.f32 -1.442695, %v2662_v41 }
0x2155   :  { %3300 = vpow2.f32 %v3063_v46 }
0x215a   :  { %v3299_v54 = vpop.eup %3298 }
0x215b   :  { %2734 = vrot.lane.b32.xlu1 %v3299_v54, %s3333_s0  ;;  %v3301_v18 = vpop.eup %3300  ;;  %v1654_v54 = vadd.f32 %v4148_v38, %v4146_v8  ;;  %v1634_v8 = vadd.f32 %v4219_v5, %v4083_v31 }
0x215c   :  { %v2711_v4 = vadd.f32 1.0, %v3301_v18 }
0x215d   :  { %v1683_v57 = vadd.f32 %v4175_v30, %v1654_v54  ;;  %v1696_v30 = vadd.f32 %v4091_v36, %v1634_v8 }
0x215e   :  { %3302 = vrcp.f32 %v2711_v4  ;;  %v2723_v3 = vand.u32 2147483648, %v2711_v4  ;;  %vm2717_vm3 = vweird.f32 %v2711_v4  ;;  %v2721_v11 = vand.u32 2147483647, %v2711_v4 }
0x215f   :  { %3304 = vpow2.f32 %v3062_v20 }
0x2160   :  { %v2724_v27 = vor.u32 1.1754944e-38, %v2723_v3  ;;  %vm2722_vm14 = vcmp.eq.f32.partialorder %v2721_v11, 8.507059e+37 }
0x2163   :  { %2729 = vrot.lane.b32.xlu1 %v4502_v6, %s3334_s18 }
0x2164   :  { %v3303_v37 = vpop.eup %3302 }
0x2165   :  { %v2713_v26 = vmul.f32 %v3303_v37, %v2711_v4  ;;  %vm2718_vm7 = vweird.f32 %v3303_v37  ;;  %v3305_v58 = vpop.eup %3304 }
0x2166   :  { %vm2719_vm4 = vmor %vm2717_vm3, %vm2718_vm7  ;;  %v2691_v12 = vadd.f32 1.0, %v3305_v58 }
0x2167   :  { %v2714_v24 = vsub.f32 1.0, %v2713_v26 }
0x2168   :  { %3306 = vrcp.f32 %v2691_v12  ;;  %v2703_v61 = vand.u32 2147483648, %v2691_v12  ;;  %vm2697_vm6 = vweird.f32 %v2691_v12  ;;  %v2701_v62 = vand.u32 2147483647, %v2691_v12 }
0x2169   :  { %v2715_v52 = vmul.f32 %v3303_v37, %v2714_v24 }
0x216a   :  { %v2704_v63 = vor.u32 1.1754944e-38, %v2703_v61  ;;  %vm2702_vm9 = vcmp.eq.f32.partialorder %v2701_v62, 8.507059e+37 }
0x216b   :  { %v2716_v33 = vadd.f32 %v3303_v37, %v2715_v52 }
0x216d   :  { %v2720_v1 = vsel %vm2719_vm4, %v3303_v37, %v2716_v33  ;;  %vm4565_vm4 = vcmp.gt.f32.partialorder %v4140_v13, 0.0 }
0x216e   :  { %v2725_v47 = vsel %vm2722_vm14, %v2724_v27, %v2720_v1  ;;  %v3307_v19 = vpop.eup %3306  ;;  %vm2925_vm14 = vcmask 523520  }
0x216f   :  { %v2693_v25 = vmul.f32 %v3307_v19, %v2691_v12  ;;  %vm2698_vm13 = vweird.f32 %v3307_v19 }
0x2170   :  { %vm2699_vm15 = vmor %vm2697_vm6, %vm2698_vm13 }
0x2171   :  { %v2694_v28 = vsub.f32 1.0, %v2693_v25 }
0x2173   :  { %v2695_v60 = vmul.f32 %v3307_v19, %v2694_v28 }
0x2175   :  { %v2696_v7 = vadd.f32 %v3307_v19, %v2695_v60 }
0x2177   :  { %v2700_v43 = vsel %vm2699_vm15, %v3307_v19, %v2696_v7 }
0x2178   :  { %v2705_v2 = vsel %vm2702_vm9, %v2704_v63, %v2700_v43 }
0x2192   :  { %v2756_v16 = vpop.permute.xlu2 %2755 }
0x2193   :  { %v2758_v0 = vmul.f32 %v2756_v16, %v2725_v47 }
0x2195   :  { %2760 = vrot.lane.b32.xlu0 %v2758_v0, %s3334_s18 }
0x219a   :  { %v2751_v32 = vpop.permute.xlu2 %2750 }
0x219b   :  { %v2753_v59 = vmul.f32 %v2751_v32, %v2725_v47 }
0x21cd   :  { %v2735_v45 = vpop.permute.xlu1 %2734 }
0x21ce   :  { %v2737_v51 = vmul.f32 %v2735_v45, %v2705_v2 }
0x21d0   :  { %2739 = vrot.lane.b32.xlu2 %v2737_v51, %s3334_s18 }
0x21d5   :  { %v2730_v15 = vpop.permute.xlu1 %2729 }
0x21d6   :  { %v2732_v23 = vmul.f32 %v2730_v15, %v2705_v2 }
0x2207   :  { %v2761_v53 = vpop.permute.xlu0 %2760 }
0x2208   :  { %v2763_v22 = vadd.f32 %v2761_v53, %v2753_v59 }
0x220a   :  { %3308 = vtanh.f32 %v2763_v22 }
0x2210   :  { %v3309_v50 = vpop.eup %3308 }
0x2211   :  { %2766 = vrot.lane.b32.xlu0 %v3309_v50, %s3333_s0 }
0x222a   :  { %v2740_v21 = vpop.permute.xlu2 %2739 }
0x222b   :  { %v2742_v35 = vadd.f32 %v2740_v21, %v2732_v23 }
0x222d   :  { %3310 = vtanh.f32 %v2742_v35 }
0x2233   :  { %v3311_v44 = vpop.eup %3310 }
0x2234   :  { %2745 = vrot.lane.b32.xlu1 %v3311_v44, %s3333_s0 }
0x223c   :  { %2786 = vrot.lane.b32.xlu1 %v2763_v22, %s3335_s19 }
0x2283   :  { %v2767_v42 = vpop.permute.xlu0 %2766 }
0x2284   :  { %v2769_v40 = vmul.f32 %v2767_v42, %v2725_v47 }
0x2286   :  { %2781 = vrot.lane.b32.xlu2 %v2769_v40, %s3334_s18 }
0x22a6   :  { %v2746_v29 = vpop.permute.xlu1 %2745 }
0x22a7   :  { %v2748_v39 = vmul.f32 %v2746_v29, %v2705_v2 }
0x22a9   :  { %2771 = vrot.lane.b32.xlu0 %v2748_v39, %s3334_s18 }
0x22b1   :  { %2776 = vrot.lane.b32.xlu0 %v2742_v35, %s3335_s19 }
0x22e0   :  { %v2782_v56 = vpop.permute.xlu2 %2781 }
0x22e1   :  { %v2784_v17 = vsel %vm2000_vm8, %v2782_v56, %v4473_v49  ;;  %v2787_v49 = vpop.permute.xlu1 %2786 }
0x22e2   :  { %3065 = vmatmul.msk.f32.vlgmr.msra.gmra.mxu3 %vm42_vm0, %v2784_v17  ;;  %v4529_v37 = vsel %vm2000_vm8, %v2787_v49, %v4491_v48 }
0x231b   :  { %v2772_v14 = vpop.permute.xlu0 %2771 }
0x231c   :  { %v2774_v41 = vsel %vm1257_vm1, %v2772_v14, %v4480_v55 }
0x231d   :  { %3064 = vmatmul.msk.f32.vlgmr.msra.gmra.mxu2 %vm42_vm0, %v2774_v41 }
0x2323   :  { %v2777_v34 = vpop.permute.xlu0 %2776 }
0x2324   :  { %v2779_v48 = vsel %vm1257_vm1, %v2777_v34, %v4502_v6 }
0x2365   :  { %v2836_v46 = vpop.f32.mrf.mxu3 }
0x2366   :  { %v2839_v18 = vadd.f32 %v2836_v46, %v1683_v57 }
0x2368   :  { %3312 = vtanh.f32 %v2839_v18  ;;  %v3067_v38 = vmul.f32 -1.442695, %v2839_v18 }
0x236a   :  { %3314 = vpow2.f32 %v3067_v38 }
0x236e   :  { %v3313_v4 = vpop.eup %3312 }
0x236f   :  { %2901 = vrot.lane.b32.xlu2 %v3313_v4, %s3333_s0 }
0x2370   :  { %v3315_v24 = vpop.eup %3314 }
0x2371   :  { %v2863_v52 = vadd.f32 1.0, %v3315_v24 }
0x2373   :  { %v2875_v1 = vand.u32 2147483648, %v2863_v52  ;;  %vm2869_vm12 = vweird.f32 %v2863_v52  ;;  %v2873_v27 = vand.u32 2147483647, %v2863_v52 }
0x2375   :  { %v2876_v47 = vor.u32 1.1754944e-38, %v2875_v1  ;;  %vm2874_vm5 = vcmp.eq.f32.partialorder %v2873_v27, 8.507059e+37 }
0x2377   :  { %2896 = vrot.lane.b32.xlu2 %v4529_v37, %s3334_s18 }
0x23a0   :  { %v2811_v55 = vpop.f32.mrf.mxu2 }
0x23a1   :  { %v2814_v26 = vadd.f32 %v2811_v55, %v1696_v30 }
0x23a3   :  { %3316 = vtanh.f32 %v2814_v26  ;;  %v3066_v10 = vmul.f32 -1.442695, %v2814_v26 }
0x23a4   :  { %3318 = vrcp.f32 %v2863_v52 }
0x23a5   :  { %3320 = vpow2.f32 %v3066_v10 }
0x23a9   :  { %v3317_v33 = vpop.eup %3316 }
0x23aa   :  { %2886 = vrot.lane.b32.xlu1 %v3317_v33, %s3333_s0  ;;  %v3319_v3 = vpop.eup %3318 }
0x23ab   :  { %v2865_v31 = vmul.f32 %v3319_v3, %v2863_v52  ;;  %vm2870_vm8 = vweird.f32 %v3319_v3  ;;  %v3321_v6 = vpop.eup %3320 }
0x23ac   :  { %vm2871_vm11 = vmor %vm2869_vm12, %vm2870_vm8  ;;  %v2843_v12 = vadd.f32 1.0, %v3321_v6 }
0x23ad   :  { %v2866_v5 = vsub.f32 1.0, %v2865_v31 }
0x23ae   :  { %3322 = vrcp.f32 %v2843_v12  ;;  %v2855_v61 = vand.u32 2147483648, %v2843_v12  ;;  %vm2849_vm2 = vweird.f32 %v2843_v12  ;;  %v2853_v62 = vand.u32 2147483647, %v2843_v12 }
0x23af   :  { %v2867_v36 = vmul.f32 %v3319_v3, %v2866_v5 }
0x23b0   :  { %v2856_v63 = vor.u32 1.1754944e-38, %v2855_v61  ;;  %vm2854_vm3 = vcmp.eq.f32.partialorder %v2853_v62, 8.507059e+37 }
0x23b1   :  { %v2868_v11 = vadd.f32 %v3319_v3, %v2867_v36 }
0x23b2   :  { %2881 = vrot.lane.b32.xlu1 %v2779_v48, %s3334_s18 }
0x23b3   :  { %v2872_v16 = vsel %vm2871_vm11, %v3319_v3, %v2868_v11 }
0x23b4   :  { %v2877_v20 = vsel %vm2874_vm5, %v2876_v47, %v2872_v16  ;;  %v3323_v19 = vpop.eup %3322 }
0x23b5   :  { %v2845_v25 = vmul.f32 %v3323_v19, %v2843_v12  ;;  %vm2850_vm1 = vweird.f32 %v3323_v19 }
0x23b6   :  { %vm2851_vm7 = vmor %vm2849_vm2, %vm2850_vm1 }
0x23b7   :  { %v2846_v28 = vsub.f32 1.0, %v2845_v25 }
0x23b9   :  { %v2847_v60 = vmul.f32 %v3323_v19, %v2846_v28 }
0x23bb   :  { %v2848_v7 = vadd.f32 %v3323_v19, %v2847_v60 }
0x23bd   :  { %v2852_v43 = vsel %vm2851_vm7, %v3323_v19, %v2848_v7 }
0x23be   :  { %v2857_v2 = vsel %vm2854_vm3, %v2856_v63, %v2852_v43 }
0x23c9   :  { %v2902_v0 = vpop.permute.xlu2 %2901 }
0x23ca   :  { %v2904_v58 = vmul.f32 %v2902_v0, %v2877_v20 }
0x23cc   :  { %2906 = vrot.lane.b32.xlu0 %v2904_v58, %s3334_s18 }
0x23d1   :  { %v2897_v32 = vpop.permute.xlu2 %2896 }
0x23d2   :  { %v2899_v59 = vmul.f32 %v2897_v32, %v2877_v20 }
0x241c   :  { %v2887_v45 = vpop.permute.xlu1 %2886 }
0x241d   :  { %v2889_v51 = vmul.f32 %v2887_v45, %v2857_v2 }
0x241f   :  { %2891 = vrot.lane.b32.xlu2 %v2889_v51, %s3334_s18 }
0x2424   :  { %v2882_v50 = vpop.permute.xlu1 %2881 }
0x2425   :  { %v2884_v15 = vmul.f32 %v2882_v50, %v2857_v2 }
0x243e   :  { %v2907_v53 = vpop.permute.xlu0 %2906 }
0x243f   :  { %v2909_v22 = vadd.f32 %v2907_v53, %v2899_v59 }
0x2441   :  { %2916 = vrot.lane.b32.xlu0 %v2909_v22, %s3335_s19 }
0x2479   :  { %v2892_v23 = vpop.permute.xlu2 %2891 }
0x247a   :  { %v2894_v21 = vadd.f32 %v2892_v23, %v2884_v15 }
0x247c   :  { %2911 = vrot.lane.b32.xlu1 %v2894_v21, %s3335_s19 }
0x24b3   :  { %v2917_v35 = vpop.permute.xlu0 %2916 }
0x24b4   :  { %v2919_v44 = vsel %vm1844_vm10, %v2917_v35, %v4529_v37 }
0x24b5   :  { %2922 = vrot.lane.b32.xlu2 %v2919_v44, %s3334_s18 }
0x24ee   :  { %v2912_v42 = vpop.permute.xlu1 %2911 }
0x24ef   :  { %v2914_v40 = vsel %vm4565_vm4, %v2912_v42, %v2779_v48 }
0x24f0   :  { %2920 = vst.msk [vmem:[%s4563_s5] sm:$0xff] %vm42_vm0, %v2914_v40 }
0x250f   :  { %v2923_v29 = vpop.permute.xlu2 %2922 }
0x2510   :  { %2926 = vst.msk [vmem:[%s4563_s5] sm:$0xff] %vm2925_vm14, %v2923_v29 }

</bundles_post_ra>
